<compile_context>
chip_gen: v7x
topology: tpu7x:2x2x1
jax: 0.10.0
libtpu: 0.0.40
codegen_flags: <defaults>
</compile_context>

<pallas_src>
import math
from functools import partial

import jax
import jax.numpy as jnp
from jax.experimental import pallas as pl
from jax.experimental.pallas import tpu as pltpu


# ----------------------------- in-kernel helpers -----------------------------

def _dot(a, w, b):
    return jnp.dot(a, w, preferred_element_type=jnp.float32) + b


def _layernorm(z, g, b, eps):
    mean = jnp.mean(z, axis=-1, keepdims=True)
    var = jnp.mean(jnp.square(z - mean), axis=-1, keepdims=True)
    return (z - mean) * jax.lax.rsqrt(var + eps) * g + b


def _attention(q, k, v, n_heads):
    """Multi-head attention for one batch element.

    q: [Lq, D] (1/sqrt(dk) already folded into the Q projection), k/v: [Lk, D].
    Heads are selected with lane masks (VPU multiplies) instead of dk-wide lane
    slices + concat, so every matmul is full-width and no relayouts are needed.
    """
    D = q.shape[-1]
    dk = D // n_heads
    lane = jax.lax.broadcasted_iota(jnp.int32, (1, D), 1)
    ctx = jnp.zeros((q.shape[0], D), jnp.float32)
    for h in range(n_heads):                         # static unroll
        m = ((lane >= h * dk) & (lane < (h + 1) * dk)).astype(jnp.float32)
        s = jax.lax.dot_general(q * m, k, (((1,), (1,)), ((), ())),
                                preferred_element_type=jnp.float32)  # [Lq, Lk]
        s = s - jnp.max(s, axis=-1, keepdims=True)
        p = jnp.exp(s)
        p = p / jnp.sum(p, axis=-1, keepdims=True)   # exact softmax
        ctx = ctx + jnp.dot(p, v * m, preferred_element_type=jnp.float32)
    return ctx


# ------------------------------ fused kernels -------------------------------

def _encoder_stack_kernel(x_ref, pe_ref, win_ref, bin_ref,
                          wq_ref, bq_ref, wk_ref, bk_ref, wv_ref, bv_ref,
                          wo_ref, bo_ref, ln1g_ref, ln1b_ref,
                          w1_ref, b1_ref, w2_ref, b2_ref, ln2g_ref, ln2b_ref,
                          o_ref, *, n_heads, eps):
    """grid = (batch, layer); the output block is the layer-to-layer carry."""
    l = pl.program_id(1)

    @pl.when(l == 0)
    def _():
        # fused input projection + sinusoidal positional encoding
        o_ref[0] = _dot(x_ref[0], win_ref[...], bin_ref[...]) + pe_ref[...]

    x = o_ref[0]                                                  # [S, D]

    # self-attention sub-block (QKV projected in-kernel)
    q = _dot(x, wq_ref[...], bq_ref[...])
    k = _dot(x, wk_ref[...], bk_ref[...])
    v = _dot(x, wv_ref[...], bv_ref[...])
    attn = _dot(_attention(q, k, v, n_heads), wo_ref[...], bo_ref[...])
    z = _layernorm(x + attn, ln1g_ref[...], ln1b_ref[...], eps)

    # feed-forward sub-block
    h = jnp.maximum(_dot(z, w1_ref[...], b1_ref[...]), 0.0)
    ff = _dot(h, w2_ref[...], b2_ref[...])
    o_ref[0] = _layernorm(z + ff, ln2g_ref[...], ln2b_ref[...], eps)


def _decoder_stack_kernel(x_ref, mem_ref,
                          swq_ref, sbq_ref, swk_ref, sbk_ref, swv_ref, sbv_ref,
                          swo_ref, sbo_ref, ln1g_ref, ln1b_ref,
                          cwq_ref, cbq_ref, cwk_ref, cbk_ref, cwv_ref, cbv_ref,
                          cwo_ref, cbo_ref, ln2g_ref, ln2b_ref,
                          w1_ref, b1_ref, w2_ref, b2_ref, ln3g_ref, ln3b_ref,
                          o_ref, *, n_heads, eps):
    l = pl.program_id(1)

    @pl.when(l == 0)
    def _():
        o_ref[0] = x_ref[0]

    x = o_ref[0]                                                  # [Lq, D]
    mem = mem_ref[0]                                              # [S,  D]

    # self-attention
    q = _dot(x, swq_ref[...], sbq_ref[...])
    k = _dot(x, swk_ref[...], sbk_ref[...])
    v = _dot(x, swv_ref[...], sbv_ref[...])
    attn = _dot(_attention(q, k, v, n_heads), swo_ref[...], sbo_ref[...])
    z1 = _layernorm(x + attn, ln1g_ref[...], ln1b_ref[...], eps)

    # cross-attention over the encoded context
    q = _dot(z1, cwq_ref[...], cbq_ref[...])
    k = _dot(mem, cwk_ref[...], cbk_ref[...])
    v = _dot(mem, cwv_ref[...], cbv_ref[...])
    attn = _dot(_attention(q, k, v, n_heads), cwo_ref[...], cbo_ref[...])
    z2 = _layernorm(z1 + attn, ln2g_ref[...], ln2b_ref[...], eps)

    # feed-forward
    h = jnp.maximum(_dot(z2, w1_ref[...], b1_ref[...]), 0.0)
    ff = _dot(h, w2_ref[...], b2_ref[...])
    o_ref[0] = _layernorm(z2 + ff, ln3g_ref[...], ln3b_ref[...], eps)


def _heads_kernel(dec_ref, tw1_ref, tb1_ref, tw2_ref, tb2_ref,
                  cw1_ref, cb1_ref, cw2_ref, cb2_ref,
                  traj_ref, conf_ref, *, horizon, n_queries):
    """Trajectory MLP + horizon-mean pooling + sigmoid confidence MLP, fused."""
    x = dec_ref[0]                                                # [T*Q, D]

    # trajectory head: Linear -> ReLU -> Linear
    h = jnp.maximum(_dot(x, tw1_ref[...], tb1_ref[...]), 0.0)
    traj_ref[0] = _dot(h, tw2_ref[...], tb2_ref[...])

    # confidence head on the mean over the horizon; pooling done with a
    # constant pooling matrix so no in-kernel reshapes / strided slices.
    tq = horizon * n_queries
    row = jax.lax.broadcasted_iota(jnp.int32, (n_queries, tq), 0)
    col = jax.lax.broadcasted_iota(jnp.int32, (n_queries, tq), 1)
    pool = jnp.where(col % n_queries == row, 1.0 / horizon, 0.0)
    pooled = jnp.dot(pool, x, preferred_element_type=jnp.float32)  # [Q, D]
    hc = jnp.maximum(_dot(pooled, cw1_ref[...], cb1_ref[...]), 0.0)
    conf_ref[0] = jax.nn.sigmoid(_dot(hc, cw2_ref[...], cb2_ref[...]))  # [Q, 1]


# ------------------------------ pallas wrappers ------------------------------

ENC_LAYER_KEYS = ("wq", "bq", "wk", "bk", "wv", "bv", "wo", "bo",
                  "ln1g", "ln1b", "w1", "b1", "w2", "b2", "ln2g", "ln2b")

DEC_LAYER_KEYS = ("swq", "sbq", "swk", "sbk", "swv", "sbv", "swo", "sbo",
                  "ln1g", "ln1b",
                  "cwq", "cbq", "cwk", "cbk", "cwv", "cbv", "cwo", "cbo",
                  "ln2g", "ln2b",
                  "w1", "b1", "w2", "b2", "ln3g", "ln3b")

HEAD_KEYS = ("tw1", "tb1", "tw2", "tb2", "cw1", "cb1", "cw2", "cb2")


def encoder_stack(x, pe_s, win, bin_, layers, n_heads, eps=1e-5):
    B, S, in_dim = x.shape
    L, _, D = layers["wq"].shape
    bcast = lambda b, l: (b, 0, 0)
    const2 = lambda b, l: (0, 0)
    per_layer = lambda b, l: (l, 0, 0)
    layer_specs = [pl.BlockSpec((None,) + layers[k].shape[1:], per_layer)
                   for k in ENC_LAYER_KEYS]
    return pl.pallas_call(
        partial(_encoder_stack_kernel, n_heads=n_heads, eps=eps),
        out_shape=jax.ShapeDtypeStruct((B, S, D), jnp.float32),
        grid=(B, L),
        in_specs=[pl.BlockSpec((1, S, in_dim), bcast),
                  pl.BlockSpec((S, D), const2),
                  pl.BlockSpec((in_dim, D), const2),
                  pl.BlockSpec((1, D), const2)] + layer_specs,
        out_specs=pl.BlockSpec((1, S, D), bcast),
        compiler_params=pltpu.CompilerParams(
            dimension_semantics=("parallel", "arbitrary")),
    )(x, pe_s, win, bin_, *[layers[k] for k in ENC_LAYER_KEYS])


def decoder_stack(x, memory, layers, n_heads, eps=1e-5):
    B, Lq, D = x.shape
    S = memory.shape[1]
    L = layers["swq"].shape[0]
    bcast = lambda b, l: (b, 0, 0)
    per_layer = lambda b, l: (l, 0, 0)
    layer_specs = [pl.BlockSpec((None,) + layers[k].shape[1:], per_layer)
                   for k in DEC_LAYER_KEYS]
    return pl.pallas_call(
        partial(_decoder_stack_kernel, n_heads=n_heads, eps=eps),
        out_shape=jax.ShapeDtypeStruct((B, Lq, D), jnp.float32),
        grid=(B, L),
        in_specs=[pl.BlockSpec((1, Lq, D), bcast),
                  pl.BlockSpec((1, S, D), bcast)] + layer_specs,
        out_specs=pl.BlockSpec((1, Lq, D), bcast),
        compiler_params=pltpu.CompilerParams(
            dimension_semantics=("parallel", "arbitrary")),
    )(x, memory, *[layers[k] for k in DEC_LAYER_KEYS])


def output_heads(dec_flat, hp, horizon, n_queries):
    B, TQ, D = dec_flat.shape
    out_dim = hp["tw2"].shape[1]
    bcast = lambda b: (b, 0, 0)
    const2 = lambda b: (0, 0)
    w_specs = [pl.BlockSpec(hp[k].shape, const2) for k in HEAD_KEYS]
    traj, conf = pl.pallas_call(
        partial(_heads_kernel, horizon=horizon, n_queries=n_queries),
        out_shape=(jax.ShapeDtypeStruct((B, TQ, out_dim), jnp.float32),
                   jax.ShapeDtypeStruct((B, n_queries, 1), jnp.float32)),
        grid=(B,),
        in_specs=[pl.BlockSpec((1, TQ, D), bcast)] + w_specs,
        out_specs=(pl.BlockSpec((1, TQ, out_dim), bcast),
                   pl.BlockSpec((1, n_queries, 1), bcast)),
        compiler_params=pltpu.CompilerParams(dimension_semantics=("parallel",)),
    )(dec_flat, *[hp[k] for k in HEAD_KEYS])
    return traj, conf


# ------------------------------- full forward --------------------------------

def motion_transformer_forward(p, x, cfg):
    B, S, _ = x.shape
    D = cfg["d_model"]
    H = cfg["n_heads"]
    T = cfg["prediction_horizon"]
    Q = cfg["n_queries"]

    # ----- context encoder: ONE pallas_call (input proj + PE + all layers) ---
    pe_s = p["pe"][:S]
    context = encoder_stack(x, pe_s, p["in_proj_w"], p["in_proj_b"], p["enc"], H)

    # ----- decoder queries (tiny broadcast/add done at XLA level) -----
    qinit = (p["query_embeddings"][None, None, :, :]
             + p["query_pos_encoding"][None, :, None, :])        # [1, T, Q, D]
    dec_in = jnp.broadcast_to(qinit, (B, T, Q, D)).reshape(B, T * Q, D)

    # ----- motion decoder: ONE pallas_call (self + cross + FFN per layer) ----
    dec = decoder_stack(dec_in, context, p["dec"], H)

    # ----- fused output heads (trajectory + pooled confidence) -----
    traj, conf = output_heads(dec, p["heads"], T, Q)

    return {
        "trajectories": traj.reshape(B, T, Q, cfg["output_dim"]),
        "confidences": conf.reshape(B, Q),
        "context_features": context,
        "query_features": dec.reshape(B, T, Q, D),
    }


# ----------------------------- parameter handling ----------------------------

class KeyGen:
    def __init__(self, key):
        self.key = key

    def __call__(self):
        self.key, sub = jax.random.split(self.key)
        return sub


def _xavier(key, fan_in, fan_out, shape=None):
    if shape is None:
        shape = (fan_in, fan_out)
    a = math.sqrt(6.0 / (fan_in + fan_out))
    return jax.random.uniform(key, shape, jnp.float32, minval=-a, maxval=a)


def sinusoid_pe(max_len, d_model):
    position = jnp.arange(max_len, dtype=jnp.float32)[:, None]
    div_term = jnp.exp(jnp.arange(0, d_model, 2, dtype=jnp.float32)
                       * (-math.log(10000.0) / d_model))
    pe = jnp.zeros((max_len, d_model), dtype=jnp.float32)
    pe = pe.at[:, 0::2].set(jnp.sin(position * div_term))
    pe = pe.at[:, 1::2].set(jnp.cos(position * div_term))
    return pe


def _init_mha(kg, D):
    return {"wq": _xavier(kg(), D, D), "bq": jnp.zeros((D,), jnp.float32),
            "wk": _xavier(kg(), D, D), "bk": jnp.zeros((D,), jnp.float32),
            "wv": _xavier(kg(), D, D), "bv": jnp.zeros((D,), jnp.float32),
            "wo": _xavier(kg(), D, D), "bo": jnp.zeros((D,), jnp.float32)}


def _init_enc_layer(kg, D, d_ff):
    return {"self_attn": _init_mha(kg, D),
            "ff_w1": _xavier(kg(), D, d_ff), "ff_b1": jnp.zeros((d_ff,), jnp.float32),
            "ff_w2": _xavier(kg(), d_ff, D), "ff_b2": jnp.zeros((D,), jnp.float32),
            "ln1_g": jnp.ones((D,), jnp.float32), "ln1_b": jnp.zeros((D,), jnp.float32),
            "ln2_g": jnp.ones((D,), jnp.float32), "ln2_b": jnp.zeros((D,), jnp.float32)}


def _init_dec_layer(kg, D, d_ff):
    return {"self_attn": _init_mha(kg, D),
            "cross_attn": _init_mha(kg, D),
            "ff_w1": _xavier(kg(), D, d_ff), "ff_b1": jnp.zeros((d_ff,), jnp.float32),
            "ff_w2": _xavier(kg(), d_ff, D), "ff_b2": jnp.zeros((D,), jnp.float32),
            "ln1_g": jnp.ones((D,), jnp.float32), "ln1_b": jnp.zeros((D,), jnp.float32),
            "ln2_g": jnp.ones((D,), jnp.float32), "ln2_b": jnp.zeros((D,), jnp.float32),
            "ln3_g": jnp.ones((D,), jnp.float32), "ln3_b": jnp.zeros((D,), jnp.float32)}


def init_params(key, cfg):
    kg = KeyGen(key)
    D = cfg["d_model"]
    return {
        "in_proj_w": _xavier(kg(), cfg["input_dim"], D),
        "in_proj_b": jnp.zeros((D,), jnp.float32),
        "pe": sinusoid_pe(cfg["max_context_len"], D),
        "enc_layers": [_init_enc_layer(kg, D, cfg["d_ff"])
                       for _ in range(cfg["encoder_layers"])],
        "dec_layers": [_init_dec_layer(kg, D, cfg["d_ff"])
                       for _ in range(cfg["decoder_layers"])],
        "query_embeddings": _xavier(kg(), D, cfg["n_queries"],
                                    shape=(cfg["n_queries"], D)),
        "query_pos_encoding": _xavier(kg(), D, cfg["prediction_horizon"],
                                      shape=(cfg["prediction_horizon"], D)),
        "traj_w1": _xavier(kg(), D, D // 2),
        "traj_b1": jnp.zeros((D // 2,), jnp.float32),
        "traj_w2": _xavier(kg(), D // 2, cfg["output_dim"]),
        "traj_b2": jnp.zeros((cfg["output_dim"],), jnp.float32),
        "conf_w1": _xavier(kg(), D, D // 4),
        "conf_b1": jnp.zeros((D // 4,), jnp.float32),
        "conf_w2": _xavier(kg(), D // 4, 1),
        "conf_b2": jnp.zeros((1,), jnp.float32),
    }


def prepare_params(raw, cfg):
    """Stack per-layer weights along a leading `layer` axis (one pallas_call per
    stack) and fold the 1/sqrt(dk) attention scale into Wq/bq.  Done once."""
    D = cfg["d_model"]
    scale = 1.0 / math.sqrt(D // cfg["n_heads"])

    def stk(fn, layers):
        return jnp.stack([fn(lp) for lp in layers], axis=0)

    def stack_attn(layers, attn_key, prefix, out):
        out[prefix + "wq"] = stk(lambda l: l[attn_key]["wq"] * scale, layers)
        out[prefix + "bq"] = stk(lambda l: (l[attn_key]["bq"] * scale)[None, :], layers)
        out[prefix + "wk"] = stk(lambda l: l[attn_key]["wk"], layers)
        out[prefix + "bk"] = stk(lambda l: l[attn_key]["bk"][None, :], layers)
        out[prefix + "wv"] = stk(lambda l: l[attn_key]["wv"], layers)
        out[prefix + "bv"] = stk(lambda l: l[attn_key]["bv"][None, :], layers)
        out[prefix + "wo"] = stk(lambda l: l[attn_key]["wo"], layers)
        out[prefix + "bo"] = stk(lambda l: l[attn_key]["bo"][None, :], layers)

    enc_layers = raw["enc_layers"]
    enc = {}
    stack_attn(enc_layers, "self_attn", "", enc)
    enc["ln1g"] = stk(lambda l: l["ln1_g"][None, :], enc_layers)
    enc["ln1b"] = stk(lambda l: l["ln1_b"][None, :], enc_layers)
    enc["w1"] = stk(lambda l: l["ff_w1"], enc_layers)
    enc["b1"] = stk(lambda l: l["ff_b1"][None, :], enc_layers)
    enc["w2"] = stk(lambda l: l["ff_w2"], enc_layers)
    enc["b2"] = stk(lambda l: l["ff_b2"][None, :], enc_layers)
    enc["ln2g"] = stk(lambda l: l["ln2_g"][None, :], enc_layers)
    enc["ln2b"] = stk(lambda l: l["ln2_b"][None, :], enc_layers)

    dec_layers = raw["dec_layers"]
    dec = {}
    stack_attn(dec_layers, "self_attn", "s", dec)
    stack_attn(dec_layers, "cross_attn", "c", dec)
    dec["ln1g"] = stk(lambda l: l["ln1_g"][None, :], dec_layers)
    dec["ln1b"] = stk(lambda l: l["ln1_b"][None, :], dec_layers)
    dec["ln2g"] = stk(lambda l: l["ln2_g"][None, :], dec_layers)
    dec["ln2b"] = stk(lambda l: l["ln2_b"][None, :], dec_layers)
    dec["w1"] = stk(lambda l: l["ff_w1"], dec_layers)
    dec["b1"] = stk(lambda l: l["ff_b1"][None, :], dec_layers)
    dec["w2"] = stk(lambda l: l["ff_w2"], dec_layers)
    dec["b2"] = stk(lambda l: l["ff_b2"][None, :], dec_layers)
    dec["ln3g"] = stk(lambda l: l["ln3_g"][None, :], dec_layers)
    dec["ln3b"] = stk(lambda l: l["ln3_b"][None, :], dec_layers)

    heads = {
        "tw1": raw["traj_w1"], "tb1": raw["traj_b1"][None, :],
        "tw2": raw["traj_w2"], "tb2": raw["traj_b2"][None, :],
        "cw1": raw["conf_w1"], "cb1": raw["conf_b1"][None, :],
        "cw2": raw["conf_w2"], "cb2": raw["conf_b2"][None, :],
    }

    return {
        "in_proj_w": raw["in_proj_w"], "in_proj_b": raw["in_proj_b"][None, :],
        "pe": raw["pe"],
        "enc": enc, "dec": dec, "heads": heads,
        "query_embeddings": raw["query_embeddings"],
        "query_pos_encoding": raw["query_pos_encoding"],
    }


# --------------------------------- main ---------------------------------

if __name__ == "__main__":
    cfg = dict(
        input_dim=4,
        d_model=32,
        n_heads=4,
        d_ff=64,
        encoder_layers=2,
        decoder_layers=2,
        n_queries=2,
        prediction_horizon=4,
        output_dim=4,
        max_context_len=100,
    )

    key = jax.random.PRNGKey(0)
    pkey, xkey = jax.random.split(key)
    raw_params = init_params(pkey, cfg)
    params = prepare_params(raw_params, cfg)

    B, S = 2, 8
    x = jax.random.normal(xkey, (B, S, cfg["input_dim"]), jnp.float32)

    # TODO(synk): dropout layers and optional attention masks are omitted
    # (eval-mode semantics, mask=None).
    fwd = jax.jit(lambda p, xx: motion_transformer_forward(p, xx, cfg))
    out = fwd(params, x)
    jax.block_until_ready(out)

    assert out["trajectories"].shape == (B, cfg["prediction_horizon"],
                                         cfg["n_queries"], cfg["output_dim"])
    assert out["confidences"].shape == (B, cfg["n_queries"])
    assert out["context_features"].shape == (B, S, cfg["d_model"])
    assert out["query_features"].shape == (B, cfg["prediction_horizon"],
                                           cfg["n_queries"], cfg["d_model"])
    assert bool(jnp.all(jnp.isfinite(out["trajectories"])))
    assert bool(jnp.all(jnp.isfinite(out["context_features"])))
    assert bool(jnp.all(jnp.isfinite(out["query_features"])))
    assert bool(jnp.all((out["confidences"] >= 0) & (out["confidences"] <= 1)))

    print("KERNEL_OK")
</pallas_src>

<mosaic_0001>
module attributes {stable_mosaic.version = 11 : i64} {
  func.func @_encoder_stack_kernel(%arg0: i32, %arg1: i32, %arg2: memref<1x8x4xf32, #tpu.memory_space<vmem>>, %arg3: memref<8x32xf32, #tpu.memory_space<vmem>>, %arg4: memref<4x32xf32, #tpu.memory_space<vmem>>, %arg5: memref<1x32xf32, #tpu.memory_space<vmem>>, %arg6: memref<1x32x32xf32, #tpu.memory_space<vmem>>, %arg7: memref<1x1x32xf32, #tpu.memory_space<vmem>>, %arg8: memref<1x32x32xf32, #tpu.memory_space<vmem>>, %arg9: memref<1x1x32xf32, #tpu.memory_space<vmem>>, %arg10: memref<1x32x32xf32, #tpu.memory_space<vmem>>, %arg11: memref<1x1x32xf32, #tpu.memory_space<vmem>>, %arg12: memref<1x32x32xf32, #tpu.memory_space<vmem>>, %arg13: memref<1x1x32xf32, #tpu.memory_space<vmem>>, %arg14: memref<1x1x32xf32, #tpu.memory_space<vmem>>, %arg15: memref<1x1x32xf32, #tpu.memory_space<vmem>>, %arg16: memref<1x32x64xf32, #tpu.memory_space<vmem>>, %arg17: memref<1x1x64xf32, #tpu.memory_space<vmem>>, %arg18: memref<1x64x32xf32, #tpu.memory_space<vmem>>, %arg19: memref<1x1x32xf32, #tpu.memory_space<vmem>>, %arg20: memref<1x1x32xf32, #tpu.memory_space<vmem>>, %arg21: memref<1x1x32xf32, #tpu.memory_space<vmem>>, %arg22: memref<1x8x32xf32, #tpu.memory_space<vmem>>) attributes {dimension_semantics = [#tpu.dimension_semantics<parallel>, #tpu.dimension_semantics<arbitrary>], iteration_bounds = array<i64: 2, 2>, scalar_prefetch = 0 : i64, scratch_operands = 0 : i64, tpu.core_type = #tpu.core_type<tc>, window_params = [{transform_indices = @transform_0, window_bounds = array<i64: 1, 8, 4>}, {pipeline_mode = #tpu.pipeline_mode<synchronous>, transform_indices = @transform_1, window_bounds = array<i64: 8, 32>}, {pipeline_mode = #tpu.pipeline_mode<synchronous>, transform_indices = @transform_2, window_bounds = array<i64: 4, 32>}, {pipeline_mode = #tpu.pipeline_mode<synchronous>, transform_indices = @transform_3, window_bounds = array<i64: 1, 32>}, {transform_indices = @transform_4, window_bounds = array<i64: 1, 32, 32>}, {transform_indices = @transform_5, window_bounds = array<i64: 1, 1, 32>}, {transform_indices = @transform_6, window_bounds = array<i64: 1, 32, 32>}, {transform_indices = @transform_7, window_bounds = array<i64: 1, 1, 32>}, {transform_indices = @transform_8, window_bounds = array<i64: 1, 32, 32>}, {transform_indices = @transform_9, window_bounds = array<i64: 1, 1, 32>}, {transform_indices = @transform_10, window_bounds = array<i64: 1, 32, 32>}, {transform_indices = @transform_11, window_bounds = array<i64: 1, 1, 32>}, {transform_indices = @transform_12, window_bounds = array<i64: 1, 1, 32>}, {transform_indices = @transform_13, window_bounds = array<i64: 1, 1, 32>}, {transform_indices = @transform_14, window_bounds = array<i64: 1, 32, 64>}, {transform_indices = @transform_15, window_bounds = array<i64: 1, 1, 64>}, {transform_indices = @transform_16, window_bounds = array<i64: 1, 64, 32>}, {transform_indices = @transform_17, window_bounds = array<i64: 1, 1, 32>}, {transform_indices = @transform_18, window_bounds = array<i64: 1, 1, 32>}, {transform_indices = @transform_19, window_bounds = array<i64: 1, 1, 32>}, {transform_indices = @transform_20, window_bounds = array<i64: 1, 8, 32>}]} {
    %c0_i32 = arith.constant 0 : i32
    %0 = arith.cmpi eq, %arg1, %c0_i32 : i32
    %1 = arith.extui %0 : i1 to i32
    %c0_i32_0 = arith.constant 0 : i32
    %2 = arith.cmpi ne, %1, %c0_i32_0 : i32
    scf.if %2 {
      %c0_91 = arith.constant 0 : index
      %c0_92 = arith.constant 0 : index
      %c0_93 = arith.constant 0 : index
      %200 = vector.load %arg2[%c0_91, %c0_92, %c0_93] : memref<1x8x4xf32, #tpu.memory_space<vmem>>, vector<1x8x4xf32>
      %201 = vector.shape_cast %200 : vector<1x8x4xf32> to vector<8x4xf32>
      %c0_94 = arith.constant 0 : index
      %c0_95 = arith.constant 0 : index
      %202 = vector.load %arg4[%c0_94, %c0_95] : memref<4x32xf32, #tpu.memory_space<vmem>>, vector<4x32xf32>
      %c0_96 = arith.constant 0 : index
      %c0_97 = arith.constant 0 : index
      %203 = vector.load %arg5[%c0_96, %c0_97] : memref<1x32xf32, #tpu.memory_space<vmem>>, vector<1x32xf32>
      %cst_98 = arith.constant dense<0.000000e+00> : vector<8x32xf32>
      %204 = tpu.matmul %201, %202, %cst_98 {dimension_numbers = #tpu.dot_dimension_numbers<[1], [0], [0], [1], [0, 0, 1, 1], [], []>} : vector<8x4xf32>, vector<4x32xf32>, vector<8x32xf32> -> vector<8x32xf32>
      %205 = vector.broadcast %203 : vector<1x32xf32> to vector<8x32xf32>
      %206 = arith.addf %204, %205 : vector<8x32xf32>
      %c0_99 = arith.constant 0 : index
      %c0_100 = arith.constant 0 : index
      %207 = vector.load %arg3[%c0_99, %c0_100] : memref<8x32xf32, #tpu.memory_space<vmem>>, vector<8x32xf32>
      %208 = arith.addf %206, %207 : vector<8x32xf32>
      %c0_101 = arith.constant 0 : index
      %c0_102 = arith.constant 0 : index
      %c0_103 = arith.constant 0 : index
      %209 = vector.load %arg22[%c0_101, %c0_102, %c0_103] : memref<1x8x32xf32, #tpu.memory_space<vmem>>, vector<1x8x32xf32>
      %210 = vector.shape_cast %209 : vector<1x8x32xf32> to vector<8x32xf32>
      %211 = vector.shape_cast %208 : vector<8x32xf32> to vector<1x8x32xf32>
      tpu.vector_store %arg22[%c0_101, %c0_102, %c0_103], %211 {strides = array<i32>} : memref<1x8x32xf32, #tpu.memory_space<vmem>>, vector<1x8x32xf32>,
    } else {
    }
    %c0 = arith.constant 0 : index
    %c0_1 = arith.constant 0 : index
    %c0_2 = arith.constant 0 : index
    %3 = vector.load %arg22[%c0, %c0_1, %c0_2] : memref<1x8x32xf32, #tpu.memory_space<vmem>>, vector<1x8x32xf32>
    %4 = vector.shape_cast %3 : vector<1x8x32xf32> to vector<8x32xf32>
    %c0_3 = arith.constant 0 : index
    %c0_4 = arith.constant 0 : index
    %c0_5 = arith.constant 0 : index
    %5 = vector.load %arg6[%c0_3, %c0_4, %c0_5] : memref<1x32x32xf32, #tpu.memory_space<vmem>>, vector<1x32x32xf32>
    %6 = vector.shape_cast %5 : vector<1x32x32xf32> to vector<32x32xf32>
    %c0_6 = arith.constant 0 : index
    %c0_7 = arith.constant 0 : index
    %c0_8 = arith.constant 0 : index
    %7 = vector.load %arg7[%c0_6, %c0_7, %c0_8] : memref<1x1x32xf32, #tpu.memory_space<vmem>>, vector<1x1x32xf32>
    %8 = vector.shape_cast %7 : vector<1x1x32xf32> to vector<1x32xf32>
    %cst = arith.constant dense<0.000000e+00> : vector<8x32xf32>
    %9 = tpu.matmul %4, %6, %cst {dimension_numbers = #tpu.dot_dimension_numbers<[1], [0], [0], [1], [0, 0, 1, 1], [], []>} : vector<8x32xf32>, vector<32x32xf32>, vector<8x32xf32> -> vector<8x32xf32>
    %10 = vector.broadcast %8 : vector<1x32xf32> to vector<8x32xf32>
    %11 = arith.addf %9, %10 : vector<8x32xf32>
    %c0_9 = arith.constant 0 : index
    %c0_10 = arith.constant 0 : index
    %c0_11 = arith.constant 0 : index
    %12 = vector.load %arg8[%c0_9, %c0_10, %c0_11] : memref<1x32x32xf32, #tpu.memory_space<vmem>>, vector<1x32x32xf32>
    %13 = vector.shape_cast %12 : vector<1x32x32xf32> to vector<32x32xf32>
    %c0_12 = arith.constant 0 : index
    %c0_13 = arith.constant 0 : index
    %c0_14 = arith.constant 0 : index
    %14 = vector.load %arg9[%c0_12, %c0_13, %c0_14] : memref<1x1x32xf32, #tpu.memory_space<vmem>>, vector<1x1x32xf32>
    %15 = vector.shape_cast %14 : vector<1x1x32xf32> to vector<1x32xf32>
    %cst_15 = arith.constant dense<0.000000e+00> : vector<8x32xf32>
    %16 = tpu.matmul %4, %13, %cst_15 {dimension_numbers = #tpu.dot_dimension_numbers<[1], [0], [0], [1], [0, 0, 1, 1], [], []>} : vector<8x32xf32>, vector<32x32xf32>, vector<8x32xf32> -> vector<8x32xf32>
    %17 = vector.broadcast %15 : vector<1x32xf32> to vector<8x32xf32>
    %18 = arith.addf %16, %17 : vector<8x32xf32>
    %c0_16 = arith.constant 0 : index
    %c0_17 = arith.constant 0 : index
    %c0_18 = arith.constant 0 : index
    %19 = vector.load %arg10[%c0_16, %c0_17, %c0_18] : memref<1x32x32xf32, #tpu.memory_space<vmem>>, vector<1x32x32xf32>
    %20 = vector.shape_cast %19 : vector<1x32x32xf32> to vector<32x32xf32>
    %c0_19 = arith.constant 0 : index
    %c0_20 = arith.constant 0 : index
    %c0_21 = arith.constant 0 : index
    %21 = vector.load %arg11[%c0_19, %c0_20, %c0_21] : memref<1x1x32xf32, #tpu.memory_space<vmem>>, vector<1x1x32xf32>
    %22 = vector.shape_cast %21 : vector<1x1x32xf32> to vector<1x32xf32>
    %cst_22 = arith.constant dense<0.000000e+00> : vector<8x32xf32>
    %23 = tpu.matmul %4, %20, %cst_22 {dimension_numbers = #tpu.dot_dimension_numbers<[1], [0], [0], [1], [0, 0, 1, 1], [], []>} : vector<8x32xf32>, vector<32x32xf32>, vector<8x32xf32> -> vector<8x32xf32>
    %24 = vector.broadcast %22 : vector<1x32xf32> to vector<8x32xf32>
    %25 = arith.addf %23, %24 : vector<8x32xf32>
    %26 = tpu.iota {dimensions = array<i32: 1>} : vector<1x32xi32>
    %cst_23 = arith.constant 0.000000e+00 : f32
    %27 = vector.broadcast %cst_23 : f32 to vector<8x32xf32>
    %c0_i32_24 = arith.constant 0 : i32
    %28 = vector.broadcast %c0_i32_24 : i32 to vector<1x32xi32>
    %29 = arith.cmpi sge, %26, %28 : vector<1x32xi32>
    %c8_i32 = arith.constant 8 : i32
    %30 = vector.broadcast %c8_i32 : i32 to vector<1x32xi32>
    %31 = arith.cmpi slt, %26, %30 : vector<1x32xi32>
    %32 = arith.andi %29, %31 : vector<1x32xi1>
    %33 = arith.extui %32 : vector<1x32xi1> to vector<1x32xi32>
    %34 = arith.sitofp %33 : vector<1x32xi32> to vector<1x32xf32>
    %35 = vector.broadcast %34 : vector<1x32xf32> to vector<8x32xf32>
    %36 = arith.mulf %11, %35 : vector<8x32xf32>
    %cst_25 = arith.constant dense<0.000000e+00> : vector<8x8xf32>
    %37 = tpu.matmul %36, %18, %cst_25 {dimension_numbers = #tpu.dot_dimension_numbers<[1], [1], [0], [0], [0, 0, 1, 0], [], []>} : vector<8x32xf32>, vector<8x32xf32>, vector<8x8xf32> -> vector<8x8xf32>
    %cst_26 = arith.constant dense<0xFF800000> : vector<8xf32>
    %38 = vector.multi_reduction <maximumf>, %37, %cst_26 [1] : vector<8x8xf32> to vector<8xf32>
    %39 = vector.shape_cast %38 : vector<8xf32> to vector<8x1xf32>
    %40 = vector.broadcast %39 : vector<8x1xf32> to vector<8x8xf32>
    %41 = arith.subf %37, %40 : vector<8x8xf32>
    %42 = math.exp %41 : vector<8x8xf32>
    %cst_27 = arith.constant dense<0.000000e+00> : vector<8xf32>
    %43 = vector.multi_reduction <add>, %42, %cst_27 [1] : vector<8x8xf32> to vector<8xf32>
    %44 = vector.shape_cast %43 : vector<8xf32> to vector<8x1xf32>
    %45 = vector.broadcast %44 : vector<8x1xf32> to vector<8x8xf32>
    %46 = arith.divf %42, %45 : vector<8x8xf32>
    %47 = vector.broadcast %34 : vector<1x32xf32> to vector<8x32xf32>
    %48 = arith.mulf %25, %47 : vector<8x32xf32>
    %cst_28 = arith.constant dense<0.000000e+00> : vector<8x32xf32>
    %49 = tpu.matmul %46, %48, %cst_28 {dimension_numbers = #tpu.dot_dimension_numbers<[1], [0], [0], [1], [0, 0, 1, 1], [], []>} : vector<8x8xf32>, vector<8x32xf32>, vector<8x32xf32> -> vector<8x32xf32>
    %50 = arith.addf %27, %49 : vector<8x32xf32>
    %c8_i32_29 = arith.constant 8 : i32
    %51 = vector.broadcast %c8_i32_29 : i32 to vector<1x32xi32>
    %52 = arith.cmpi sge, %26, %51 : vector<1x32xi32>
    %c16_i32 = arith.constant 16 : i32
    %53 = vector.broadcast %c16_i32 : i32 to vector<1x32xi32>
    %54 = arith.cmpi slt, %26, %53 : vector<1x32xi32>
    %55 = arith.andi %52, %54 : vector<1x32xi1>
    %56 = arith.extui %55 : vector<1x32xi1> to vector<1x32xi32>
    %57 = arith.sitofp %56 : vector<1x32xi32> to vector<1x32xf32>
    %58 = vector.broadcast %57 : vector<1x32xf32> to vector<8x32xf32>
    %59 = arith.mulf %11, %58 : vector<8x32xf32>
    %cst_30 = arith.constant dense<0.000000e+00> : vector<8x8xf32>
    %60 = tpu.matmul %59, %18, %cst_30 {dimension_numbers = #tpu.dot_dimension_numbers<[1], [1], [0], [0], [0, 0, 1, 0], [], []>} : vector<8x32xf32>, vector<8x32xf32>, vector<8x8xf32> -> vector<8x8xf32>
    %cst_31 = arith.constant dense<0xFF800000> : vector<8xf32>
    %61 = vector.multi_reduction <maximumf>, %60, %cst_31 [1] : vector<8x8xf32> to vector<8xf32>
    %62 = vector.shape_cast %61 : vector<8xf32> to vector<8x1xf32>
    %63 = vector.broadcast %62 : vector<8x1xf32> to vector<8x8xf32>
    %64 = arith.subf %60, %63 : vector<8x8xf32>
    %65 = math.exp %64 : vector<8x8xf32>
    %cst_32 = arith.constant dense<0.000000e+00> : vector<8xf32>
    %66 = vector.multi_reduction <add>, %65, %cst_32 [1] : vector<8x8xf32> to vector<8xf32>
    %67 = vector.shape_cast %66 : vector<8xf32> to vector<8x1xf32>
    %68 = vector.broadcast %67 : vector<8x1xf32> to vector<8x8xf32>
    %69 = arith.divf %65, %68 : vector<8x8xf32>
    %70 = vector.broadcast %57 : vector<1x32xf32> to vector<8x32xf32>
    %71 = arith.mulf %25, %70 : vector<8x32xf32>
    %cst_33 = arith.constant dense<0.000000e+00> : vector<8x32xf32>
    %72 = tpu.matmul %69, %71, %cst_33 {dimension_numbers = #tpu.dot_dimension_numbers<[1], [0], [0], [1], [0, 0, 1, 1], [], []>} : vector<8x8xf32>, vector<8x32xf32>, vector<8x32xf32> -> vector<8x32xf32>
    %73 = arith.addf %50, %72 : vector<8x32xf32>
    %c16_i32_34 = arith.constant 16 : i32
    %74 = vector.broadcast %c16_i32_34 : i32 to vector<1x32xi32>
    %75 = arith.cmpi sge, %26, %74 : vector<1x32xi32>
    %c24_i32 = arith.constant 24 : i32
    %76 = vector.broadcast %c24_i32 : i32 to vector<1x32xi32>
    %77 = arith.cmpi slt, %26, %76 : vector<1x32xi32>
    %78 = arith.andi %75, %77 : vector<1x32xi1>
    %79 = arith.extui %78 : vector<1x32xi1> to vector<1x32xi32>
    %80 = arith.sitofp %79 : vector<1x32xi32> to vector<1x32xf32>
    %81 = vector.broadcast %80 : vector<1x32xf32> to vector<8x32xf32>
    %82 = arith.mulf %11, %81 : vector<8x32xf32>
    %cst_35 = arith.constant dense<0.000000e+00> : vector<8x8xf32>
    %83 = tpu.matmul %82, %18, %cst_35 {dimension_numbers = #tpu.dot_dimension_numbers<[1], [1], [0], [0], [0, 0, 1, 0], [], []>} : vector<8x32xf32>, vector<8x32xf32>, vector<8x8xf32> -> vector<8x8xf32>
    %cst_36 = arith.constant dense<0xFF800000> : vector<8xf32>
    %84 = vector.multi_reduction <maximumf>, %83, %cst_36 [1] : vector<8x8xf32> to vector<8xf32>
    %85 = vector.shape_cast %84 : vector<8xf32> to vector<8x1xf32>
    %86 = vector.broadcast %85 : vector<8x1xf32> to vector<8x8xf32>
    %87 = arith.subf %83, %86 : vector<8x8xf32>
    %88 = math.exp %87 : vector<8x8xf32>
    %cst_37 = arith.constant dense<0.000000e+00> : vector<8xf32>
    %89 = vector.multi_reduction <add>, %88, %cst_37 [1] : vector<8x8xf32> to vector<8xf32>
    %90 = vector.shape_cast %89 : vector<8xf32> to vector<8x1xf32>
    %91 = vector.broadcast %90 : vector<8x1xf32> to vector<8x8xf32>
    %92 = arith.divf %88, %91 : vector<8x8xf32>
    %93 = vector.broadcast %80 : vector<1x32xf32> to vector<8x32xf32>
    %94 = arith.mulf %25, %93 : vector<8x32xf32>
    %cst_38 = arith.constant dense<0.000000e+00> : vector<8x32xf32>
    %95 = tpu.matmul %92, %94, %cst_38 {dimension_numbers = #tpu.dot_dimension_numbers<[1], [0], [0], [1], [0, 0, 1, 1], [], []>} : vector<8x8xf32>, vector<8x32xf32>, vector<8x32xf32> -> vector<8x32xf32>
    %96 = arith.addf %73, %95 : vector<8x32xf32>
    %c24_i32_39 = arith.constant 24 : i32
    %97 = vector.broadcast %c24_i32_39 : i32 to vector<1x32xi32>
    %98 = arith.cmpi sge, %26, %97 : vector<1x32xi32>
    %c32_i32 = arith.constant 32 : i32
    %99 = vector.broadcast %c32_i32 : i32 to vector<1x32xi32>
    %100 = arith.cmpi slt, %26, %99 : vector<1x32xi32>
    %101 = arith.andi %98, %100 : vector<1x32xi1>
    %102 = arith.extui %101 : vector<1x32xi1> to vector<1x32xi32>
    %103 = arith.sitofp %102 : vector<1x32xi32> to vector<1x32xf32>
    %104 = vector.broadcast %103 : vector<1x32xf32> to vector<8x32xf32>
    %105 = arith.mulf %11, %104 : vector<8x32xf32>
    %cst_40 = arith.constant dense<0.000000e+00> : vector<8x8xf32>
    %106 = tpu.matmul %105, %18, %cst_40 {dimension_numbers = #tpu.dot_dimension_numbers<[1], [1], [0], [0], [0, 0, 1, 0], [], []>} : vector<8x32xf32>, vector<8x32xf32>, vector<8x8xf32> -> vector<8x8xf32>
    %cst_41 = arith.constant dense<0xFF800000> : vector<8xf32>
    %107 = vector.multi_reduction <maximumf>, %106, %cst_41 [1] : vector<8x8xf32> to vector<8xf32>
    %108 = vector.shape_cast %107 : vector<8xf32> to vector<8x1xf32>
    %109 = vector.broadcast %108 : vector<8x1xf32> to vector<8x8xf32>
    %110 = arith.subf %106, %109 : vector<8x8xf32>
    %111 = math.exp %110 : vector<8x8xf32>
    %cst_42 = arith.constant dense<0.000000e+00> : vector<8xf32>
    %112 = vector.multi_reduction <add>, %111, %cst_42 [1] : vector<8x8xf32> to vector<8xf32>
    %113 = vector.shape_cast %112 : vector<8xf32> to vector<8x1xf32>
    %114 = vector.broadcast %113 : vector<8x1xf32> to vector<8x8xf32>
    %115 = arith.divf %111, %114 : vector<8x8xf32>
    %116 = vector.broadcast %103 : vector<1x32xf32> to vector<8x32xf32>
    %117 = arith.mulf %25, %116 : vector<8x32xf32>
    %cst_43 = arith.constant dense<0.000000e+00> : vector<8x32xf32>
    %118 = tpu.matmul %115, %117, %cst_43 {dimension_numbers = #tpu.dot_dimension_numbers<[1], [0], [0], [1], [0, 0, 1, 1], [], []>} : vector<8x8xf32>, vector<8x32xf32>, vector<8x32xf32> -> vector<8x32xf32>
    %119 = arith.addf %96, %118 : vector<8x32xf32>
    %c0_44 = arith.constant 0 : index
    %c0_45 = arith.constant 0 : index
    %c0_46 = arith.constant 0 : index
    %120 = vector.load %arg12[%c0_44, %c0_45, %c0_46] : memref<1x32x32xf32, #tpu.memory_space<vmem>>, vector<1x32x32xf32>
    %121 = vector.shape_cast %120 : vector<1x32x32xf32> to vector<32x32xf32>
    %c0_47 = arith.constant 0 : index
    %c0_48 = arith.constant 0 : index
    %c0_49 = arith.constant 0 : index
    %122 = vector.load %arg13[%c0_47, %c0_48, %c0_49] : memref<1x1x32xf32, #tpu.memory_space<vmem>>, vector<1x1x32xf32>
    %123 = vector.shape_cast %122 : vector<1x1x32xf32> to vector<1x32xf32>
    %cst_50 = arith.constant dense<0.000000e+00> : vector<8x32xf32>
    %124 = tpu.matmul %119, %121, %cst_50 {dimension_numbers = #tpu.dot_dimension_numbers<[1], [0], [0], [1], [0, 0, 1, 1], [], []>} : vector<8x32xf32>, vector<32x32xf32>, vector<8x32xf32> -> vector<8x32xf32>
    %125 = vector.broadcast %123 : vector<1x32xf32> to vector<8x32xf32>
    %126 = arith.addf %124, %125 : vector<8x32xf32>
    %127 = arith.addf %4, %126 : vector<8x32xf32>
    %c0_51 = arith.constant 0 : index
    %c0_52 = arith.constant 0 : index
    %c0_53 = arith.constant 0 : index
    %128 = vector.load %arg14[%c0_51, %c0_52, %c0_53] : memref<1x1x32xf32, #tpu.memory_space<vmem>>, vector<1x1x32xf32>
    %129 = vector.shape_cast %128 : vector<1x1x32xf32> to vector<1x32xf32>
    %c0_54 = arith.constant 0 : index
    %c0_55 = arith.constant 0 : index
    %c0_56 = arith.constant 0 : index
    %130 = vector.load %arg15[%c0_54, %c0_55, %c0_56] : memref<1x1x32xf32, #tpu.memory_space<vmem>>, vector<1x1x32xf32>
    %131 = vector.shape_cast %130 : vector<1x1x32xf32> to vector<1x32xf32>
    %cst_57 = arith.constant dense<0.000000e+00> : vector<8xf32>
    %132 = vector.multi_reduction <add>, %127, %cst_57 [1] : vector<8x32xf32> to vector<8xf32>
    %133 = vector.shape_cast %132 : vector<8xf32> to vector<8x1xf32>
    %cst_58 = arith.constant 3.200000e+01 : f32
    %134 = vector.broadcast %cst_58 : f32 to vector<8x1xf32>
    %135 = arith.divf %133, %134 : vector<8x1xf32>
    %136 = vector.broadcast %135 : vector<8x1xf32> to vector<8x32xf32>
    %137 = arith.subf %127, %136 : vector<8x32xf32>
    %138 = arith.mulf %137, %137 : vector<8x32xf32>
    %cst_59 = arith.constant dense<0.000000e+00> : vector<8xf32>
    %139 = vector.multi_reduction <add>, %138, %cst_59 [1] : vector<8x32xf32> to vector<8xf32>
    %140 = vector.shape_cast %139 : vector<8xf32> to vector<8x1xf32>
    %cst_60 = arith.constant 3.200000e+01 : f32
    %141 = vector.broadcast %cst_60 : f32 to vector<8x1xf32>
    %142 = arith.divf %140, %141 : vector<8x1xf32>
    %143 = vector.broadcast %135 : vector<8x1xf32> to vector<8x32xf32>
    %144 = arith.subf %127, %143 : vector<8x32xf32>
    %cst_61 = arith.constant 9.99999974E-6 : f32
    %145 = vector.broadcast %cst_61 : f32 to vector<8x1xf32>
    %146 = arith.addf %142, %145 : vector<8x1xf32>
    %147 = math.rsqrt %146 : vector<8x1xf32>
    %148 = vector.broadcast %147 : vector<8x1xf32> to vector<8x32xf32>
    %149 = arith.mulf %144, %148 : vector<8x32xf32>
    %150 = vector.broadcast %129 : vector<1x32xf32> to vector<8x32xf32>
    %151 = arith.mulf %149, %150 : vector<8x32xf32>
    %152 = vector.broadcast %131 : vector<1x32xf32> to vector<8x32xf32>
    %153 = arith.addf %151, %152 : vector<8x32xf32>
    %c0_62 = arith.constant 0 : index
    %c0_63 = arith.constant 0 : index
    %c0_64 = arith.constant 0 : index
    %154 = vector.load %arg16[%c0_62, %c0_63, %c0_64] : memref<1x32x64xf32, #tpu.memory_space<vmem>>, vector<1x32x64xf32>
    %155 = vector.shape_cast %154 : vector<1x32x64xf32> to vector<32x64xf32>
    %c0_65 = arith.constant 0 : index
    %c0_66 = arith.constant 0 : index
    %c0_67 = arith.constant 0 : index
    %156 = vector.load %arg17[%c0_65, %c0_66, %c0_67] : memref<1x1x64xf32, #tpu.memory_space<vmem>>, vector<1x1x64xf32>
    %157 = vector.shape_cast %156 : vector<1x1x64xf32> to vector<1x64xf32>
    %cst_68 = arith.constant dense<0.000000e+00> : vector<8x64xf32>
    %158 = tpu.matmul %153, %155, %cst_68 {dimension_numbers = #tpu.dot_dimension_numbers<[1], [0], [0], [1], [0, 0, 1, 1], [], []>} : vector<8x32xf32>, vector<32x64xf32>, vector<8x64xf32> -> vector<8x64xf32>
    %159 = vector.broadcast %157 : vector<1x64xf32> to vector<8x64xf32>
    %160 = arith.addf %158, %159 : vector<8x64xf32>
    %cst_69 = arith.constant 0.000000e+00 : f32
    %161 = vector.broadcast %cst_69 : f32 to vector<8x64xf32>
    %162 = arith.maximumf %160, %161 : vector<8x64xf32>
    %c0_70 = arith.constant 0 : index
    %c0_71 = arith.constant 0 : index
    %c0_72 = arith.constant 0 : index
    %163 = vector.load %arg18[%c0_70, %c0_71, %c0_72] : memref<1x64x32xf32, #tpu.memory_space<vmem>>, vector<1x64x32xf32>
    %164 = vector.shape_cast %163 : vector<1x64x32xf32> to vector<64x32xf32>
    %c0_73 = arith.constant 0 : index
    %c0_74 = arith.constant 0 : index
    %c0_75 = arith.constant 0 : index
    %165 = vector.load %arg19[%c0_73, %c0_74, %c0_75] : memref<1x1x32xf32, #tpu.memory_space<vmem>>, vector<1x1x32xf32>
    %166 = vector.shape_cast %165 : vector<1x1x32xf32> to vector<1x32xf32>
    %cst_76 = arith.constant dense<0.000000e+00> : vector<8x32xf32>
    %167 = tpu.matmul %162, %164, %cst_76 {dimension_numbers = #tpu.dot_dimension_numbers<[1], [0], [0], [1], [0, 0, 1, 1], [], []>} : vector<8x64xf32>, vector<64x32xf32>, vector<8x32xf32> -> vector<8x32xf32>
    %168 = vector.broadcast %166 : vector<1x32xf32> to vector<8x32xf32>
    %169 = arith.addf %167, %168 : vector<8x32xf32>
    %170 = arith.addf %153, %169 : vector<8x32xf32>
    %c0_77 = arith.constant 0 : index
    %c0_78 = arith.constant 0 : index
    %c0_79 = arith.constant 0 : index
    %171 = vector.load %arg20[%c0_77, %c0_78, %c0_79] : memref<1x1x32xf32, #tpu.memory_space<vmem>>, vector<1x1x32xf32>
    %172 = vector.shape_cast %171 : vector<1x1x32xf32> to vector<1x32xf32>
    %c0_80 = arith.constant 0 : index
    %c0_81 = arith.constant 0 : index
    %c0_82 = arith.constant 0 : index
    %173 = vector.load %arg21[%c0_80, %c0_81, %c0_82] : memref<1x1x32xf32, #tpu.memory_space<vmem>>, vector<1x1x32xf32>
    %174 = vector.shape_cast %173 : vector<1x1x32xf32> to vector<1x32xf32>
    %cst_83 = arith.constant dense<0.000000e+00> : vector<8xf32>
    %175 = vector.multi_reduction <add>, %170, %cst_83 [1] : vector<8x32xf32> to vector<8xf32>
    %176 = vector.shape_cast %175 : vector<8xf32> to vector<8x1xf32>
    %cst_84 = arith.constant 3.200000e+01 : f32
    %177 = vector.broadcast %cst_84 : f32 to vector<8x1xf32>
    %178 = arith.divf %176, %177 : vector<8x1xf32>
    %179 = vector.broadcast %178 : vector<8x1xf32> to vector<8x32xf32>
    %180 = arith.subf %170, %179 : vector<8x32xf32>
    %181 = arith.mulf %180, %180 : vector<8x32xf32>
    %cst_85 = arith.constant dense<0.000000e+00> : vector<8xf32>
    %182 = vector.multi_reduction <add>, %181, %cst_85 [1] : vector<8x32xf32> to vector<8xf32>
    %183 = vector.shape_cast %182 : vector<8xf32> to vector<8x1xf32>
    %cst_86 = arith.constant 3.200000e+01 : f32
    %184 = vector.broadcast %cst_86 : f32 to vector<8x1xf32>
    %185 = arith.divf %183, %184 : vector<8x1xf32>
    %186 = vector.broadcast %178 : vector<8x1xf32> to vector<8x32xf32>
    %187 = arith.subf %170, %186 : vector<8x32xf32>
    %cst_87 = arith.constant 9.99999974E-6 : f32
    %188 = vector.broadcast %cst_87 : f32 to vector<8x1xf32>
    %189 = arith.addf %185, %188 : vector<8x1xf32>
    %190 = math.rsqrt %189 : vector<8x1xf32>
    %191 = vector.broadcast %190 : vector<8x1xf32> to vector<8x32xf32>
    %192 = arith.mulf %187, %191 : vector<8x32xf32>
    %193 = vector.broadcast %172 : vector<1x32xf32> to vector<8x32xf32>
    %194 = arith.mulf %192, %193 : vector<8x32xf32>
    %195 = vector.broadcast %174 : vector<1x32xf32> to vector<8x32xf32>
    %196 = arith.addf %194, %195 : vector<8x32xf32>
    %c0_88 = arith.constant 0 : index
    %c0_89 = arith.constant 0 : index
    %c0_90 = arith.constant 0 : index
    %197 = vector.load %arg22[%c0_88, %c0_89, %c0_90] : memref<1x8x32xf32, #tpu.memory_space<vmem>>, vector<1x8x32xf32>
    %198 = vector.shape_cast %197 : vector<1x8x32xf32> to vector<8x32xf32>
    %199 = vector.shape_cast %196 : vector<8x32xf32> to vector<1x8x32xf32>
    tpu.vector_store %arg22[%c0_88, %c0_89, %c0_90], %199 {strides = array<i32>} : memref<1x8x32xf32, #tpu.memory_space<vmem>>, vector<1x8x32xf32>,
    return
  }
  func.func @transform_0(%arg0: i32, %arg1: i32) -> (i32, i32, i32) {
    %c0_i32 = arith.constant 0 : i32
    %c0_i32_0 = arith.constant 0 : i32
    %c0_i32_1 = arith.constant 0 : i32
    return %arg0, %c0_i32, %c0_i32_0 : i32, i32, i32
  }
  func.func @transform_1(%arg0: i32, %arg1: i32) -> (i32, i32) {
    %c0_i32 = arith.constant 0 : i32
    %c0_i32_0 = arith.constant 0 : i32
    %c0_i32_1 = arith.constant 0 : i32
    return %c0_i32, %c0_i32_0 : i32, i32
  }
  func.func @transform_2(%arg0: i32, %arg1: i32) -> (i32, i32) {
    %c0_i32 = arith.constant 0 : i32
    %c0_i32_0 = arith.constant 0 : i32
    %c0_i32_1 = arith.constant 0 : i32
    return %c0_i32, %c0_i32_0 : i32, i32
  }
  func.func @transform_3(%arg0: i32, %arg1: i32) -> (i32, i32) {
    %c0_i32 = arith.constant 0 : i32
    %c0_i32_0 = arith.constant 0 : i32
    %c0_i32_1 = arith.constant 0 : i32
    return %c0_i32, %c0_i32_0 : i32, i32
  }
  func.func @transform_4(%arg0: i32, %arg1: i32) -> (i32, i32, i32) {
    %c0_i32 = arith.constant 0 : i32
    %c0_i32_0 = arith.constant 0 : i32
    %c0_i32_1 = arith.constant 0 : i32
    return %arg1, %c0_i32, %c0_i32_0 : i32, i32, i32
  }
  func.func @transform_5(%arg0: i32, %arg1: i32) -> (i32, i32, i32) {
    %c0_i32 = arith.constant 0 : i32
    %c0_i32_0 = arith.constant 0 : i32
    %c0_i32_1 = arith.constant 0 : i32
    return %arg1, %c0_i32, %c0_i32_0 : i32, i32, i32
  }
  func.func @transform_6(%arg0: i32, %arg1: i32) -> (i32, i32, i32) {
    %c0_i32 = arith.constant 0 : i32
    %c0_i32_0 = arith.constant 0 : i32
    %c0_i32_1 = arith.constant 0 : i32
    return %arg1, %c0_i32, %c0_i32_0 : i32, i32, i32
  }
  func.func @transform_7(%arg0: i32, %arg1: i32) -> (i32, i32, i32) {
    %c0_i32 = arith.constant 0 : i32
    %c0_i32_0 = arith.constant 0 : i32
    %c0_i32_1 = arith.constant 0 : i32
    return %arg1, %c0_i32, %c0_i32_0 : i32, i32, i32
  }
  func.func @transform_8(%arg0: i32, %arg1: i32) -> (i32, i32, i32) {
    %c0_i32 = arith.constant 0 : i32
    %c0_i32_0 = arith.constant 0 : i32
    %c0_i32_1 = arith.constant 0 : i32
    return %arg1, %c0_i32, %c0_i32_0 : i32, i32, i32
  }
  func.func @transform_9(%arg0: i32, %arg1: i32) -> (i32, i32, i32) {
    %c0_i32 = arith.constant 0 : i32
    %c0_i32_0 = arith.constant 0 : i32
    %c0_i32_1 = arith.constant 0 : i32
    return %arg1, %c0_i32, %c0_i32_0 : i32, i32, i32
  }
  func.func @transform_10(%arg0: i32, %arg1: i32) -> (i32, i32, i32) {
    %c0_i32 = arith.constant 0 : i32
    %c0_i32_0 = arith.constant 0 : i32
    %c0_i32_1 = arith.constant 0 : i32
    return %arg1, %c0_i32, %c0_i32_0 : i32, i32, i32
  }
  func.func @transform_11(%arg0: i32, %arg1: i32) -> (i32, i32, i32) {
    %c0_i32 = arith.constant 0 : i32
    %c0_i32_0 = arith.constant 0 : i32
    %c0_i32_1 = arith.constant 0 : i32
    return %arg1, %c0_i32, %c0_i32_0 : i32, i32, i32
  }
  func.func @transform_12(%arg0: i32, %arg1: i32) -> (i32, i32, i32) {
    %c0_i32 = arith.constant 0 : i32
    %c0_i32_0 = arith.constant 0 : i32
    %c0_i32_1 = arith.constant 0 : i32
    return %arg1, %c0_i32, %c0_i32_0 : i32, i32, i32
  }
  func.func @transform_13(%arg0: i32, %arg1: i32) -> (i32, i32, i32) {
    %c0_i32 = arith.constant 0 : i32
    %c0_i32_0 = arith.constant 0 : i32
    %c0_i32_1 = arith.constant 0 : i32
    return %arg1, %c0_i32, %c0_i32_0 : i32, i32, i32
  }
  func.func @transform_14(%arg0: i32, %arg1: i32) -> (i32, i32, i32) {
    %c0_i32 = arith.constant 0 : i32
    %c0_i32_0 = arith.constant 0 : i32
    %c0_i32_1 = arith.constant 0 : i32
    return %arg1, %c0_i32, %c0_i32_0 : i32, i32, i32
  }
  func.func @transform_15(%arg0: i32, %arg1: i32) -> (i32, i32, i32) {
    %c0_i32 = arith.constant 0 : i32
    %c0_i32_0 = arith.constant 0 : i32
    %c0_i32_1 = arith.constant 0 : i32
    return %arg1, %c0_i32, %c0_i32_0 : i32, i32, i32
  }
  func.func @transform_16(%arg0: i32, %arg1: i32) -> (i32, i32, i32) {
    %c0_i32 = arith.constant 0 : i32
    %c0_i32_0 = arith.constant 0 : i32
    %c0_i32_1 = arith.constant 0 : i32
    return %arg1, %c0_i32, %c0_i32_0 : i32, i32, i32
  }
  func.func @transform_17(%arg0: i32, %arg1: i32) -> (i32, i32, i32) {
    %c0_i32 = arith.constant 0 : i32
    %c0_i32_0 = arith.constant 0 : i32
    %c0_i32_1 = arith.constant 0 : i32
    return %arg1, %c0_i32, %c0_i32_0 : i32, i32, i32
  }
  func.func @transform_18(%arg0: i32, %arg1: i32) -> (i32, i32, i32) {
    %c0_i32 = arith.constant 0 : i32
    %c0_i32_0 = arith.constant 0 : i32
    %c0_i32_1 = arith.constant 0 : i32
    return %arg1, %c0_i32, %c0_i32_0 : i32, i32, i32
  }
  func.func @transform_19(%arg0: i32, %arg1: i32) -> (i32, i32, i32) {
    %c0_i32 = arith.constant 0 : i32
    %c0_i32_0 = arith.constant 0 : i32
    %c0_i32_1 = arith.constant 0 : i32
    return %arg1, %c0_i32, %c0_i32_0 : i32, i32, i32
  }
  func.func @transform_20(%arg0: i32, %arg1: i32) -> (i32, i32, i32) {
    %c0_i32 = arith.constant 0 : i32
    %c0_i32_0 = arith.constant 0 : i32
    %c0_i32_1 = arith.constant 0 : i32
    return %arg0, %c0_i32, %c0_i32_0 : i32, i32, i32
  }
}

module attributes {stable_mosaic.version = 11 : i64} {
  func.func @_heads_kernel(%arg0: i32, %arg1: memref<1x8x32xf32, #tpu.memory_space<vmem>>, %arg2: memref<32x16xf32, #tpu.memory_space<vmem>>, %arg3: memref<1x16xf32, #tpu.memory_space<vmem>>, %arg4: memref<16x4xf32, #tpu.memory_space<vmem>>, %arg5: memref<1x4xf32, #tpu.memory_space<vmem>>, %arg6: memref<32x8xf32, #tpu.memory_space<vmem>>, %arg7: memref<1x8xf32, #tpu.memory_space<vmem>>, %arg8: memref<8x1xf32, #tpu.memory_space<vmem>>, %arg9: memref<1x1xf32, #tpu.memory_space<vmem>>, %arg10: memref<1x8x4xf32, #tpu.memory_space<vmem>>, %arg11: memref<1x2x1xf32, #tpu.memory_space<vmem>>) attributes {dimension_semantics = [#tpu.dimension_semantics<parallel>], iteration_bounds = array<i64: 2>, scalar_prefetch = 0 : i64, scratch_operands = 0 : i64, tpu.core_type = #tpu.core_type<tc>, window_params = [{transform_indices = @transform_0, window_bounds = array<i64: 1, 8, 32>}, {pipeline_mode = #tpu.pipeline_mode<synchronous>, transform_indices = @transform_1, window_bounds = array<i64: 32, 16>}, {pipeline_mode = #tpu.pipeline_mode<synchronous>, transform_indices = @transform_2, window_bounds = array<i64: 1, 16>}, {pipeline_mode = #tpu.pipeline_mode<synchronous>, transform_indices = @transform_3, window_bounds = array<i64: 16, 4>}, {pipeline_mode = #tpu.pipeline_mode<synchronous>, transform_indices = @transform_4, window_bounds = array<i64: 1, 4>}, {pipeline_mode = #tpu.pipeline_mode<synchronous>, transform_indices = @transform_5, window_bounds = array<i64: 32, 8>}, {pipeline_mode = #tpu.pipeline_mode<synchronous>, transform_indices = @transform_6, window_bounds = array<i64: 1, 8>}, {pipeline_mode = #tpu.pipeline_mode<synchronous>, transform_indices = @transform_7, window_bounds = array<i64: 8, 1>}, {pipeline_mode = #tpu.pipeline_mode<synchronous>, transform_indices = @transform_8, window_bounds = array<i64: 1, 1>}, {transform_indices = @transform_9, window_bounds = array<i64: 1, 8, 4>}, {transform_indices = @transform_10, window_bounds = array<i64: 1, 2, 1>}]} {
    %c0 = arith.constant 0 : index
    %c0_0 = arith.constant 0 : index
    %c0_1 = arith.constant 0 : index
    %0 = vector.load %arg1[%c0, %c0_0, %c0_1] : memref<1x8x32xf32, #tpu.memory_space<vmem>>, vector<1x8x32xf32>
    %1 = vector.shape_cast %0 : vector<1x8x32xf32> to vector<8x32xf32>
    %c0_2 = arith.constant 0 : index
    %c0_3 = arith.constant 0 : index
    %2 = vector.load %arg2[%c0_2, %c0_3] : memref<32x16xf32, #tpu.memory_space<vmem>>, vector<32x16xf32>
    %c0_4 = arith.constant 0 : index
    %c0_5 = arith.constant 0 : index
    %3 = vector.load %arg3[%c0_4, %c0_5] : memref<1x16xf32, #tpu.memory_space<vmem>>, vector<1x16xf32>
    %cst = arith.constant dense<0.000000e+00> : vector<8x16xf32>
    %4 = tpu.matmul %1, %2, %cst {dimension_numbers = #tpu.dot_dimension_numbers<[1], [0], [0], [1], [0, 0, 1, 1], [], []>} : vector<8x32xf32>, vector<32x16xf32>, vector<8x16xf32> -> vector<8x16xf32>
    %5 = vector.broadcast %3 : vector<1x16xf32> to vector<8x16xf32>
    %6 = arith.addf %4, %5 : vector<8x16xf32>
    %cst_6 = arith.constant 0.000000e+00 : f32
    %7 = vector.broadcast %cst_6 : f32 to vector<8x16xf32>
    %8 = arith.maximumf %6, %7 : vector<8x16xf32>
    %c0_7 = arith.constant 0 : index
    %c0_8 = arith.constant 0 : index
    %9 = vector.load %arg4[%c0_7, %c0_8] : memref<16x4xf32, #tpu.memory_space<vmem>>, vector<16x4xf32>
    %c0_9 = arith.constant 0 : index
    %c0_10 = arith.constant 0 : index
    %10 = vector.load %arg5[%c0_9, %c0_10] : memref<1x4xf32, #tpu.memory_space<vmem>>, vector<1x4xf32>
    %cst_11 = arith.constant dense<0.000000e+00> : vector<8x4xf32>
    %11 = tpu.matmul %8, %9, %cst_11 {dimension_numbers = #tpu.dot_dimension_numbers<[1], [0], [0], [1], [0, 0, 1, 1], [], []>} : vector<8x16xf32>, vector<16x4xf32>, vector<8x4xf32> -> vector<8x4xf32>
    %12 = vector.broadcast %10 : vector<1x4xf32> to vector<8x4xf32>
    %13 = arith.addf %11, %12 : vector<8x4xf32>
    %c0_12 = arith.constant 0 : index
    %c0_13 = arith.constant 0 : index
    %c0_14 = arith.constant 0 : index
    %14 = vector.load %arg10[%c0_12, %c0_13, %c0_14] : memref<1x8x4xf32, #tpu.memory_space<vmem>>, vector<1x8x4xf32>
    %15 = vector.shape_cast %14 : vector<1x8x4xf32> to vector<8x4xf32>
    %16 = vector.shape_cast %13 : vector<8x4xf32> to vector<1x8x4xf32>
    tpu.vector_store %arg10[%c0_12, %c0_13, %c0_14], %16 {strides = array<i32>} : memref<1x8x4xf32, #tpu.memory_space<vmem>>, vector<1x8x4xf32>,
    %17 = tpu.iota {dimensions = array<i32: 0>} : vector<2x8xi32>
    %18 = tpu.iota {dimensions = array<i32: 1>} : vector<2x8xi32>
    %c2_i32 = arith.constant 2 : i32
    %c0_i32 = arith.constant 0 : i32
    %19 = arith.cmpi eq, %c2_i32, %c0_i32 : i32
    %c1_i32 = arith.constant 1 : i32
    %20 = arith.select %19, %c1_i32, %c2_i32 : i32
    %21 = vector.broadcast %20 : i32 to vector<2x8xi32>
    %22 = arith.remsi %18, %21 : vector<2x8xi32>
    %c0_i32_15 = arith.constant 0 : i32
    %23 = vector.broadcast %c0_i32_15 : i32 to vector<2x8xi32>
    %24 = arith.cmpi ne, %22, %23 : vector<2x8xi32>
    %c0_i32_16 = arith.constant 0 : i32
    %25 = vector.broadcast %c0_i32_16 : i32 to vector<2x8xi32>
    %26 = arith.cmpi slt, %22, %25 : vector<2x8xi32>
    %c0_i32_17 = arith.constant 0 : i32
    %27 = arith.cmpi slt, %20, %c0_i32_17 : i32
    %28 = vector.broadcast %27 : i1 to vector<2x8xi1>
    %29 = vector.broadcast %28 : vector<2x8xi1> to vector<2x8xi1>
    %30 = arith.xori %26, %29 : vector<2x8xi1>
    %31 = arith.andi %30, %24 : vector<2x8xi1>
    %32 = vector.broadcast %20 : i32 to vector<2x8xi32>
    %33 = arith.addi %22, %32 : vector<2x8xi32>
    %34 = arith.select %31, %33, %22 : vector<2x8xi1>, vector<2x8xi32>
    %35 = arith.cmpi eq, %34, %17 : vector<2x8xi32>
    %cst_18 = arith.constant 2.500000e-01 : f32
    %cst_19 = arith.constant 0.000000e+00 : f32
    %36 = vector.broadcast %cst_18 : f32 to vector<2x8xf32>
    %37 = vector.broadcast %cst_19 : f32 to vector<2x8xf32>
    %38 = arith.select %35, %36, %37 : vector<2x8xi1>, vector<2x8xf32>
    %cst_20 = arith.constant dense<0.000000e+00> : vector<2x32xf32>
    %39 = tpu.matmul %38, %1, %cst_20 {dimension_numbers = #tpu.dot_dimension_numbers<[1], [0], [0], [1], [0, 0, 1, 1], [], []>} : vector<2x8xf32>, vector<8x32xf32>, vector<2x32xf32> -> vector<2x32xf32>
    %c0_21 = arith.constant 0 : index
    %c0_22 = arith.constant 0 : index
    %40 = vector.load %arg6[%c0_21, %c0_22] : memref<32x8xf32, #tpu.memory_space<vmem>>, vector<32x8xf32>
    %c0_23 = arith.constant 0 : index
    %c0_24 = arith.constant 0 : index
    %41 = vector.load %arg7[%c0_23, %c0_24] : memref<1x8xf32, #tpu.memory_space<vmem>>, vector<1x8xf32>
    %cst_25 = arith.constant dense<0.000000e+00> : vector<2x8xf32>
    %42 = tpu.matmul %39, %40, %cst_25 {dimension_numbers = #tpu.dot_dimension_numbers<[1], [0], [0], [1], [0, 0, 1, 1], [], []>} : vector<2x32xf32>, vector<32x8xf32>, vector<2x8xf32> -> vector<2x8xf32>
    %43 = vector.broadcast %41 : vector<1x8xf32> to vector<2x8xf32>
    %44 = arith.addf %42, %43 : vector<2x8xf32>
    %cst_26 = arith.constant 0.000000e+00 : f32
    %45 = vector.broadcast %cst_26 : f32 to vector<2x8xf32>
    %46 = arith.maximumf %44, %45 : vector<2x8xf32>
    %c0_27 = arith.constant 0 : index
    %c0_28 = arith.constant 0 : index
    %47 = vector.load %arg8[%c0_27, %c0_28] : memref<8x1xf32, #tpu.memory_space<vmem>>, vector<8x1xf32>
    %c0_29 = arith.constant 0 : index
    %c0_30 = arith.constant 0 : index
    %48 = vector.load %arg9[%c0_29, %c0_30] : memref<1x1xf32, #tpu.memory_space<vmem>>, vector<1x1xf32>
    %cst_31 = arith.constant dense<0.000000e+00> : vector<2x1xf32>
    %49 = tpu.matmul %46, %47, %cst_31 {dimension_numbers = #tpu.dot_dimension_numbers<[1], [0], [0], [1], [0, 0, 1, 1], [], []>} : vector<2x8xf32>, vector<8x1xf32>, vector<2x1xf32> -> vector<2x1xf32>
    %50 = vector.broadcast %48 : vector<1x1xf32> to vector<2x1xf32>
    %51 = arith.addf %49, %50 : vector<2x1xf32>
    %52 = arith.negf %51 : vector<2x1xf32>
    %53 = math.exp %52 : vector<2x1xf32>
    %cst_32 = arith.constant 1.000000e+00 : f32
    %54 = vector.broadcast %cst_32 : f32 to vector<2x1xf32>
    %55 = arith.addf %54, %53 : vector<2x1xf32>
    %56 = arith.divf %54, %55 : vector<2x1xf32>
    %c0_33 = arith.constant 0 : index
    %c0_34 = arith.constant 0 : index
    %c0_35 = arith.constant 0 : index
    %57 = vector.load %arg11[%c0_33, %c0_34, %c0_35] : memref<1x2x1xf32, #tpu.memory_space<vmem>>, vector<1x2x1xf32>
    %58 = vector.shape_cast %57 : vector<1x2x1xf32> to vector<2x1xf32>
    %59 = vector.shape_cast %56 : vector<2x1xf32> to vector<1x2x1xf32>
    tpu.vector_store %arg11[%c0_33, %c0_34, %c0_35], %59 {strides = array<i32>} : memref<1x2x1xf32, #tpu.memory_space<vmem>>, vector<1x2x1xf32>,
    return
  }
  func.func @transform_0(%arg0: i32) -> (i32, i32, i32) {
    %c0_i32 = arith.constant 0 : i32
    %c0_i32_0 = arith.constant 0 : i32
    %c0_i32_1 = arith.constant 0 : i32
    return %arg0, %c0_i32, %c0_i32_0 : i32, i32, i32
  }
  func.func @transform_1(%arg0: i32) -> (i32, i32) {
    %c0_i32 = arith.constant 0 : i32
    %c0_i32_0 = arith.constant 0 : i32
    %c0_i32_1 = arith.constant 0 : i32
    return %c0_i32, %c0_i32_0 : i32, i32
  }
  func.func @transform_2(%arg0: i32) -> (i32, i32) {
    %c0_i32 = arith.constant 0 : i32
    %c0_i32_0 = arith.constant 0 : i32
    %c0_i32_1 = arith.constant 0 : i32
    return %c0_i32, %c0_i32_0 : i32, i32
  }
  func.func @transform_3(%arg0: i32) -> (i32, i32) {
    %c0_i32 = arith.constant 0 : i32
    %c0_i32_0 = arith.constant 0 : i32
    %c0_i32_1 = arith.constant 0 : i32
    return %c0_i32, %c0_i32_0 : i32, i32
  }
  func.func @transform_4(%arg0: i32) -> (i32, i32) {
    %c0_i32 = arith.constant 0 : i32
    %c0_i32_0 = arith.constant 0 : i32
    %c0_i32_1 = arith.constant 0 : i32
    return %c0_i32, %c0_i32_0 : i32, i32
  }
  func.func @transform_5(%arg0: i32) -> (i32, i32) {
    %c0_i32 = arith.constant 0 : i32
    %c0_i32_0 = arith.constant 0 : i32
    %c0_i32_1 = arith.constant 0 : i32
    return %c0_i32, %c0_i32_0 : i32, i32
  }
  func.func @transform_6(%arg0: i32) -> (i32, i32) {
    %c0_i32 = arith.constant 0 : i32
    %c0_i32_0 = arith.constant 0 : i32
    %c0_i32_1 = arith.constant 0 : i32
    return %c0_i32, %c0_i32_0 : i32, i32
  }
  func.func @transform_7(%arg0: i32) -> (i32, i32) {
    %c0_i32 = arith.constant 0 : i32
    %c0_i32_0 = arith.constant 0 : i32
    %c0_i32_1 = arith.constant 0 : i32
    return %c0_i32, %c0_i32_0 : i32, i32
  }
  func.func @transform_8(%arg0: i32) -> (i32, i32) {
    %c0_i32 = arith.constant 0 : i32
    %c0_i32_0 = arith.constant 0 : i32
    %c0_i32_1 = arith.constant 0 : i32
    return %c0_i32, %c0_i32_0 : i32, i32
  }
  func.func @transform_9(%arg0: i32) -> (i32, i32, i32) {
    %c0_i32 = arith.constant 0 : i32
    %c0_i32_0 = arith.constant 0 : i32
    %c0_i32_1 = arith.constant 0 : i32
    return %arg0, %c0_i32, %c0_i32_0 : i32, i32, i32
  }
  func.func @transform_10(%arg0: i32) -> (i32, i32, i32) {
    %c0_i32 = arith.constant 0 : i32
    %c0_i32_0 = arith.constant 0 : i32
    %c0_i32_1 = arith.constant 0 : i32
    return %arg0, %c0_i32, %c0_i32_0 : i32, i32, i32
  }
}

module attributes {stable_mosaic.version = 11 : i64} {
  func.func @_decoder_stack_kernel(%arg0: i32, %arg1: i32, %arg2: memref<1x8x32xf32, #tpu.memory_space<vmem>>, %arg3: memref<1x8x32xf32, #tpu.memory_space<vmem>>, %arg4: memref<1x32x32xf32, #tpu.memory_space<vmem>>, %arg5: memref<1x1x32xf32, #tpu.memory_space<vmem>>, %arg6: memref<1x32x32xf32, #tpu.memory_space<vmem>>, %arg7: memref<1x1x32xf32, #tpu.memory_space<vmem>>, %arg8: memref<1x32x32xf32, #tpu.memory_space<vmem>>, %arg9: memref<1x1x32xf32, #tpu.memory_space<vmem>>, %arg10: memref<1x32x32xf32, #tpu.memory_space<vmem>>, %arg11: memref<1x1x32xf32, #tpu.memory_space<vmem>>, %arg12: memref<1x1x32xf32, #tpu.memory_space<vmem>>, %arg13: memref<1x1x32xf32, #tpu.memory_space<vmem>>, %arg14: memref<1x32x32xf32, #tpu.memory_space<vmem>>, %arg15: memref<1x1x32xf32, #tpu.memory_space<vmem>>, %arg16: memref<1x32x32xf32, #tpu.memory_space<vmem>>, %arg17: memref<1x1x32xf32, #tpu.memory_space<vmem>>, %arg18: memref<1x32x32xf32, #tpu.memory_space<vmem>>, %arg19: memref<1x1x32xf32, #tpu.memory_space<vmem>>, %arg20: memref<1x32x32xf32, #tpu.memory_space<vmem>>, %arg21: memref<1x1x32xf32, #tpu.memory_space<vmem>>, %arg22: memref<1x1x32xf32, #tpu.memory_space<vmem>>, %arg23: memref<1x1x32xf32, #tpu.memory_space<vmem>>, %arg24: memref<1x32x64xf32, #tpu.memory_space<vmem>>, %arg25: memref<1x1x64xf32, #tpu.memory_space<vmem>>, %arg26: memref<1x64x32xf32, #tpu.memory_space<vmem>>, %arg27: memref<1x1x32xf32, #tpu.memory_space<vmem>>, %arg28: memref<1x1x32xf32, #tpu.memory_space<vmem>>, %arg29: memref<1x1x32xf32, #tpu.memory_space<vmem>>, %arg30: memref<1x8x32xf32, #tpu.memory_space<vmem>>) attributes {dimension_semantics = [#tpu.dimension_semantics<parallel>, #tpu.dimension_semantics<arbitrary>], iteration_bounds = array<i64: 2, 2>, scalar_prefetch = 0 : i64, scratch_operands = 0 : i64, tpu.core_type = #tpu.core_type<tc>, window_params = [{transform_indices = @transform_0, window_bounds = array<i64: 1, 8, 32>}, {transform_indices = @transform_1, window_bounds = array<i64: 1, 8, 32>}, {transform_indices = @transform_2, window_bounds = array<i64: 1, 32, 32>}, {transform_indices = @transform_3, window_bounds = array<i64: 1, 1, 32>}, {transform_indices = @transform_4, window_bounds = array<i64: 1, 32, 32>}, {transform_indices = @transform_5, window_bounds = array<i64: 1, 1, 32>}, {transform_indices = @transform_6, window_bounds = array<i64: 1, 32, 32>}, {transform_indices = @transform_7, window_bounds = array<i64: 1, 1, 32>}, {transform_indices = @transform_8, window_bounds = array<i64: 1, 32, 32>}, {transform_indices = @transform_9, window_bounds = array<i64: 1, 1, 32>}, {transform_indices = @transform_10, window_bounds = array<i64: 1, 1, 32>}, {transform_indices = @transform_11, window_bounds = array<i64: 1, 1, 32>}, {transform_indices = @transform_12, window_bounds = array<i64: 1, 32, 32>}, {transform_indices = @transform_13, window_bounds = array<i64: 1, 1, 32>}, {transform_indices = @transform_14, window_bounds = array<i64: 1, 32, 32>}, {transform_indices = @transform_15, window_bounds = array<i64: 1, 1, 32>}, {transform_indices = @transform_16, window_bounds = array<i64: 1, 32, 32>}, {transform_indices = @transform_17, window_bounds = array<i64: 1, 1, 32>}, {transform_indices = @transform_18, window_bounds = array<i64: 1, 32, 32>}, {transform_indices = @transform_19, window_bounds = array<i64: 1, 1, 32>}, {transform_indices = @transform_20, window_bounds = array<i64: 1, 1, 32>}, {transform_indices = @transform_21, window_bounds = array<i64: 1, 1, 32>}, {transform_indices = @transform_22, window_bounds = array<i64: 1, 32, 64>}, {transform_indices = @transform_23, window_bounds = array<i64: 1, 1, 64>}, {transform_indices = @transform_24, window_bounds = array<i64: 1, 64, 32>}, {transform_indices = @transform_25, window_bounds = array<i64: 1, 1, 32>}, {transform_indices = @transform_26, window_bounds = array<i64: 1, 1, 32>}, {transform_indices = @transform_27, window_bounds = array<i64: 1, 1, 32>}, {transform_indices = @transform_28, window_bounds = array<i64: 1, 8, 32>}]} {
    %c0_i32 = arith.constant 0 : i32
    %0 = arith.cmpi eq, %arg1, %c0_i32 : i32
    %1 = arith.extui %0 : i1 to i32
    %c0_i32_0 = arith.constant 0 : i32
    %2 = arith.cmpi ne, %1, %c0_i32_0 : i32
    scf.if %2 {
      %c0_158 = arith.constant 0 : index
      %c0_159 = arith.constant 0 : index
      %c0_160 = arith.constant 0 : index
      %351 = vector.load %arg2[%c0_158, %c0_159, %c0_160] : memref<1x8x32xf32, #tpu.memory_space<vmem>>, vector<1x8x32xf32>
      %352 = vector.shape_cast %351 : vector<1x8x32xf32> to vector<8x32xf32>
      %c0_161 = arith.constant 0 : index
      %c0_162 = arith.constant 0 : index
      %c0_163 = arith.constant 0 : index
      %353 = vector.load %arg30[%c0_161, %c0_162, %c0_163] : memref<1x8x32xf32, #tpu.memory_space<vmem>>, vector<1x8x32xf32>
      %354 = vector.shape_cast %353 : vector<1x8x32xf32> to vector<8x32xf32>
      %355 = vector.shape_cast %352 : vector<8x32xf32> to vector<1x8x32xf32>
      tpu.vector_store %arg30[%c0_161, %c0_162, %c0_163], %355 {strides = array<i32>} : memref<1x8x32xf32, #tpu.memory_space<vmem>>, vector<1x8x32xf32>,
    } else {
    }
    %c0 = arith.constant 0 : index
    %c0_1 = arith.constant 0 : index
    %c0_2 = arith.constant 0 : index
    %3 = vector.load %arg30[%c0, %c0_1, %c0_2] : memref<1x8x32xf32, #tpu.memory_space<vmem>>, vector<1x8x32xf32>
    %4 = vector.shape_cast %3 : vector<1x8x32xf32> to vector<8x32xf32>
    %c0_3 = arith.constant 0 : index
    %c0_4 = arith.constant 0 : index
    %c0_5 = arith.constant 0 : index
    %5 = vector.load %arg3[%c0_3, %c0_4, %c0_5] : memref<1x8x32xf32, #tpu.memory_space<vmem>>, vector<1x8x32xf32>
    %6 = vector.shape_cast %5 : vector<1x8x32xf32> to vector<8x32xf32>
    %c0_6 = arith.constant 0 : index
    %c0_7 = arith.constant 0 : index
    %c0_8 = arith.constant 0 : index
    %7 = vector.load %arg4[%c0_6, %c0_7, %c0_8] : memref<1x32x32xf32, #tpu.memory_space<vmem>>, vector<1x32x32xf32>
    %8 = vector.shape_cast %7 : vector<1x32x32xf32> to vector<32x32xf32>
    %c0_9 = arith.constant 0 : index
    %c0_10 = arith.constant 0 : index
    %c0_11 = arith.constant 0 : index
    %9 = vector.load %arg5[%c0_9, %c0_10, %c0_11] : memref<1x1x32xf32, #tpu.memory_space<vmem>>, vector<1x1x32xf32>
    %10 = vector.shape_cast %9 : vector<1x1x32xf32> to vector<1x32xf32>
    %cst = arith.constant dense<0.000000e+00> : vector<8x32xf32>
    %11 = tpu.matmul %4, %8, %cst {dimension_numbers = #tpu.dot_dimension_numbers<[1], [0], [0], [1], [0, 0, 1, 1], [], []>} : vector<8x32xf32>, vector<32x32xf32>, vector<8x32xf32> -> vector<8x32xf32>
    %12 = vector.broadcast %10 : vector<1x32xf32> to vector<8x32xf32>
    %13 = arith.addf %11, %12 : vector<8x32xf32>
    %c0_12 = arith.constant 0 : index
    %c0_13 = arith.constant 0 : index
    %c0_14 = arith.constant 0 : index
    %14 = vector.load %arg6[%c0_12, %c0_13, %c0_14] : memref<1x32x32xf32, #tpu.memory_space<vmem>>, vector<1x32x32xf32>
    %15 = vector.shape_cast %14 : vector<1x32x32xf32> to vector<32x32xf32>
    %c0_15 = arith.constant 0 : index
    %c0_16 = arith.constant 0 : index
    %c0_17 = arith.constant 0 : index
    %16 = vector.load %arg7[%c0_15, %c0_16, %c0_17] : memref<1x1x32xf32, #tpu.memory_space<vmem>>, vector<1x1x32xf32>
    %17 = vector.shape_cast %16 : vector<1x1x32xf32> to vector<1x32xf32>
    %cst_18 = arith.constant dense<0.000000e+00> : vector<8x32xf32>
    %18 = tpu.matmul %4, %15, %cst_18 {dimension_numbers = #tpu.dot_dimension_numbers<[1], [0], [0], [1], [0, 0, 1, 1], [], []>} : vector<8x32xf32>, vector<32x32xf32>, vector<8x32xf32> -> vector<8x32xf32>
    %19 = vector.broadcast %17 : vector<1x32xf32> to vector<8x32xf32>
    %20 = arith.addf %18, %19 : vector<8x32xf32>
    %c0_19 = arith.constant 0 : index
    %c0_20 = arith.constant 0 : index
    %c0_21 = arith.constant 0 : index
    %21 = vector.load %arg8[%c0_19, %c0_20, %c0_21] : memref<1x32x32xf32, #tpu.memory_space<vmem>>, vector<1x32x32xf32>
    %22 = vector.shape_cast %21 : vector<1x32x32xf32> to vector<32x32xf32>
    %c0_22 = arith.constant 0 : index
    %c0_23 = arith.constant 0 : index
    %c0_24 = arith.constant 0 : index
    %23 = vector.load %arg9[%c0_22, %c0_23, %c0_24] : memref<1x1x32xf32, #tpu.memory_space<vmem>>, vector<1x1x32xf32>
    %24 = vector.shape_cast %23 : vector<1x1x32xf32> to vector<1x32xf32>
    %cst_25 = arith.constant dense<0.000000e+00> : vector<8x32xf32>
    %25 = tpu.matmul %4, %22, %cst_25 {dimension_numbers = #tpu.dot_dimension_numbers<[1], [0], [0], [1], [0, 0, 1, 1], [], []>} : vector<8x32xf32>, vector<32x32xf32>, vector<8x32xf32> -> vector<8x32xf32>
    %26 = vector.broadcast %24 : vector<1x32xf32> to vector<8x32xf32>
    %27 = arith.addf %25, %26 : vector<8x32xf32>
    %28 = tpu.iota {dimensions = array<i32: 1>} : vector<1x32xi32>
    %cst_26 = arith.constant 0.000000e+00 : f32
    %29 = vector.broadcast %cst_26 : f32 to vector<8x32xf32>
    %c0_i32_27 = arith.constant 0 : i32
    %30 = vector.broadcast %c0_i32_27 : i32 to vector<1x32xi32>
    %31 = arith.cmpi sge, %28, %30 : vector<1x32xi32>
    %c8_i32 = arith.constant 8 : i32
    %32 = vector.broadcast %c8_i32 : i32 to vector<1x32xi32>
    %33 = arith.cmpi slt, %28, %32 : vector<1x32xi32>
    %34 = arith.andi %31, %33 : vector<1x32xi1>
    %35 = arith.extui %34 : vector<1x32xi1> to vector<1x32xi32>
    %36 = arith.sitofp %35 : vector<1x32xi32> to vector<1x32xf32>
    %37 = vector.broadcast %36 : vector<1x32xf32> to vector<8x32xf32>
    %38 = arith.mulf %13, %37 : vector<8x32xf32>
    %cst_28 = arith.constant dense<0.000000e+00> : vector<8x8xf32>
    %39 = tpu.matmul %38, %20, %cst_28 {dimension_numbers = #tpu.dot_dimension_numbers<[1], [1], [0], [0], [0, 0, 1, 0], [], []>} : vector<8x32xf32>, vector<8x32xf32>, vector<8x8xf32> -> vector<8x8xf32>
    %cst_29 = arith.constant dense<0xFF800000> : vector<8xf32>
    %40 = vector.multi_reduction <maximumf>, %39, %cst_29 [1] : vector<8x8xf32> to vector<8xf32>
    %41 = vector.shape_cast %40 : vector<8xf32> to vector<8x1xf32>
    %42 = vector.broadcast %41 : vector<8x1xf32> to vector<8x8xf32>
    %43 = arith.subf %39, %42 : vector<8x8xf32>
    %44 = math.exp %43 : vector<8x8xf32>
    %cst_30 = arith.constant dense<0.000000e+00> : vector<8xf32>
    %45 = vector.multi_reduction <add>, %44, %cst_30 [1] : vector<8x8xf32> to vector<8xf32>
    %46 = vector.shape_cast %45 : vector<8xf32> to vector<8x1xf32>
    %47 = vector.broadcast %46 : vector<8x1xf32> to vector<8x8xf32>
    %48 = arith.divf %44, %47 : vector<8x8xf32>
    %49 = vector.broadcast %36 : vector<1x32xf32> to vector<8x32xf32>
    %50 = arith.mulf %27, %49 : vector<8x32xf32>
    %cst_31 = arith.constant dense<0.000000e+00> : vector<8x32xf32>
    %51 = tpu.matmul %48, %50, %cst_31 {dimension_numbers = #tpu.dot_dimension_numbers<[1], [0], [0], [1], [0, 0, 1, 1], [], []>} : vector<8x8xf32>, vector<8x32xf32>, vector<8x32xf32> -> vector<8x32xf32>
    %52 = arith.addf %29, %51 : vector<8x32xf32>
    %c8_i32_32 = arith.constant 8 : i32
    %53 = vector.broadcast %c8_i32_32 : i32 to vector<1x32xi32>
    %54 = arith.cmpi sge, %28, %53 : vector<1x32xi32>
    %c16_i32 = arith.constant 16 : i32
    %55 = vector.broadcast %c16_i32 : i32 to vector<1x32xi32>
    %56 = arith.cmpi slt, %28, %55 : vector<1x32xi32>
    %57 = arith.andi %54, %56 : vector<1x32xi1>
    %58 = arith.extui %57 : vector<1x32xi1> to vector<1x32xi32>
    %59 = arith.sitofp %58 : vector<1x32xi32> to vector<1x32xf32>
    %60 = vector.broadcast %59 : vector<1x32xf32> to vector<8x32xf32>
    %61 = arith.mulf %13, %60 : vector<8x32xf32>
    %cst_33 = arith.constant dense<0.000000e+00> : vector<8x8xf32>
    %62 = tpu.matmul %61, %20, %cst_33 {dimension_numbers = #tpu.dot_dimension_numbers<[1], [1], [0], [0], [0, 0, 1, 0], [], []>} : vector<8x32xf32>, vector<8x32xf32>, vector<8x8xf32> -> vector<8x8xf32>
    %cst_34 = arith.constant dense<0xFF800000> : vector<8xf32>
    %63 = vector.multi_reduction <maximumf>, %62, %cst_34 [1] : vector<8x8xf32> to vector<8xf32>
    %64 = vector.shape_cast %63 : vector<8xf32> to vector<8x1xf32>
    %65 = vector.broadcast %64 : vector<8x1xf32> to vector<8x8xf32>
    %66 = arith.subf %62, %65 : vector<8x8xf32>
    %67 = math.exp %66 : vector<8x8xf32>
    %cst_35 = arith.constant dense<0.000000e+00> : vector<8xf32>
    %68 = vector.multi_reduction <add>, %67, %cst_35 [1] : vector<8x8xf32> to vector<8xf32>
    %69 = vector.shape_cast %68 : vector<8xf32> to vector<8x1xf32>
    %70 = vector.broadcast %69 : vector<8x1xf32> to vector<8x8xf32>
    %71 = arith.divf %67, %70 : vector<8x8xf32>
    %72 = vector.broadcast %59 : vector<1x32xf32> to vector<8x32xf32>
    %73 = arith.mulf %27, %72 : vector<8x32xf32>
    %cst_36 = arith.constant dense<0.000000e+00> : vector<8x32xf32>
    %74 = tpu.matmul %71, %73, %cst_36 {dimension_numbers = #tpu.dot_dimension_numbers<[1], [0], [0], [1], [0, 0, 1, 1], [], []>} : vector<8x8xf32>, vector<8x32xf32>, vector<8x32xf32> -> vector<8x32xf32>
    %75 = arith.addf %52, %74 : vector<8x32xf32>
    %c16_i32_37 = arith.constant 16 : i32
    %76 = vector.broadcast %c16_i32_37 : i32 to vector<1x32xi32>
    %77 = arith.cmpi sge, %28, %76 : vector<1x32xi32>
    %c24_i32 = arith.constant 24 : i32
    %78 = vector.broadcast %c24_i32 : i32 to vector<1x32xi32>
    %79 = arith.cmpi slt, %28, %78 : vector<1x32xi32>
    %80 = arith.andi %77, %79 : vector<1x32xi1>
    %81 = arith.extui %80 : vector<1x32xi1> to vector<1x32xi32>
    %82 = arith.sitofp %81 : vector<1x32xi32> to vector<1x32xf32>
    %83 = vector.broadcast %82 : vector<1x32xf32> to vector<8x32xf32>
    %84 = arith.mulf %13, %83 : vector<8x32xf32>
    %cst_38 = arith.constant dense<0.000000e+00> : vector<8x8xf32>
    %85 = tpu.matmul %84, %20, %cst_38 {dimension_numbers = #tpu.dot_dimension_numbers<[1], [1], [0], [0], [0, 0, 1, 0], [], []>} : vector<8x32xf32>, vector<8x32xf32>, vector<8x8xf32> -> vector<8x8xf32>
    %cst_39 = arith.constant dense<0xFF800000> : vector<8xf32>
    %86 = vector.multi_reduction <maximumf>, %85, %cst_39 [1] : vector<8x8xf32> to vector<8xf32>
    %87 = vector.shape_cast %86 : vector<8xf32> to vector<8x1xf32>
    %88 = vector.broadcast %87 : vector<8x1xf32> to vector<8x8xf32>
    %89 = arith.subf %85, %88 : vector<8x8xf32>
    %90 = math.exp %89 : vector<8x8xf32>
    %cst_40 = arith.constant dense<0.000000e+00> : vector<8xf32>
    %91 = vector.multi_reduction <add>, %90, %cst_40 [1] : vector<8x8xf32> to vector<8xf32>
    %92 = vector.shape_cast %91 : vector<8xf32> to vector<8x1xf32>
    %93 = vector.broadcast %92 : vector<8x1xf32> to vector<8x8xf32>
    %94 = arith.divf %90, %93 : vector<8x8xf32>
    %95 = vector.broadcast %82 : vector<1x32xf32> to vector<8x32xf32>
    %96 = arith.mulf %27, %95 : vector<8x32xf32>
    %cst_41 = arith.constant dense<0.000000e+00> : vector<8x32xf32>
    %97 = tpu.matmul %94, %96, %cst_41 {dimension_numbers = #tpu.dot_dimension_numbers<[1], [0], [0], [1], [0, 0, 1, 1], [], []>} : vector<8x8xf32>, vector<8x32xf32>, vector<8x32xf32> -> vector<8x32xf32>
    %98 = arith.addf %75, %97 : vector<8x32xf32>
    %c24_i32_42 = arith.constant 24 : i32
    %99 = vector.broadcast %c24_i32_42 : i32 to vector<1x32xi32>
    %100 = arith.cmpi sge, %28, %99 : vector<1x32xi32>
    %c32_i32 = arith.constant 32 : i32
    %101 = vector.broadcast %c32_i32 : i32 to vector<1x32xi32>
    %102 = arith.cmpi slt, %28, %101 : vector<1x32xi32>
    %103 = arith.andi %100, %102 : vector<1x32xi1>
    %104 = arith.extui %103 : vector<1x32xi1> to vector<1x32xi32>
    %105 = arith.sitofp %104 : vector<1x32xi32> to vector<1x32xf32>
    %106 = vector.broadcast %105 : vector<1x32xf32> to vector<8x32xf32>
    %107 = arith.mulf %13, %106 : vector<8x32xf32>
    %cst_43 = arith.constant dense<0.000000e+00> : vector<8x8xf32>
    %108 = tpu.matmul %107, %20, %cst_43 {dimension_numbers = #tpu.dot_dimension_numbers<[1], [1], [0], [0], [0, 0, 1, 0], [], []>} : vector<8x32xf32>, vector<8x32xf32>, vector<8x8xf32> -> vector<8x8xf32>
    %cst_44 = arith.constant dense<0xFF800000> : vector<8xf32>
    %109 = vector.multi_reduction <maximumf>, %108, %cst_44 [1] : vector<8x8xf32> to vector<8xf32>
    %110 = vector.shape_cast %109 : vector<8xf32> to vector<8x1xf32>
    %111 = vector.broadcast %110 : vector<8x1xf32> to vector<8x8xf32>
    %112 = arith.subf %108, %111 : vector<8x8xf32>
    %113 = math.exp %112 : vector<8x8xf32>
    %cst_45 = arith.constant dense<0.000000e+00> : vector<8xf32>
    %114 = vector.multi_reduction <add>, %113, %cst_45 [1] : vector<8x8xf32> to vector<8xf32>
    %115 = vector.shape_cast %114 : vector<8xf32> to vector<8x1xf32>
    %116 = vector.broadcast %115 : vector<8x1xf32> to vector<8x8xf32>
    %117 = arith.divf %113, %116 : vector<8x8xf32>
    %118 = vector.broadcast %105 : vector<1x32xf32> to vector<8x32xf32>
    %119 = arith.mulf %27, %118 : vector<8x32xf32>
    %cst_46 = arith.constant dense<0.000000e+00> : vector<8x32xf32>
    %120 = tpu.matmul %117, %119, %cst_46 {dimension_numbers = #tpu.dot_dimension_numbers<[1], [0], [0], [1], [0, 0, 1, 1], [], []>} : vector<8x8xf32>, vector<8x32xf32>, vector<8x32xf32> -> vector<8x32xf32>
    %121 = arith.addf %98, %120 : vector<8x32xf32>
    %c0_47 = arith.constant 0 : index
    %c0_48 = arith.constant 0 : index
    %c0_49 = arith.constant 0 : index
    %122 = vector.load %arg10[%c0_47, %c0_48, %c0_49] : memref<1x32x32xf32, #tpu.memory_space<vmem>>, vector<1x32x32xf32>
    %123 = vector.shape_cast %122 : vector<1x32x32xf32> to vector<32x32xf32>
    %c0_50 = arith.constant 0 : index
    %c0_51 = arith.constant 0 : index
    %c0_52 = arith.constant 0 : index
    %124 = vector.load %arg11[%c0_50, %c0_51, %c0_52] : memref<1x1x32xf32, #tpu.memory_space<vmem>>, vector<1x1x32xf32>
    %125 = vector.shape_cast %124 : vector<1x1x32xf32> to vector<1x32xf32>
    %cst_53 = arith.constant dense<0.000000e+00> : vector<8x32xf32>
    %126 = tpu.matmul %121, %123, %cst_53 {dimension_numbers = #tpu.dot_dimension_numbers<[1], [0], [0], [1], [0, 0, 1, 1], [], []>} : vector<8x32xf32>, vector<32x32xf32>, vector<8x32xf32> -> vector<8x32xf32>
    %127 = vector.broadcast %125 : vector<1x32xf32> to vector<8x32xf32>
    %128 = arith.addf %126, %127 : vector<8x32xf32>
    %129 = arith.addf %4, %128 : vector<8x32xf32>
    %c0_54 = arith.constant 0 : index
    %c0_55 = arith.constant 0 : index
    %c0_56 = arith.constant 0 : index
    %130 = vector.load %arg12[%c0_54, %c0_55, %c0_56] : memref<1x1x32xf32, #tpu.memory_space<vmem>>, vector<1x1x32xf32>
    %131 = vector.shape_cast %130 : vector<1x1x32xf32> to vector<1x32xf32>
    %c0_57 = arith.constant 0 : index
    %c0_58 = arith.constant 0 : index
    %c0_59 = arith.constant 0 : index
    %132 = vector.load %arg13[%c0_57, %c0_58, %c0_59] : memref<1x1x32xf32, #tpu.memory_space<vmem>>, vector<1x1x32xf32>
    %133 = vector.shape_cast %132 : vector<1x1x32xf32> to vector<1x32xf32>
    %cst_60 = arith.constant dense<0.000000e+00> : vector<8xf32>
    %134 = vector.multi_reduction <add>, %129, %cst_60 [1] : vector<8x32xf32> to vector<8xf32>
    %135 = vector.shape_cast %134 : vector<8xf32> to vector<8x1xf32>
    %cst_61 = arith.constant 3.200000e+01 : f32
    %136 = vector.broadcast %cst_61 : f32 to vector<8x1xf32>
    %137 = arith.divf %135, %136 : vector<8x1xf32>
    %138 = vector.broadcast %137 : vector<8x1xf32> to vector<8x32xf32>
    %139 = arith.subf %129, %138 : vector<8x32xf32>
    %140 = arith.mulf %139, %139 : vector<8x32xf32>
    %cst_62 = arith.constant dense<0.000000e+00> : vector<8xf32>
    %141 = vector.multi_reduction <add>, %140, %cst_62 [1] : vector<8x32xf32> to vector<8xf32>
    %142 = vector.shape_cast %141 : vector<8xf32> to vector<8x1xf32>
    %cst_63 = arith.constant 3.200000e+01 : f32
    %143 = vector.broadcast %cst_63 : f32 to vector<8x1xf32>
    %144 = arith.divf %142, %143 : vector<8x1xf32>
    %145 = vector.broadcast %137 : vector<8x1xf32> to vector<8x32xf32>
    %146 = arith.subf %129, %145 : vector<8x32xf32>
    %cst_64 = arith.constant 9.99999974E-6 : f32
    %147 = vector.broadcast %cst_64 : f32 to vector<8x1xf32>
    %148 = arith.addf %144, %147 : vector<8x1xf32>
    %149 = math.rsqrt %148 : vector<8x1xf32>
    %150 = vector.broadcast %149 : vector<8x1xf32> to vector<8x32xf32>
    %151 = arith.mulf %146, %150 : vector<8x32xf32>
    %152 = vector.broadcast %131 : vector<1x32xf32> to vector<8x32xf32>
    %153 = arith.mulf %151, %152 : vector<8x32xf32>
    %154 = vector.broadcast %133 : vector<1x32xf32> to vector<8x32xf32>
    %155 = arith.addf %153, %154 : vector<8x32xf32>
    %c0_65 = arith.constant 0 : index
    %c0_66 = arith.constant 0 : index
    %c0_67 = arith.constant 0 : index
    %156 = vector.load %arg14[%c0_65, %c0_66, %c0_67] : memref<1x32x32xf32, #tpu.memory_space<vmem>>, vector<1x32x32xf32>
    %157 = vector.shape_cast %156 : vector<1x32x32xf32> to vector<32x32xf32>
    %c0_68 = arith.constant 0 : index
    %c0_69 = arith.constant 0 : index
    %c0_70 = arith.constant 0 : index
    %158 = vector.load %arg15[%c0_68, %c0_69, %c0_70] : memref<1x1x32xf32, #tpu.memory_space<vmem>>, vector<1x1x32xf32>
    %159 = vector.shape_cast %158 : vector<1x1x32xf32> to vector<1x32xf32>
    %cst_71 = arith.constant dense<0.000000e+00> : vector<8x32xf32>
    %160 = tpu.matmul %155, %157, %cst_71 {dimension_numbers = #tpu.dot_dimension_numbers<[1], [0], [0], [1], [0, 0, 1, 1], [], []>} : vector<8x32xf32>, vector<32x32xf32>, vector<8x32xf32> -> vector<8x32xf32>
    %161 = vector.broadcast %159 : vector<1x32xf32> to vector<8x32xf32>
    %162 = arith.addf %160, %161 : vector<8x32xf32>
    %c0_72 = arith.constant 0 : index
    %c0_73 = arith.constant 0 : index
    %c0_74 = arith.constant 0 : index
    %163 = vector.load %arg16[%c0_72, %c0_73, %c0_74] : memref<1x32x32xf32, #tpu.memory_space<vmem>>, vector<1x32x32xf32>
    %164 = vector.shape_cast %163 : vector<1x32x32xf32> to vector<32x32xf32>
    %c0_75 = arith.constant 0 : index
    %c0_76 = arith.constant 0 : index
    %c0_77 = arith.constant 0 : index
    %165 = vector.load %arg17[%c0_75, %c0_76, %c0_77] : memref<1x1x32xf32, #tpu.memory_space<vmem>>, vector<1x1x32xf32>
    %166 = vector.shape_cast %165 : vector<1x1x32xf32> to vector<1x32xf32>
    %cst_78 = arith.constant dense<0.000000e+00> : vector<8x32xf32>
    %167 = tpu.matmul %6, %164, %cst_78 {dimension_numbers = #tpu.dot_dimension_numbers<[1], [0], [0], [1], [0, 0, 1, 1], [], []>} : vector<8x32xf32>, vector<32x32xf32>, vector<8x32xf32> -> vector<8x32xf32>
    %168 = vector.broadcast %166 : vector<1x32xf32> to vector<8x32xf32>
    %169 = arith.addf %167, %168 : vector<8x32xf32>
    %c0_79 = arith.constant 0 : index
    %c0_80 = arith.constant 0 : index
    %c0_81 = arith.constant 0 : index
    %170 = vector.load %arg18[%c0_79, %c0_80, %c0_81] : memref<1x32x32xf32, #tpu.memory_space<vmem>>, vector<1x32x32xf32>
    %171 = vector.shape_cast %170 : vector<1x32x32xf32> to vector<32x32xf32>
    %c0_82 = arith.constant 0 : index
    %c0_83 = arith.constant 0 : index
    %c0_84 = arith.constant 0 : index
    %172 = vector.load %arg19[%c0_82, %c0_83, %c0_84] : memref<1x1x32xf32, #tpu.memory_space<vmem>>, vector<1x1x32xf32>
    %173 = vector.shape_cast %172 : vector<1x1x32xf32> to vector<1x32xf32>
    %cst_85 = arith.constant dense<0.000000e+00> : vector<8x32xf32>
    %174 = tpu.matmul %6, %171, %cst_85 {dimension_numbers = #tpu.dot_dimension_numbers<[1], [0], [0], [1], [0, 0, 1, 1], [], []>} : vector<8x32xf32>, vector<32x32xf32>, vector<8x32xf32> -> vector<8x32xf32>
    %175 = vector.broadcast %173 : vector<1x32xf32> to vector<8x32xf32>
    %176 = arith.addf %174, %175 : vector<8x32xf32>
    %177 = tpu.iota {dimensions = array<i32: 1>} : vector<1x32xi32>
    %cst_86 = arith.constant 0.000000e+00 : f32
    %178 = vector.broadcast %cst_86 : f32 to vector<8x32xf32>
    %c0_i32_87 = arith.constant 0 : i32
    %179 = vector.broadcast %c0_i32_87 : i32 to vector<1x32xi32>
    %180 = arith.cmpi sge, %177, %179 : vector<1x32xi32>
    %c8_i32_88 = arith.constant 8 : i32
    %181 = vector.broadcast %c8_i32_88 : i32 to vector<1x32xi32>
    %182 = arith.cmpi slt, %177, %181 : vector<1x32xi32>
    %183 = arith.andi %180, %182 : vector<1x32xi1>
    %184 = arith.extui %183 : vector<1x32xi1> to vector<1x32xi32>
    %185 = arith.sitofp %184 : vector<1x32xi32> to vector<1x32xf32>
    %186 = vector.broadcast %185 : vector<1x32xf32> to vector<8x32xf32>
    %187 = arith.mulf %162, %186 : vector<8x32xf32>
    %cst_89 = arith.constant dense<0.000000e+00> : vector<8x8xf32>
    %188 = tpu.matmul %187, %169, %cst_89 {dimension_numbers = #tpu.dot_dimension_numbers<[1], [1], [0], [0], [0, 0, 1, 0], [], []>} : vector<8x32xf32>, vector<8x32xf32>, vector<8x8xf32> -> vector<8x8xf32>
    %cst_90 = arith.constant dense<0xFF800000> : vector<8xf32>
    %189 = vector.multi_reduction <maximumf>, %188, %cst_90 [1] : vector<8x8xf32> to vector<8xf32>
    %190 = vector.shape_cast %189 : vector<8xf32> to vector<8x1xf32>
    %191 = vector.broadcast %190 : vector<8x1xf32> to vector<8x8xf32>
    %192 = arith.subf %188, %191 : vector<8x8xf32>
    %193 = math.exp %192 : vector<8x8xf32>
    %cst_91 = arith.constant dense<0.000000e+00> : vector<8xf32>
    %194 = vector.multi_reduction <add>, %193, %cst_91 [1] : vector<8x8xf32> to vector<8xf32>
    %195 = vector.shape_cast %194 : vector<8xf32> to vector<8x1xf32>
    %196 = vector.broadcast %195 : vector<8x1xf32> to vector<8x8xf32>
    %197 = arith.divf %193, %196 : vector<8x8xf32>
    %198 = vector.broadcast %185 : vector<1x32xf32> to vector<8x32xf32>
    %199 = arith.mulf %176, %198 : vector<8x32xf32>
    %cst_92 = arith.constant dense<0.000000e+00> : vector<8x32xf32>
    %200 = tpu.matmul %197, %199, %cst_92 {dimension_numbers = #tpu.dot_dimension_numbers<[1], [0], [0], [1], [0, 0, 1, 1], [], []>} : vector<8x8xf32>, vector<8x32xf32>, vector<8x32xf32> -> vector<8x32xf32>
    %201 = arith.addf %178, %200 : vector<8x32xf32>
    %c8_i32_93 = arith.constant 8 : i32
    %202 = vector.broadcast %c8_i32_93 : i32 to vector<1x32xi32>
    %203 = arith.cmpi sge, %177, %202 : vector<1x32xi32>
    %c16_i32_94 = arith.constant 16 : i32
    %204 = vector.broadcast %c16_i32_94 : i32 to vector<1x32xi32>
    %205 = arith.cmpi slt, %177, %204 : vector<1x32xi32>
    %206 = arith.andi %203, %205 : vector<1x32xi1>
    %207 = arith.extui %206 : vector<1x32xi1> to vector<1x32xi32>
    %208 = arith.sitofp %207 : vector<1x32xi32> to vector<1x32xf32>
    %209 = vector.broadcast %208 : vector<1x32xf32> to vector<8x32xf32>
    %210 = arith.mulf %162, %209 : vector<8x32xf32>
    %cst_95 = arith.constant dense<0.000000e+00> : vector<8x8xf32>
    %211 = tpu.matmul %210, %169, %cst_95 {dimension_numbers = #tpu.dot_dimension_numbers<[1], [1], [0], [0], [0, 0, 1, 0], [], []>} : vector<8x32xf32>, vector<8x32xf32>, vector<8x8xf32> -> vector<8x8xf32>
    %cst_96 = arith.constant dense<0xFF800000> : vector<8xf32>
    %212 = vector.multi_reduction <maximumf>, %211, %cst_96 [1] : vector<8x8xf32> to vector<8xf32>
    %213 = vector.shape_cast %212 : vector<8xf32> to vector<8x1xf32>
    %214 = vector.broadcast %213 : vector<8x1xf32> to vector<8x8xf32>
    %215 = arith.subf %211, %214 : vector<8x8xf32>
    %216 = math.exp %215 : vector<8x8xf32>
    %cst_97 = arith.constant dense<0.000000e+00> : vector<8xf32>
    %217 = vector.multi_reduction <add>, %216, %cst_97 [1] : vector<8x8xf32> to vector<8xf32>
    %218 = vector.shape_cast %217 : vector<8xf32> to vector<8x1xf32>
    %219 = vector.broadcast %218 : vector<8x1xf32> to vector<8x8xf32>
    %220 = arith.divf %216, %219 : vector<8x8xf32>
    %221 = vector.broadcast %208 : vector<1x32xf32> to vector<8x32xf32>
    %222 = arith.mulf %176, %221 : vector<8x32xf32>
    %cst_98 = arith.constant dense<0.000000e+00> : vector<8x32xf32>
    %223 = tpu.matmul %220, %222, %cst_98 {dimension_numbers = #tpu.dot_dimension_numbers<[1], [0], [0], [1], [0, 0, 1, 1], [], []>} : vector<8x8xf32>, vector<8x32xf32>, vector<8x32xf32> -> vector<8x32xf32>
    %224 = arith.addf %201, %223 : vector<8x32xf32>
    %c16_i32_99 = arith.constant 16 : i32
    %225 = vector.broadcast %c16_i32_99 : i32 to vector<1x32xi32>
    %226 = arith.cmpi sge, %177, %225 : vector<1x32xi32>
    %c24_i32_100 = arith.constant 24 : i32
    %227 = vector.broadcast %c24_i32_100 : i32 to vector<1x32xi32>
    %228 = arith.cmpi slt, %177, %227 : vector<1x32xi32>
    %229 = arith.andi %226, %228 : vector<1x32xi1>
    %230 = arith.extui %229 : vector<1x32xi1> to vector<1x32xi32>
    %231 = arith.sitofp %230 : vector<1x32xi32> to vector<1x32xf32>
    %232 = vector.broadcast %231 : vector<1x32xf32> to vector<8x32xf32>
    %233 = arith.mulf %162, %232 : vector<8x32xf32>
    %cst_101 = arith.constant dense<0.000000e+00> : vector<8x8xf32>
    %234 = tpu.matmul %233, %169, %cst_101 {dimension_numbers = #tpu.dot_dimension_numbers<[1], [1], [0], [0], [0, 0, 1, 0], [], []>} : vector<8x32xf32>, vector<8x32xf32>, vector<8x8xf32> -> vector<8x8xf32>
    %cst_102 = arith.constant dense<0xFF800000> : vector<8xf32>
    %235 = vector.multi_reduction <maximumf>, %234, %cst_102 [1] : vector<8x8xf32> to vector<8xf32>
    %236 = vector.shape_cast %235 : vector<8xf32> to vector<8x1xf32>
    %237 = vector.broadcast %236 : vector<8x1xf32> to vector<8x8xf32>
    %238 = arith.subf %234, %237 : vector<8x8xf32>
    %239 = math.exp %238 : vector<8x8xf32>
    %cst_103 = arith.constant dense<0.000000e+00> : vector<8xf32>
    %240 = vector.multi_reduction <add>, %239, %cst_103 [1] : vector<8x8xf32> to vector<8xf32>
    %241 = vector.shape_cast %240 : vector<8xf32> to vector<8x1xf32>
    %242 = vector.broadcast %241 : vector<8x1xf32> to vector<8x8xf32>
    %243 = arith.divf %239, %242 : vector<8x8xf32>
    %244 = vector.broadcast %231 : vector<1x32xf32> to vector<8x32xf32>
    %245 = arith.mulf %176, %244 : vector<8x32xf32>
    %cst_104 = arith.constant dense<0.000000e+00> : vector<8x32xf32>
    %246 = tpu.matmul %243, %245, %cst_104 {dimension_numbers = #tpu.dot_dimension_numbers<[1], [0], [0], [1], [0, 0, 1, 1], [], []>} : vector<8x8xf32>, vector<8x32xf32>, vector<8x32xf32> -> vector<8x32xf32>
    %247 = arith.addf %224, %246 : vector<8x32xf32>
    %c24_i32_105 = arith.constant 24 : i32
    %248 = vector.broadcast %c24_i32_105 : i32 to vector<1x32xi32>
    %249 = arith.cmpi sge, %177, %248 : vector<1x32xi32>
    %c32_i32_106 = arith.constant 32 : i32
    %250 = vector.broadcast %c32_i32_106 : i32 to vector<1x32xi32>
    %251 = arith.cmpi slt, %177, %250 : vector<1x32xi32>
    %252 = arith.andi %249, %251 : vector<1x32xi1>
    %253 = arith.extui %252 : vector<1x32xi1> to vector<1x32xi32>
    %254 = arith.sitofp %253 : vector<1x32xi32> to vector<1x32xf32>
    %255 = vector.broadcast %254 : vector<1x32xf32> to vector<8x32xf32>
    %256 = arith.mulf %162, %255 : vector<8x32xf32>
    %cst_107 = arith.constant dense<0.000000e+00> : vector<8x8xf32>
    %257 = tpu.matmul %256, %169, %cst_107 {dimension_numbers = #tpu.dot_dimension_numbers<[1], [1], [0], [0], [0, 0, 1, 0], [], []>} : vector<8x32xf32>, vector<8x32xf32>, vector<8x8xf32> -> vector<8x8xf32>
    %cst_108 = arith.constant dense<0xFF800000> : vector<8xf32>
    %258 = vector.multi_reduction <maximumf>, %257, %cst_108 [1] : vector<8x8xf32> to vector<8xf32>
    %259 = vector.shape_cast %258 : vector<8xf32> to vector<8x1xf32>
    %260 = vector.broadcast %259 : vector<8x1xf32> to vector<8x8xf32>
    %261 = arith.subf %257, %260 : vector<8x8xf32>
    %262 = math.exp %261 : vector<8x8xf32>
    %cst_109 = arith.constant dense<0.000000e+00> : vector<8xf32>
    %263 = vector.multi_reduction <add>, %262, %cst_109 [1] : vector<8x8xf32> to vector<8xf32>
    %264 = vector.shape_cast %263 : vector<8xf32> to vector<8x1xf32>
    %265 = vector.broadcast %264 : vector<8x1xf32> to vector<8x8xf32>
    %266 = arith.divf %262, %265 : vector<8x8xf32>
    %267 = vector.broadcast %254 : vector<1x32xf32> to vector<8x32xf32>
    %268 = arith.mulf %176, %267 : vector<8x32xf32>
    %cst_110 = arith.constant dense<0.000000e+00> : vector<8x32xf32>
    %269 = tpu.matmul %266, %268, %cst_110 {dimension_numbers = #tpu.dot_dimension_numbers<[1], [0], [0], [1], [0, 0, 1, 1], [], []>} : vector<8x8xf32>, vector<8x32xf32>, vector<8x32xf32> -> vector<8x32xf32>
    %270 = arith.addf %247, %269 : vector<8x32xf32>
    %c0_111 = arith.constant 0 : index
    %c0_112 = arith.constant 0 : index
    %c0_113 = arith.constant 0 : index
    %271 = vector.load %arg20[%c0_111, %c0_112, %c0_113] : memref<1x32x32xf32, #tpu.memory_space<vmem>>, vector<1x32x32xf32>
    %272 = vector.shape_cast %271 : vector<1x32x32xf32> to vector<32x32xf32>
    %c0_114 = arith.constant 0 : index
    %c0_115 = arith.constant 0 : index
    %c0_116 = arith.constant 0 : index
    %273 = vector.load %arg21[%c0_114, %c0_115, %c0_116] : memref<1x1x32xf32, #tpu.memory_space<vmem>>, vector<1x1x32xf32>
    %274 = vector.shape_cast %273 : vector<1x1x32xf32> to vector<1x32xf32>
    %cst_117 = arith.constant dense<0.000000e+00> : vector<8x32xf32>
    %275 = tpu.matmul %270, %272, %cst_117 {dimension_numbers = #tpu.dot_dimension_numbers<[1], [0], [0], [1], [0, 0, 1, 1], [], []>} : vector<8x32xf32>, vector<32x32xf32>, vector<8x32xf32> -> vector<8x32xf32>
    %276 = vector.broadcast %274 : vector<1x32xf32> to vector<8x32xf32>
    %277 = arith.addf %275, %276 : vector<8x32xf32>
    %278 = arith.addf %155, %277 : vector<8x32xf32>
    %c0_118 = arith.constant 0 : index
    %c0_119 = arith.constant 0 : index
    %c0_120 = arith.constant 0 : index
    %279 = vector.load %arg22[%c0_118, %c0_119, %c0_120] : memref<1x1x32xf32, #tpu.memory_space<vmem>>, vector<1x1x32xf32>
    %280 = vector.shape_cast %279 : vector<1x1x32xf32> to vector<1x32xf32>
    %c0_121 = arith.constant 0 : index
    %c0_122 = arith.constant 0 : index
    %c0_123 = arith.constant 0 : index
    %281 = vector.load %arg23[%c0_121, %c0_122, %c0_123] : memref<1x1x32xf32, #tpu.memory_space<vmem>>, vector<1x1x32xf32>
    %282 = vector.shape_cast %281 : vector<1x1x32xf32> to vector<1x32xf32>
    %cst_124 = arith.constant dense<0.000000e+00> : vector<8xf32>
    %283 = vector.multi_reduction <add>, %278, %cst_124 [1] : vector<8x32xf32> to vector<8xf32>
    %284 = vector.shape_cast %283 : vector<8xf32> to vector<8x1xf32>
    %cst_125 = arith.constant 3.200000e+01 : f32
    %285 = vector.broadcast %cst_125 : f32 to vector<8x1xf32>
    %286 = arith.divf %284, %285 : vector<8x1xf32>
    %287 = vector.broadcast %286 : vector<8x1xf32> to vector<8x32xf32>
    %288 = arith.subf %278, %287 : vector<8x32xf32>
    %289 = arith.mulf %288, %288 : vector<8x32xf32>
    %cst_126 = arith.constant dense<0.000000e+00> : vector<8xf32>
    %290 = vector.multi_reduction <add>, %289, %cst_126 [1] : vector<8x32xf32> to vector<8xf32>
    %291 = vector.shape_cast %290 : vector<8xf32> to vector<8x1xf32>
    %cst_127 = arith.constant 3.200000e+01 : f32
    %292 = vector.broadcast %cst_127 : f32 to vector<8x1xf32>
    %293 = arith.divf %291, %292 : vector<8x1xf32>
    %294 = vector.broadcast %286 : vector<8x1xf32> to vector<8x32xf32>
    %295 = arith.subf %278, %294 : vector<8x32xf32>
    %cst_128 = arith.constant 9.99999974E-6 : f32
    %296 = vector.broadcast %cst_128 : f32 to vector<8x1xf32>
    %297 = arith.addf %293, %296 : vector<8x1xf32>
    %298 = math.rsqrt %297 : vector<8x1xf32>
    %299 = vector.broadcast %298 : vector<8x1xf32> to vector<8x32xf32>
    %300 = arith.mulf %295, %299 : vector<8x32xf32>
    %301 = vector.broadcast %280 : vector<1x32xf32> to vector<8x32xf32>
    %302 = arith.mulf %300, %301 : vector<8x32xf32>
    %303 = vector.broadcast %282 : vector<1x32xf32> to vector<8x32xf32>
    %304 = arith.addf %302, %303 : vector<8x32xf32>
    %c0_129 = arith.constant 0 : index
    %c0_130 = arith.constant 0 : index
    %c0_131 = arith.constant 0 : index
    %305 = vector.load %arg24[%c0_129, %c0_130, %c0_131] : memref<1x32x64xf32, #tpu.memory_space<vmem>>, vector<1x32x64xf32>
    %306 = vector.shape_cast %305 : vector<1x32x64xf32> to vector<32x64xf32>
    %c0_132 = arith.constant 0 : index
    %c0_133 = arith.constant 0 : index
    %c0_134 = arith.constant 0 : index
    %307 = vector.load %arg25[%c0_132, %c0_133, %c0_134] : memref<1x1x64xf32, #tpu.memory_space<vmem>>, vector<1x1x64xf32>
    %308 = vector.shape_cast %307 : vector<1x1x64xf32> to vector<1x64xf32>
    %cst_135 = arith.constant dense<0.000000e+00> : vector<8x64xf32>
    %309 = tpu.matmul %304, %306, %cst_135 {dimension_numbers = #tpu.dot_dimension_numbers<[1], [0], [0], [1], [0, 0, 1, 1], [], []>} : vector<8x32xf32>, vector<32x64xf32>, vector<8x64xf32> -> vector<8x64xf32>
    %310 = vector.broadcast %308 : vector<1x64xf32> to vector<8x64xf32>
    %311 = arith.addf %309, %310 : vector<8x64xf32>
    %cst_136 = arith.constant 0.000000e+00 : f32
    %312 = vector.broadcast %cst_136 : f32 to vector<8x64xf32>
    %313 = arith.maximumf %311, %312 : vector<8x64xf32>
    %c0_137 = arith.constant 0 : index
    %c0_138 = arith.constant 0 : index
    %c0_139 = arith.constant 0 : index
    %314 = vector.load %arg26[%c0_137, %c0_138, %c0_139] : memref<1x64x32xf32, #tpu.memory_space<vmem>>, vector<1x64x32xf32>
    %315 = vector.shape_cast %314 : vector<1x64x32xf32> to vector<64x32xf32>
    %c0_140 = arith.constant 0 : index
    %c0_141 = arith.constant 0 : index
    %c0_142 = arith.constant 0 : index
    %316 = vector.load %arg27[%c0_140, %c0_141, %c0_142] : memref<1x1x32xf32, #tpu.memory_space<vmem>>, vector<1x1x32xf32>
    %317 = vector.shape_cast %316 : vector<1x1x32xf32> to vector<1x32xf32>
    %cst_143 = arith.constant dense<0.000000e+00> : vector<8x32xf32>
    %318 = tpu.matmul %313, %315, %cst_143 {dimension_numbers = #tpu.dot_dimension_numbers<[1], [0], [0], [1], [0, 0, 1, 1], [], []>} : vector<8x64xf32>, vector<64x32xf32>, vector<8x32xf32> -> vector<8x32xf32>
    %319 = vector.broadcast %317 : vector<1x32xf32> to vector<8x32xf32>
    %320 = arith.addf %318, %319 : vector<8x32xf32>
    %321 = arith.addf %304, %320 : vector<8x32xf32>
    %c0_144 = arith.constant 0 : index
    %c0_145 = arith.constant 0 : index
    %c0_146 = arith.constant 0 : index
    %322 = vector.load %arg28[%c0_144, %c0_145, %c0_146] : memref<1x1x32xf32, #tpu.memory_space<vmem>>, vector<1x1x32xf32>
    %323 = vector.shape_cast %322 : vector<1x1x32xf32> to vector<1x32xf32>
    %c0_147 = arith.constant 0 : index
    %c0_148 = arith.constant 0 : index
    %c0_149 = arith.constant 0 : index
    %324 = vector.load %arg29[%c0_147, %c0_148, %c0_149] : memref<1x1x32xf32, #tpu.memory_space<vmem>>, vector<1x1x32xf32>
    %325 = vector.shape_cast %324 : vector<1x1x32xf32> to vector<1x32xf32>
    %cst_150 = arith.constant dense<0.000000e+00> : vector<8xf32>
    %326 = vector.multi_reduction <add>, %321, %cst_150 [1] : vector<8x32xf32> to vector<8xf32>
    %327 = vector.shape_cast %326 : vector<8xf32> to vector<8x1xf32>
    %cst_151 = arith.constant 3.200000e+01 : f32
    %328 = vector.broadcast %cst_151 : f32 to vector<8x1xf32>
    %329 = arith.divf %327, %328 : vector<8x1xf32>
    %330 = vector.broadcast %329 : vector<8x1xf32> to vector<8x32xf32>
    %331 = arith.subf %321, %330 : vector<8x32xf32>
    %332 = arith.mulf %331, %331 : vector<8x32xf32>
    %cst_152 = arith.constant dense<0.000000e+00> : vector<8xf32>
    %333 = vector.multi_reduction <add>, %332, %cst_152 [1] : vector<8x32xf32> to vector<8xf32>
    %334 = vector.shape_cast %333 : vector<8xf32> to vector<8x1xf32>
    %cst_153 = arith.constant 3.200000e+01 : f32
    %335 = vector.broadcast %cst_153 : f32 to vector<8x1xf32>
    %336 = arith.divf %334, %335 : vector<8x1xf32>
    %337 = vector.broadcast %329 : vector<8x1xf32> to vector<8x32xf32>
    %338 = arith.subf %321, %337 : vector<8x32xf32>
    %cst_154 = arith.constant 9.99999974E-6 : f32
    %339 = vector.broadcast %cst_154 : f32 to vector<8x1xf32>
    %340 = arith.addf %336, %339 : vector<8x1xf32>
    %341 = math.rsqrt %340 : vector<8x1xf32>
    %342 = vector.broadcast %341 : vector<8x1xf32> to vector<8x32xf32>
    %343 = arith.mulf %338, %342 : vector<8x32xf32>
    %344 = vector.broadcast %323 : vector<1x32xf32> to vector<8x32xf32>
    %345 = arith.mulf %343, %344 : vector<8x32xf32>
    %346 = vector.broadcast %325 : vector<1x32xf32> to vector<8x32xf32>
    %347 = arith.addf %345, %346 : vector<8x32xf32>
    %c0_155 = arith.constant 0 : index
    %c0_156 = arith.constant 0 : index
    %c0_157 = arith.constant 0 : index
    %348 = vector.load %arg30[%c0_155, %c0_156, %c0_157] : memref<1x8x32xf32, #tpu.memory_space<vmem>>, vector<1x8x32xf32>
    %349 = vector.shape_cast %348 : vector<1x8x32xf32> to vector<8x32xf32>
    %350 = vector.shape_cast %347 : vector<8x32xf32> to vector<1x8x32xf32>
    tpu.vector_store %arg30[%c0_155, %c0_156, %c0_157], %350 {strides = array<i32>} : memref<1x8x32xf32, #tpu.memory_space<vmem>>, vector<1x8x32xf32>,
    return
  }
  func.func @transform_0(%arg0: i32, %arg1: i32) -> (i32, i32, i32) {
    %c0_i32 = arith.constant 0 : i32
    %c0_i32_0 = arith.constant 0 : i32
    %c0_i32_1 = arith.constant 0 : i32
    return %arg0, %c0_i32, %c0_i32_0 : i32, i32, i32
  }
  func.func @transform_1(%arg0: i32, %arg1: i32) -> (i32, i32, i32) {
    %c0_i32 = arith.constant 0 : i32
    %c0_i32_0 = arith.constant 0 : i32
    %c0_i32_1 = arith.constant 0 : i32
    return %arg0, %c0_i32, %c0_i32_0 : i32, i32, i32
  }
  func.func @transform_2(%arg0: i32, %arg1: i32) -> (i32, i32, i32) {
    %c0_i32 = arith.constant 0 : i32
    %c0_i32_0 = arith.constant 0 : i32
    %c0_i32_1 = arith.constant 0 : i32
    return %arg1, %c0_i32, %c0_i32_0 : i32, i32, i32
  }
  func.func @transform_3(%arg0: i32, %arg1: i32) -> (i32, i32, i32) {
    %c0_i32 = arith.constant 0 : i32
    %c0_i32_0 = arith.constant 0 : i32
    %c0_i32_1 = arith.constant 0 : i32
    return %arg1, %c0_i32, %c0_i32_0 : i32, i32, i32
  }
  func.func @transform_4(%arg0: i32, %arg1: i32) -> (i32, i32, i32) {
    %c0_i32 = arith.constant 0 : i32
    %c0_i32_0 = arith.constant 0 : i32
    %c0_i32_1 = arith.constant 0 : i32
    return %arg1, %c0_i32, %c0_i32_0 : i32, i32, i32
  }
  func.func @transform_5(%arg0: i32, %arg1: i32) -> (i32, i32, i32) {
    %c0_i32 = arith.constant 0 : i32
    %c0_i32_0 = arith.constant 0 : i32
    %c0_i32_1 = arith.constant 0 : i32
    return %arg1, %c0_i32, %c0_i32_0 : i32, i32, i32
  }
  func.func @transform_6(%arg0: i32, %arg1: i32) -> (i32, i32, i32) {
    %c0_i32 = arith.constant 0 : i32
    %c0_i32_0 = arith.constant 0 : i32
    %c0_i32_1 = arith.constant 0 : i32
    return %arg1, %c0_i32, %c0_i32_0 : i32, i32, i32
  }
  func.func @transform_7(%arg0: i32, %arg1: i32) -> (i32, i32, i32) {
    %c0_i32 = arith.constant 0 : i32
    %c0_i32_0 = arith.constant 0 : i32
    %c0_i32_1 = arith.constant 0 : i32
    return %arg1, %c0_i32, %c0_i32_0 : i32, i32, i32
  }
  func.func @transform_8(%arg0: i32, %arg1: i32) -> (i32, i32, i32) {
    %c0_i32 = arith.constant 0 : i32
    %c0_i32_0 = arith.constant 0 : i32
    %c0_i32_1 = arith.constant 0 : i32
    return %arg1, %c0_i32, %c0_i32_0 : i32, i32, i32
  }
  func.func @transform_9(%arg0: i32, %arg1: i32) -> (i32, i32, i32) {
    %c0_i32 = arith.constant 0 : i32
    %c0_i32_0 = arith.constant 0 : i32
    %c0_i32_1 = arith.constant 0 : i32
    return %arg1, %c0_i32, %c0_i32_0 : i32, i32, i32
  }
  func.func @transform_10(%arg0: i32, %arg1: i32) -> (i32, i32, i32) {
    %c0_i32 = arith.constant 0 : i32
    %c0_i32_0 = arith.constant 0 : i32
    %c0_i32_1 = arith.constant 0 : i32
    return %arg1, %c0_i32, %c0_i32_0 : i32, i32, i32
  }
  func.func @transform_11(%arg0: i32, %arg1: i32) -> (i32, i32, i32) {
    %c0_i32 = arith.constant 0 : i32
    %c0_i32_0 = arith.constant 0 : i32
    %c0_i32_1 = arith.constant 0 : i32
    return %arg1, %c0_i32, %c0_i32_0 : i32, i32, i32
  }
  func.func @transform_12(%arg0: i32, %arg1: i32) -> (i32, i32, i32) {
    %c0_i32 = arith.constant 0 : i32
    %c0_i32_0 = arith.constant 0 : i32
    %c0_i32_1 = arith.constant 0 : i32
    return %arg1, %c0_i32, %c0_i32_0 : i32, i32, i32
  }
  func.func @transform_13(%arg0: i32, %arg1: i32) -> (i32, i32, i32) {
    %c0_i32 = arith.constant 0 : i32
    %c0_i32_0 = arith.constant 0 : i32
    %c0_i32_1 = arith.constant 0 : i32
    return %arg1, %c0_i32, %c0_i32_0 : i32, i32, i32
  }
  func.func @transform_14(%arg0: i32, %arg1: i32) -> (i32, i32, i32) {
    %c0_i32 = arith.constant 0 : i32
    %c0_i32_0 = arith.constant 0 : i32
    %c0_i32_1 = arith.constant 0 : i32
    return %arg1, %c0_i32, %c0_i32_0 : i32, i32, i32
  }
  func.func @transform_15(%arg0: i32, %arg1: i32) -> (i32, i32, i32) {
    %c0_i32 = arith.constant 0 : i32
    %c0_i32_0 = arith.constant 0 : i32
    %c0_i32_1 = arith.constant 0 : i32
    return %arg1, %c0_i32, %c0_i32_0 : i32, i32, i32
  }
  func.func @transform_16(%arg0: i32, %arg1: i32) -> (i32, i32, i32) {
    %c0_i32 = arith.constant 0 : i32
    %c0_i32_0 = arith.constant 0 : i32
    %c0_i32_1 = arith.constant 0 : i32
    return %arg1, %c0_i32, %c0_i32_0 : i32, i32, i32
  }
  func.func @transform_17(%arg0: i32, %arg1: i32) -> (i32, i32, i32) {
    %c0_i32 = arith.constant 0 : i32
    %c0_i32_0 = arith.constant 0 : i32
    %c0_i32_1 = arith.constant 0 : i32
    return %arg1, %c0_i32, %c0_i32_0 : i32, i32, i32
  }
  func.func @transform_18(%arg0: i32, %arg1: i32) -> (i32, i32, i32) {
    %c0_i32 = arith.constant 0 : i32
    %c0_i32_0 = arith.constant 0 : i32
    %c0_i32_1 = arith.constant 0 : i32
    return %arg1, %c0_i32, %c0_i32_0 : i32, i32, i32
  }
  func.func @transform_19(%arg0: i32, %arg1: i32) -> (i32, i32, i32) {
    %c0_i32 = arith.constant 0 : i32
    %c0_i32_0 = arith.constant 0 : i32
    %c0_i32_1 = arith.constant 0 : i32
    return %arg1, %c0_i32, %c0_i32_0 : i32, i32, i32
  }
  func.func @transform_20(%arg0: i32, %arg1: i32) -> (i32, i32, i32) {
    %c0_i32 = arith.constant 0 : i32
    %c0_i32_0 = arith.constant 0 : i32
    %c0_i32_1 = arith.constant 0 : i32
    return %arg1, %c0_i32, %c0_i32_0 : i32, i32, i32
  }
  func.func @transform_21(%arg0: i32, %arg1: i32) -> (i32, i32, i32) {
    %c0_i32 = arith.constant 0 : i32
    %c0_i32_0 = arith.constant 0 : i32
    %c0_i32_1 = arith.constant 0 : i32
    return %arg1, %c0_i32, %c0_i32_0 : i32, i32, i32
  }
  func.func @transform_22(%arg0: i32, %arg1: i32) -> (i32, i32, i32) {
    %c0_i32 = arith.constant 0 : i32
    %c0_i32_0 = arith.constant 0 : i32
    %c0_i32_1 = arith.constant 0 : i32
    return %arg1, %c0_i32, %c0_i32_0 : i32, i32, i32
  }
  func.func @transform_23(%arg0: i32, %arg1: i32) -> (i32, i32, i32) {
    %c0_i32 = arith.constant 0 : i32
    %c0_i32_0 = arith.constant 0 : i32
    %c0_i32_1 = arith.constant 0 : i32
    return %arg1, %c0_i32, %c0_i32_0 : i32, i32, i32
  }
  func.func @transform_24(%arg0: i32, %arg1: i32) -> (i32, i32, i32) {
    %c0_i32 = arith.constant 0 : i32
    %c0_i32_0 = arith.constant 0 : i32
    %c0_i32_1 = arith.constant 0 : i32
    return %arg1, %c0_i32, %c0_i32_0 : i32, i32, i32
  }
  func.func @transform_25(%arg0: i32, %arg1: i32) -> (i32, i32, i32) {
    %c0_i32 = arith.constant 0 : i32
    %c0_i32_0 = arith.constant 0 : i32
    %c0_i32_1 = arith.constant 0 : i32
    return %arg1, %c0_i32, %c0_i32_0 : i32, i32, i32
  }
  func.func @transform_26(%arg0: i32, %arg1: i32) -> (i32, i32, i32) {
    %c0_i32 = arith.constant 0 : i32
    %c0_i32_0 = arith.constant 0 : i32
    %c0_i32_1 = arith.constant 0 : i32
    return %arg1, %c0_i32, %c0_i32_0 : i32, i32, i32
  }
  func.func @transform_27(%arg0: i32, %arg1: i32) -> (i32, i32, i32) {
    %c0_i32 = arith.constant 0 : i32
    %c0_i32_0 = arith.constant 0 : i32
    %c0_i32_1 = arith.constant 0 : i32
    return %arg1, %c0_i32, %c0_i32_0 : i32, i32, i32
  }
  func.func @transform_28(%arg0: i32, %arg1: i32) -> (i32, i32, i32) {
    %c0_i32 = arith.constant 0 : i32
    %c0_i32_0 = arith.constant 0 : i32
    %c0_i32_1 = arith.constant 0 : i32
    return %arg0, %c0_i32, %c0_i32_0 : i32, i32, i32
  }
}

</mosaic_0001>

<bundles_post_ra>
// kernel: _lambda_.5
= control target key start
LH: loop header
LB: loop body
LE: loop exit
PB: predicated region body
PF: predicated region fallthrough
CT: control target
= control target key end

     0   :  { %s1326_s0 = inlined_call_operand.vmem [shape: f32[2,8,32], index: 0, kind: input, shape index: {}]   ;;  %s1327_s1 = inlined_call_operand.vmem [shape: f32[32,16], index: 1, kind: input, shape index: {}]   ;;  %s1328_s2 = inlined_call_operand.vmem [shape: f32[1,16], index: 2, kind: input, shape index: {}]   ;;  %s1329_s3 = inlined_call_operand.vmem [shape: f32[16,4], index: 3, kind: input, shape index: {}]   ;;  %s1330_s4 = inlined_call_operand.vmem [shape: f32[1,4], index: 4, kind: input, shape index: {}]   ;;  %s1331_s5 = inlined_call_operand.vmem [shape: f32[32,8], index: 5, kind: input, shape index: {}]   ;;  %s1332_s6 = inlined_call_operand.vmem [shape: f32[1,8], index: 6, kind: input, shape index: {}]   ;;  %s1333_s7 = inlined_call_operand.vmem [shape: f32[8,1], index: 7, kind: input, shape index: {}]   ;;  %s1334_s8 = inlined_call_operand.<no memory space> [shape: f32[1,1], index: 8, kind: input, shape index: {}]   ;;  %s1335_s9 = inlined_call_operand.hbm [shape: f32[2,8,4], index: 9, kind: output, shape index: {0}]   ;;  %s1336_s10 = inlined_call_operand.vmem [shape: f32[2,2,1], index: 10, kind: output, shape index: {1}]  }
   0x1   :  { %1337 = sst [smem:[#allocation6_spill]] %s1326_s0  ;;  %v16_v0 = vstv %s1334_s8 }
   0x2   :  { %17 = vst [vmem:[#allocation2] sm:$0x1] %v16_v0 }
   0x3   :  { %18 = vsyncpa [#allocation4], 0 }
   0x4   :  { %20 = vsyncpa [#allocation4 + $0x1], 0  ;;  %s1174_s15 = smov 0   ;;  %s1176_s16 = smov 0  }
   0x5   :  { %s1178_s17 = smov 0   ;;  %s1180_s18 = smov 0  }
   0x6 LB: > { %s1195_s8 = sadd.s32 4294967295, %s1110_s18   ;;  %s910_s19 = sadd.s32 4294967294, %s1110_s18   ;;  %s1110_s18 = sphi %s1180_s18, %s1344_s18   ;;  %s1106_s17 = sphi %s1178_s17, %s1343_s17   ;;  %s1102_s16 = sphi %s1176_s16, %s1342_s16   ;;  %s1098_s15 = sphi %s1174_s15, %s1341_s15  }
   0x7   : > { %s1199_s20 = sadd.s32 1, %s1110_s18   ;;  %s227_s21 = sadd.s32 1, %s1106_s17 }
   0x8   : > { %s224_s22 = ssub.s32 %s1110_s18, %s1199_s20  ;;  %p237_p0 = scmp.ne.s32.totalorder %s1106_s17, %s1102_s16 }
   0x9   : > { %p225_p1 = scmp.eq.s32.totalorder %s224_s22, 0  ;;  %p238_p2 = scmp.eq.s32.totalorder %s1195_s8, 1 }
   0xa   : > { %p243_p3 = scmp.ne.s32.totalorder %s1102_s16, %s1098_s15  ;;  %p244_p4 = scmp.eq.s32.totalorder %s910_s19, 1 }
   0xb   : > { %s1210_s23 = scalar_select %p225_p1, %s1106_s17, %s227_s21  }
   0xc   : > { %p1212_p5 = por %p238_p2, %p237_p0  ;;  %p1216_p6 = por %p244_p4, %p243_p3 }
   0xd   : > { %p913_p7 = scmp.ge.s32.totalorder %s1110_s18, 1  ;;  %p319_p8 = scmp.lt.s32.totalorder %s1110_s18, 3 }
   0xf   : > { %p320_p9 = pnand %p913_p7, %p319_p8 }
  0x10   : > { %v369_v1 = vld [vmem:[%s1327_s1] sm:$0xff] (!%p320_p9)  ;;  %v370_v2 = vld [vmem:[%s1327_s1 + $0x8] sm:$0xff] (!%p320_p9)  ;;  %v371_v3 = vld [vmem:[%s1327_s1 + $0x10] sm:$0xff] (!%p320_p9)  ;;  %v1112_v4 = vmov (!%p320_p9), 0.0|0.0   ;;  %vm1113_vm0 = vmmov (!%p320_p9), 0   ;;  %v1114_v7 = vmov (!%p320_p9), 0.0   ;;  %v540_v16 = vlaneseq (!%p320_p9) }
  0x11   : > { %323 = sbr.rel (%p320_p9) target bundleno = 918 (0x396), region = 56  ;;  %987 = vmatprep.subr.bf16.mxu0 (!%p320_p9), %v1112_v4  ;;  %v988_v5 = vpack.c.bf16 (!%p320_p9), %v370_v2, %v369_v1  ;;  %v372_v6 = vld [vmem:[%s1327_s1 + $0x18] sm:$0xff] (!%p320_p9)  ;;  %956 = vmatprep.mubr.msk.f32.mxu0 (!%p320_p9), %vm1113_vm0, %v1114_v7  ;;  %p360_p10 = scmp.lt.s32.totalorder (!%p320_p9), %s1195_s8, 1  ;;  %vm380_vm1 = vcmask (!%p320_p9), 261120   ;;  %v455_v10 = vld [vmem:[%s1329_s3] sm:$0xff] (!%p320_p9)  ;;  %v456_v11 = vld [vmem:[%s1329_s3 + $0x8] sm:$0xff] (!%p320_p9) }
  0x12   : > { %993 = vmatprep.subr.bf16.mxu1 (!%p320_p9), %v1112_v4  ;;  %963 = vmatprep.mubr.msk.f32.mxu1 (!%p320_p9), %vm1113_vm0, %v1114_v7  ;;  %v991_v8 = vpack.c.bf16 (!%p320_p9), %v372_v6, %v371_v3  ;;  %s1340_s0 = sld [smem:[#allocation6_spill]] (!%p320_p9)  ;;  %v994_v12 = vpack.c.bf16 (!%p320_p9), %v456_v11, %v455_v10  ;;  %v632_v13 = vld [vmem:[%s1331_s5] sm:$0xff] (!%p320_p9)  ;;  %v633_v14 = vld [vmem:[%s1331_s5 + $0x8] sm:$0xff] (!%p320_p9)  ;;  %v543_v17 = vand.u32 (!%p320_p9), 127, %v540_v16  ;;  %v541_v19 = vshrl.u32 (!%p320_p9), %v540_v16, 7  ;;  %v634_v26 = vld [vmem:[%s1331_s5 + $0x10] sm:$0xff] (!%p320_p9) }
  0x13   : > { %989 = vmatpush3.bf16.msra.mxu0 (!%p320_p9), %v988_v5  ;;  %v997_v15 = vpack.c.bf16 (!%p320_p9), %v633_v14, %v632_v13  ;;  %v917_v18 = vld [vmem:[%s1328_s2] ss:$0 sm:$0xff] (!%p320_p9)  ;;  %vm464_vm2 = vcmask (!%p320_p9), 130048   ;;  %vm558_vm4 = vcmask (!%p320_p9), 64512   ;;  %v635_v27 = vld [vmem:[%s1331_s5 + $0x18] sm:$0xff] (!%p320_p9)  ;;  %s351_s30 = sand.u32 (!%p320_p9), 1, %s1102_s16  }
  0x14   : > { %990 = vmatprep.subr.bf16.mxu0 (!%p320_p9), %v1112_v4  ;;  %995 = vmatpush3.bf16.msra.mxu1 (!%p320_p9), %v994_v12  ;;  %v548_v20 = vand.u32 (!%p320_p9), 1, %v543_v17  ;;  %v1000_v28 = vpack.c.bf16 (!%p320_p9), %v635_v27, %v634_v26  ;;  %s914_s11 = sshll.u32 (!%p320_p9), %s351_s30, 3  ;;  %v919_v29 = vld [vmem:[%s1330_s4] ss:$0 sm:$0xff] (!%p320_p9)  ;;  %vm538_vm5 = vcmask (!%p320_p9), 31744   ;;  %s928_s28 = sshll.u32 (!%p320_p9), %s1195_s8, 7 }
  0x15   : > { %966 = vmatprep.subr.mxu1 (!%p320_p9), %v1114_v7  ;;  %v717_v35 = vld [vmem:[%s1333_s7] sm:$0xff] (!%p320_p9)  ;;  %s1286_s13 = scalar_lea.hbm (!%p320_p9), %s1335_s9, %s928_s28  ;;  %s807_s21 = scalar_lea.sflag (!%p320_p9), [#allocation4], %s351_s30 }
  0x16   : > { %vm556_vm3 = vcmp.eq.s32.totalorder (!%p320_p9), %v548_v20, %v541_v19  ;;  %v922_v36 = vld [vmem:[%s1332_s6] ss:$0 sm:$0xff] (!%p320_p9) }
  0x17   : > { %992 = vmatpush3.bf16.msra.mxu0 (!%p320_p9), %v991_v8  ;;  %v557_v25 = vsel (!%p320_p9), %vm556_vm3, 0.25, %v1114_v7 }
  0x18   : > { %s1238_s14 = scalar_select %p360_p10, %s1195_s8, 1  ;;  %996 = vmatprep.subr.bf16.mxu0 %v1112_v4 }
  0x1a   : > { %s915_s19 = sshll.u32 %s1238_s14, 3 }
  0x1b   : > { %s363_s26 = scalar_lea.vmem %s1340_s0, %s915_s19  ;;  %s353_s19 = scalar_lea.vmem [#allocation3], %s914_s11 }
  0x1c   : > { %v368_v9 = vld [vmem:[%s363_s26] sm:$0xff]  ;;  %s824_s29 = sshll.u32 %s353_s19, 4  ;;  %s1115_s26 = smov [#allocation3]   ;;  %s825_s29 = int_to_ptr.vmem [resolvable:$true] %s824_s29 }
  0x1d   : > { %957 = vmatmul.mubr.msk.f32.vlgmr.msra.gmra.mrb[0].mxu0 %vm380_vm1, %v368_v9  ;;  %s1048_s22 = scalar_lea.vmem %s825_s29, 128  ;;  %s1052_s27 = sshll.u32 %s1115_s26, 4  ;;  %s1053_s27 = int_to_ptr.vmem [resolvable:$false] %s1052_s27 }
  0x1e   : > { %979 = vmatprep.mubr.msk.f32.mxu0 %vm1113_vm0, %v1114_v7  ;;  %998 = vmatpush3.bf16.msra.mxu0 %v997_v15  ;;  %p1049_p11 = scmp.ne.s32.totalorder %s825_s29, %s1048_s22  ;;  %s1054_s0 = scalar_lea.vmem %s1053_s27, 256 }
  0x1f   : > { %999 = vmatprep.subr.bf16.mxu0 %v1112_v4  ;;  %p1055_p0 = scmp.lt.s32.totalorder %s825_s29, %s1053_s27  ;;  %p1056_p1 = scmp.lt.s32.totalorder %s1054_s0, %s1048_s22 }
  0x20   : > { %p1050_p12 = pnand %p1049_p11, %p1212_p5 }
  0x21   : > { %p1057_p2 = por %p1056_p1, %p1055_p0 }
  0x22   : > { %1001 = vmatpush3.bf16.msra.mxu0 %v1000_v28  ;;  %p1051_p13 = pneg %p1050_p12 }
  0x24   : > { %p1058_p3 = pnand %p1057_p2, %p1051_p13 }
  0xf0   : > { %v450_v21 = vpop.f32.mrb[0].mxu0 }
  0xf1   : > { %v451_v22 = vadd.f32 %v917_v18, %v450_v21  ;;  %v958_v23 = vpop.f32.mrb[1].mxu0 }
  0xf3   : > { %v454_v24 = vmax.f32 %v451_v22, 0.0 }
  0xf5   : > { %964 = vmatmul.mubr.msk.f32.vlgmr.msra.gmra.mrb[0].mxu1 %vm464_vm2, %v454_v24 }
  0xf6   : > { %967 = vmatpush3.msra.mxu1 %v368_v9  ;;  %968 = vmatprep.mubr.msk.f32.mxu1 %vm1113_vm0, %v1114_v7 }
  0xf7   : > { %982 = vmatprep.subr.mxu1 %v1114_v7 }
  0xf9   : > { %969 = vmatmul.mubr.msk.f32.vlgmr.msra.gmra.mrb[2].mxu1 %vm558_vm4, %v557_v25 }
  0xfa   : > { %984 = vmatprep.mubr.msk.f32.mxu1 %vm1113_vm0, %v1114_v7  ;;  %983 = vmatpush3.msra.mxu1 %v717_v35 }
 0x1c8   : > { %v534_v30 = vpop.f32.mrb[0].mxu1 }
 0x1c9   : > { %v535_v31 = vadd.f32 %v919_v29, %v534_v30  ;;  %v965_v32 = vpop.f32.mrb[1].mxu1 }
 0x1cb   : > { %539 = vst.msk [vmem:[%s353_s19] sm:$0xff] %vm538_vm5, %v535_v31 }
 0x1cc   : > { %v628_v33 = vpop.f32.mrb[2].mxu1 }
 0x1cd   : > { %v970_v34 = vpop.f32.mrb[3].mxu1  ;;  %980 = vmatmul.mubr.msk.f32.vlgmr.msra.gmra.mrb[2].mxu0 %vm380_vm1, %v628_v33 }
 0x2a0   : > { %v712_v37 = vpop.f32.mrb[2].mxu0 }
 0x2a1   : > { %v713_v38 = vadd.f32 %v922_v36, %v712_v37  ;;  %v981_v39 = vpop.f32.mrb[3].mxu0 }
 0x2a3   : > { %v716_v40 = vmax.f32 %v713_v38, 0.0 }
 0x2a5   : > { %985 = vmatmul.mubr.msk.f32.vlgmr.msra.gmra.mrb[4].mxu1 %vm558_vm4, %v716_v40 }
 0x2a6   : > { %1061 = shalt.err (!%p1058_p3)
}
 0x2a7   : > { %s1062_s8 = scalar_lea.hbm %s1286_s13, 128  ;;  %s1066_s28 = scalar_lea.hbm %s1335_s9, 256 }
 0x2a8   : > { %p1063_p4 = scmp.ne.s32.totalorder %s1286_s13, %s1062_s8  ;;  %p1067_p9 = scmp.lt.u32.totalorder %s1286_s13, %s1335_s9 }
 0x2a9   : > { %p1068_p10 = scmp.lt.u32.totalorder %s1066_s28, %s1062_s8  ;;  %p1070_p12 = scmp.lt.u32.totalorder %s1062_s8, %s1286_s13 }
 0x2aa   : > { %p1064_p7 = pnand %p1063_p4, %p1212_p5 }
 0x2ab   : > { %p1069_p11 = por %p1068_p10, %p1067_p9 }
 0x2ac   : > { %p1065_p8 = pneg %p1064_p7 }
 0x2ad   : > { %p1071_p13 = por %p1070_p12, %p1069_p11 }
 0x2af   : > { %p1072_p0 = pnand %p1071_p13, %p1065_p8 }
 0x2b1   : > { %1075 = shalt.err (!%p1072_p0)
}
 0x2b2   : > { %1002 = dma.vmem_to_hbm [thread:$0]  (%p1212_p5), %s825_s29, 128, %s1286_s13, %s807_s21   ;;  %v924_v41 = vld [vmem:[#allocation2] ss:$0 sm:$0xff]  ;;  %vm804_vm6 = vcmask 1024  }
 0x2b3   : > { %s916_s0 = sshll.u32 %s1238_s14, 1 }
 0x2b4   : > { %s367_s27 = scalar_lea.vmem %s1336_s10, %s916_s0 }
 0x378   : > { %v794_v42 = vpop.f32.mrb[4].mxu1 }
 0x379   : > { %v795_v43 = vadd.f32 %v924_v41, %v794_v42  ;;  %v986_v44 = vpop.f32.mrb[5].mxu1 }
 0x37b   : > { %v926_v45 = vmul.f32 -1.442695, %v795_v43 }
 0x37d   : > { %1044 = vpow2.f32 %v926_v45 }
 0x387   : > { %v1045_v46 = vpop.eup %1044 }
 0x388   : > { %v801_v47 = vadd.f32 1.0, %v1045_v46 }
 0x38a   : > { %1046 = vrcp.f32 %v801_v47 }
 0x394   : > { %v1047_v48 = vpop.eup %1046 }
 0x395   : > { %805 = vst.msk [vmem:[%s367_s27] sm:$0x3] %vm804_vm6, %v1047_v48 }
 0x396 PF: > { %p1008_p5 = scmp.ge.s32.totalorder %s1110_s18, 2  ;;  %s839_s24 = sand.u32 1, %s1098_s15  }
 0x397   : > { %s840_s29 = scalar_lea.sflag [#allocation4], %s839_s24 }
 0x398   : > { %p1005_p1 = pnand %p1008_p5, %p1216_p6 }
 0x39a   : > { %1093 = dma.done.wait (!%p1005_p1), %s840_s29, 128  }
 0x39b   : > { %1095 = vsyncadd (!%p1005_p1), %s840_s29, 4294967168  ;;  %p23_p2 = scmp.ge.s32.totalorder %s1199_s20, 4   ;;  %s1341_s15 = smov %s1102_s16 }
 0x39c   : > { %s1342_s16 = smov %s1106_s17  ;;  %s1343_s17 = smov %s1210_s23 }
 0x39d   : > { %s1344_s18 = smov %s1199_s20  ;;  %25 = sbr.rel (!%p23_p2) target bundleno = 6 (0x6), region = 103 }
 0x3a4   :  { %852 = vsyncpa [#allocation4], 1 }
 0x3a5   :  { %854 = vsyncpa [#allocation4 + $0x1], 1 }

// kernel: _lambda_.3
= control target key start
LH: loop header
LB: loop body
LE: loop exit
PB: predicated region body
PF: predicated region fallthrough
CT: control target
= control target key end

     0   :  { %s3962_s0 = inlined_call_operand.vmem [shape: f32[2,8,4], index: 0, kind: input, shape index: {}]   ;;  %s3963_s1 = inlined_call_operand.vmem [shape: f32[8,32], index: 1, kind: input, shape index: {}]   ;;  %s3964_s2 = inlined_call_operand.hbm [shape: f32[4,32], index: 2, kind: input, shape index: {}]   ;;  %s3965_s3 = inlined_call_operand.hbm [shape: f32[1,32], index: 3, kind: input, shape index: {}]   ;;  %s3966_s4 = inlined_call_operand.vmem [shape: f32[2,32,32], index: 4, kind: input, shape index: {}]   ;;  %s3967_s5 = inlined_call_operand.vmem [shape: f32[2,1,32], index: 5, kind: input, shape index: {}]   ;;  %s3968_s6 = inlined_call_operand.vmem [shape: f32[2,32,32], index: 6, kind: input, shape index: {}]   ;;  %s3969_s7 = inlined_call_operand.vmem [shape: f32[2,1,32], index: 7, kind: input, shape index: {}]   ;;  %s3970_s8 = inlined_call_operand.vmem [shape: f32[2,32,32], index: 8, kind: input, shape index: {}]   ;;  %s3971_s9 = inlined_call_operand.vmem [shape: f32[2,1,32], index: 9, kind: input, shape index: {}]   ;;  %s3972_s10 = inlined_call_operand.vmem [shape: f32[2,32,32], index: 10, kind: input, shape index: {}]   ;;  %s3973_s11 = inlined_call_operand.vmem [shape: f32[2,1,32], index: 11, kind: input, shape index: {}]   ;;  %s3974_s12 = inlined_call_operand.hbm [shape: f32[2,1,32], index: 12, kind: input, shape index: {}]   ;;  %s3975_s13 = inlined_call_operand.hbm [shape: f32[2,1,32], index: 13, kind: input, shape index: {}]   ;;  %s3976_s14 = inlined_call_operand.vmem [shape: f32[2,32,64], index: 14, kind: input, shape index: {}]   ;;  %s3977_s15 = inlined_call_operand.vmem [shape: f32[2,1,64], index: 15, kind: input, shape index: {}]   ;;  %s3978_s16 = inlined_call_operand.vmem [shape: f32[2,64,32], index: 16, kind: input, shape index: {}]   ;;  %s3979_s17 = inlined_call_operand.vmem [shape: f32[2,1,32], index: 17, kind: input, shape index: {}]   ;;  %s3980_s18 = inlined_call_operand.hbm [shape: f32[2,1,32], index: 18, kind: input, shape index: {}]   ;;  %s3981_s19 = inlined_call_operand.hbm [shape: f32[2,1,32], index: 19, kind: input, shape index: {}]   ;;  %s3982_s20 = inlined_call_operand.vmem [shape: f32[2,8,32], index: 20, kind: output, shape index: {}]  }
   0x1   :  { %4006 = sst [smem:[#allocation22_spill]] %s3962_s0 }
   0x2   :  { %4007 = sst [smem:[#allocation23_spill]] %s3963_s1 }
   0x3   :  { %4008 = sst [smem:[#allocation24_spill]] %s3964_s2 }
   0x4   :  { %4009 = sst [smem:[#allocation25_spill]] %s3965_s3 }
   0x5   :  { %4010 = sst [smem:[#allocation26_spill]] %s3966_s4 }
   0x6   :  { %4011 = sst [smem:[#allocation27_spill]] %s3967_s5 }
   0x7   :  { %4012 = sst [smem:[#allocation28_spill]] %s3968_s6 }
   0x8   :  { %4013 = sst [smem:[#allocation29_spill]] %s3970_s8 }
   0x9   :  { %4014 = sst [smem:[#allocation30_spill]] %s3971_s9 }
   0xa   :  { %4015 = sst [smem:[#allocation31_spill]] %s3972_s10 }
   0xb   :  { %4016 = sst [smem:[#allocation32_spill]] %s3973_s11 }
   0xc   :  { %4017 = sst [smem:[#allocation33_spill]] %s3974_s12 }
   0xd   :  { %4018 = sst [smem:[#allocation34_spill]] %s3975_s13 }
   0xe   :  { %4019 = sst [smem:[#allocation35_spill]] %s3976_s14 }
   0xf   :  { %4020 = sst [smem:[#allocation36_spill]] %s3977_s15 }
  0x10   :  { %4021 = sst [smem:[#allocation37_spill]] %s3978_s16 }
  0x11   :  { %4022 = sst [smem:[#allocation38_spill]] %s3979_s17 }
  0x12   :  { %4023 = sst [smem:[#allocation39_spill]] %s3980_s18 }
  0x13   :  { %4024 = sst [smem:[#allocation40_spill]] %s3981_s19 }
  0x14   :  { %4025 = sst [smem:[#allocation41_spill]] %s3982_s20 }
  0x15   :  { %25 = vsyncpa [#allocation3], 0 }
  0x16   :  { %26 = vsyncpa [#allocation5], 0  ;;  %s3389_s1 = smov 0   ;;  %s3391_s22 = smov 0  }
  0x17   :  { %s3393_s23 = smov 0   ;;  %s3395_s24 = smov 0  }
  0x18   :  { %s3397_s2 = smov 0   ;;  %s3399_s25 = smov 0  }
  0x19   :  { %s3401_s3 = smov 0   ;;  %s3403_s26 = smov 0  }
  0x1a LB: > { %4026 = sst [smem:[#allocation13_spill]] %s3247_s22  ;;  %s3985_s27 = sadd.s32 4294967295, %s3271_s26   ;;  %s3271_s26 = sphi %s3403_s26, %s32_s26   ;;  %s3267_s3 = sphi %s3401_s3, %s4092_s3   ;;  %s3263_s25 = sphi %s3399_s25, %s4091_s25   ;;  %s3259_s2 = sphi %s3397_s2, %s4090_s2   ;;  %s3255_s24 = sphi %s3395_s24, %s4089_s24   ;;  %s3251_s23 = sphi %s3393_s23, %s4088_s23   ;;  %s3247_s22 = sphi %s3391_s22, %s4087_s22   ;;  %s3243_s1 = sphi %s3389_s1, %s4086_s1  }
  0x1b   : > { %4027 = sst [smem:[#allocation14_spill]] %s3251_s23  ;;  %p361_p1 = scmp.ne.s32.totalorder %s3247_s22, %s3243_s1 }
  0x1c   : > { %4028 = sst [smem:[#allocation15_spill]] %s3263_s25  ;;  %p3434_p2 = scmp.eq.s32.totalorder %s3985_s27, 0 }
  0x1d   : > { %4029 = sst [smem:[#allocation16_spill]] %s3267_s3  ;;  %p2601_p3 = scmp.ge.s32.totalorder %s3271_s26, 1 }
  0x1e   : > { %4030 = sst [smem:[#allocation17_spill]] %s3271_s26  ;;  %p580_p4 = scmp.lt.s32.totalorder %s3271_s26, 5 }
  0x1f   : > { %s4031_s4 = scalar_select %p3434_p2, 1, 0 }
  0x20   : > { %p3442_p5 = por %p3434_p2, %p361_p1  ;;  %p3446_p6 = pnand %p2601_p3, %p580_p4 }
  0x21   : > { %s3273_s0 = smov [#allocation2]   ;;  %s41_s27 = sadd.s32 1, %s3263_s25 }
  0x22   : > { %s4032_s29 = scalar_select %p3442_p5, 1, 0 }
  0x23   : > { %s4033_s30 = scalar_select %p3446_p6, 1, 0 }
  0x24   : > { %s596_s21 = sshll.u32 %s3273_s0, 4  ;;  %p2905_p7 = pneg %p3446_p6  ;;  %s597_s21 = int_to_ptr.vmem [resolvable:$true] %s596_s21 }
  0x25   : > { %s44_s28 = sadd.s32 1, %s3267_s3  ;;  %p3460_p9 = scmp.ge.s32.totalorder %s41_s27, 2 }
  0x26   : > { %p3454_p8 = pnand %p2905_p7, %p3434_p2  ;;  %s4036_s15 = sld [smem:[#allocation24_spill]] }
  0x27   : > { %s4035_s20 = scalar_select %p3460_p9, 1, 0 }
  0x28   : > { %s4034_s1 = scalar_select %p3454_p8, 1, 0 }
  0x29   : > { %p3996_p11 = pneg %p3454_p8 }
  0x2c   : > { %s3021_s0 = scalar_lea.hbm %s4036_s15, 64 }
  0x2d   : > { %p3022_p10 = scmp.ne.s32.totalorder %s4036_s15, %s3021_s0  ;;  %p3028_p1 = scmp.lt.u32.totalorder %s3021_s0, %s4036_s15 }
  0x2f   : > { %p3024_p12 = pnand %p3996_p11, %p3022_p10 }
  0x31   : > { %p3025_p13 = pneg %p3024_p12 }
  0x33   : > { %p3030_p3 = pnand %p3028_p1, %p3025_p13 }
  0x35   : > { %3033 = shalt.err (!%p3030_p3)
}
  0x36   : > { %s3034_s8 = scalar_lea.vmem %s597_s21, 64  ;;  %p3042_p5 = scmp.lt.s32.totalorder %s597_s21, %s597_s21 }
  0x37   : > { %p3035_p4 = scmp.ne.s32.totalorder %s597_s21, %s3034_s8  ;;  %p3043_p2 = scmp.lt.s32.totalorder %s3034_s8, %s3034_s8 }
  0x39   : > { %p3037_p7 = pnand %p3035_p4, %p3996_p11  ;;  %p3044_p6 = por %p3043_p2, %p3042_p5 }
  0x3b   : > { %p3038_p0 = pneg %p3037_p7 }
  0x3d   : > { %p3045_p9 = pnand %p3044_p6, %p3038_p0 }
  0x3f   : > { %3048 = shalt.err (!%p3045_p9)
}
  0x40   : > { %2908 = dma.hbm_to_vmem [thread:$0]  (!%p3454_p8), %s4036_s15, 64, %s597_s21, [#allocation3]  }
  0x41   : > { %p4037_p0 = scmp.ne.s32.totalorder %s4035_s20, 0  ;;  %p356_p2 = scmp.eq.s32.totalorder %s3271_s26, 0 }
  0x42   : > { %p4039_p9 = scmp.ne.s32.totalorder %s3251_s23, %s3247_s22  ;;  %p2927_p12 = scmp.lt.s32.totalorder %s3271_s26, 4 }
  0x43   : > { %s4094_s27 = smov (%p4037_p0, %s41_s27), 0  ;;  %s4096_s28 = smov (!%p4037_p0, %s44_s28), %s3267_s3 }
  0x44   : > { %4038 = sst [smem:[#allocation18_spill]] %s4094_s27  ;;  %s345_s8 = ssub.s32 %s3263_s25, %s4094_s27 }
  0x45   : > { %p46_p5 = scmp.ge.s32.totalorder %s4096_s28, 2  ;;  %p346_p6 = scmp.eq.s32.totalorder %s345_s8, 0 }
  0x46   : > { %p357_p10 = por %p356_p2, %p4039_p9  ;;  %s4041_s9 = sadd.s32 1, %s3251_s23 }
  0x47   : > { %s4098_s28 = smov (%p46_p5, %s4096_s28), 0  ;;  %s681_s16 = sand.u32 1, %s3271_s26  }
  0x48   : > { %4040 = sst [smem:[#allocation19_spill]] %s4098_s28  ;;  %s3509_s17 = sand.u32 1, %s3251_s23  }
  0x49   : > { %s3505_s10 = scalar_select %p346_p6, %s3251_s23, %s4041_s9  }
  0x4a   : > { %s3512_s20 = sshll.u32 %s3263_s25, 4  ;;  %s684_s21 = scalar_lea.vmem [#allocation6], %s3509_s17 }
  0x4b   : > { %4042 = sst [smem:[#allocation20_spill]] %s3505_s10  ;;  %s691_s0 = sshll.u32 %s684_s21, 4  ;;  %s3521_s0 = int_to_ptr.vmem [resolvable:$true] %s691_s0 }
  0x4c   : > { %s4043_s12 = sld [smem:[#allocation33_spill]]  ;;  %p3523_p13 = pnand %p2927_p12, %p357_p10 }
  0x4d   : > { %s4045_s13 = sld [smem:[#allocation34_spill]]  ;;  %s701_s27 = scalar_lea.vmem [#allocation7], %s3509_s17 }
  0x4e   : > { %s4044_s9 = scalar_select %p3523_p13, 1, 0 }
  0x4f   : > { %s708_s11 = sshll.u32 %s701_s27, 4  ;;  %s3536_s14 = scalar_lea.sflag [#allocation3], %s681_s16  ;;  %s3534_s11 = int_to_ptr.vmem [resolvable:$true] %s708_s11 }
  0x50   : > { %p3542_p3 = pneg %p3523_p13 }
  0x52   : > { %s3519_s8 = scalar_lea.hbm %s4043_s12, %s3512_s20  ;;  %s3054_s10 = scalar_lea.hbm %s4043_s12, 32 }
  0x53   : > { %s3531_s21 = scalar_lea.hbm %s4045_s13, %s3512_s20  ;;  %s3049_s3 = scalar_lea.hbm %s3519_s8, 16 }
  0x54   : > { %p3050_p1 = scmp.ne.s32.totalorder %s3519_s8, %s3049_s3  ;;  %p3055_p0 = scmp.lt.u32.totalorder %s3519_s8, %s4043_s12 }
  0x55   : > { %s4046_s25 = scalar_select %p3542_p3, 1, 0 }
  0x56   : > { %p3052_p4 = pnand %p3542_p3, %p3050_p1  ;;  %p3056_p2 = scmp.lt.u32.totalorder %s3054_s10, %s3049_s3 }
  0x57   : > { %p3058_p6 = scmp.lt.u32.totalorder %s3049_s3, %s3519_s8 }
  0x58   : > { %p3053_p7 = pneg %p3052_p4  ;;  %p3057_p5 = por %p3056_p2, %p3055_p0 }
  0x5a   : > { %p3059_p9 = por %p3058_p6, %p3057_p5 }
  0x5c   : > { %p3060_p10 = pnand %p3059_p9, %p3053_p7 }
  0x5e   : > { %3063 = shalt.err (!%p3060_p10)
}
  0x5f   : > { %s3064_s16 = scalar_lea.vmem %s3521_s0, 16  ;;  %s3274_s15 = smov [#allocation6]  }
  0x60   : > { %p3065_p12 = scmp.ne.s32.totalorder %s3521_s0, %s3064_s16  ;;  %s3069_s28 = sshll.u32 %s3274_s15, 4  ;;  %s3070_s28 = int_to_ptr.vmem [resolvable:$false] %s3069_s28 }
  0x61   : > { %s3071_s23 = scalar_lea.vmem %s3070_s28, 32  ;;  %p3072_p11 = scmp.lt.s32.totalorder %s3521_s0, %s3070_s28 }
  0x62   : > { %p3067_p1 = pnand %p3065_p12, %p3542_p3  ;;  %p3073_p8 = scmp.lt.s32.totalorder %s3071_s23, %s3064_s16 }
  0x64   : > { %p3068_p4 = pneg %p3067_p1  ;;  %p3074_p0 = por %p3073_p8, %p3072_p11 }
  0x66   : > { %p3075_p2 = pnand %p3074_p0, %p3068_p4 }
  0x68   : > { %3078 = shalt.err (!%p3075_p2)
}
  0x69   : > { %2915 = dma.hbm_to_vmem [thread:$0]  (!%p3523_p13), %s3519_s8, 16, %s3521_s0, %s3536_s14  }
  0x6a   : > { %s3079_s3 = scalar_lea.hbm %s3531_s21, 16  ;;  %s3084_s16 = scalar_lea.hbm %s4045_s13, 32 }
  0x6b   : > { %p3080_p7 = scmp.ne.s32.totalorder %s3531_s21, %s3079_s3  ;;  %p3085_p8 = scmp.lt.u32.totalorder %s3531_s21, %s4045_s13 }
  0x6c   : > { %p3086_p11 = scmp.lt.u32.totalorder %s3084_s16, %s3079_s3  ;;  %p3088_p10 = scmp.lt.u32.totalorder %s3079_s3, %s3531_s21 }
  0x6d   : > { %p3082_p5 = pnand %p3080_p7, %p3542_p3 }
  0x6e   : > { %p3087_p9 = por %p3086_p11, %p3085_p8 }
  0x6f   : > { %p3083_p6 = pneg %p3082_p5 }
  0x70   : > { %p3089_p12 = por %p3088_p10, %p3087_p9 }
  0x72   : > { %p3090_p1 = pnand %p3089_p12, %p3083_p6 }
  0x74   : > { %3093 = shalt.err (!%p3090_p1)
}
  0x75   : > { %s3094_s0 = scalar_lea.vmem %s3534_s11, 16  ;;  %s3275_s8 = smov [#allocation7]  }
  0x76   : > { %p3095_p4 = scmp.ne.s32.totalorder %s3534_s11, %s3094_s0  ;;  %s3099_s23 = sshll.u32 %s3275_s8, 4  ;;  %s3100_s23 = int_to_ptr.vmem [resolvable:$false] %s3099_s23 }
  0x77   : > { %s3101_s10 = scalar_lea.vmem %s3100_s23, 32  ;;  %p3102_p7 = scmp.lt.s32.totalorder %s3534_s11, %s3100_s23 }
  0x78   : > { %p3097_p0 = pnand %p3095_p4, %p3542_p3  ;;  %p3103_p5 = scmp.lt.s32.totalorder %s3101_s10, %s3094_s0 }
  0x7a   : > { %p3098_p2 = pneg %p3097_p0  ;;  %p3104_p8 = por %p3103_p5, %p3102_p7 }
  0x7c   : > { %p3105_p11 = pnand %p3104_p8, %p3098_p2 }
  0x7e   : > { %3108 = shalt.err (!%p3105_p11)
}
  0x7f   : > { %2918 = dma.hbm_to_vmem [thread:$0]  (!%p3523_p13), %s3531_s21, 16, %s3534_s11, %s3536_s14  }
  0x80   : > { %s4047_s18 = sld [smem:[#allocation39_spill]]  ;;  %s746_s15 = scalar_lea.vmem [#allocation8], %s3509_s17 }
  0x81   : > { %s753_s28 = sshll.u32 %s746_s15, 4  ;;  %s3276_s0 = smov [#allocation4]   ;;  %s3595_s28 = int_to_ptr.vmem [resolvable:$true] %s753_s28 }
  0x82   : > { %s607_s8 = sshll.u32 %s3276_s0, 4  ;;  %s608_s8 = int_to_ptr.vmem [resolvable:$true] %s607_s8 }
  0x86   : > { %s3592_s16 = scalar_lea.hbm %s4047_s18, %s3512_s20  ;;  %s3114_s10 = scalar_lea.hbm %s4047_s18, 32 }
  0x87   : > { %s3109_s23 = scalar_lea.hbm %s3592_s16, 16  ;;  %p3115_p12 = scmp.lt.u32.totalorder %s3592_s16, %s4047_s18 }
  0x88   : > { %p3110_p6 = scmp.ne.s32.totalorder %s3592_s16, %s3109_s23  ;;  %p3116_p1 = scmp.lt.u32.totalorder %s3114_s10, %s3109_s23 }
  0x89   : > { %p3118_p0 = scmp.lt.u32.totalorder %s3109_s23, %s3592_s16 }
  0x8a   : > { %p3112_p9 = pnand %p3110_p6, %p3542_p3  ;;  %p3117_p4 = por %p3116_p1, %p3115_p12 }
  0x8c   : > { %p3113_p10 = pneg %p3112_p9  ;;  %p3119_p2 = por %p3118_p0, %p3117_p4 }
  0x8e   : > { %p3120_p7 = pnand %p3119_p2, %p3113_p10 }
  0x90   : > { %3123 = shalt.err (!%p3120_p7)
}
  0x91   : > { %s3124_s15 = scalar_lea.vmem %s3595_s28, 16  ;;  %s3277_s0 = smov [#allocation8]  }
  0x92   : > { %p3125_p5 = scmp.ne.s32.totalorder %s3595_s28, %s3124_s15  ;;  %s3129_s21 = sshll.u32 %s3277_s0, 4  ;;  %s3130_s21 = int_to_ptr.vmem [resolvable:$false] %s3129_s21 }
  0x93   : > { %s3131_s11 = scalar_lea.vmem %s3130_s21, 32  ;;  %p3132_p6 = scmp.lt.s32.totalorder %s3595_s28, %s3130_s21 }
  0x94   : > { %p3127_p8 = pnand %p3125_p5, %p3542_p3  ;;  %p3133_p9 = scmp.lt.s32.totalorder %s3131_s11, %s3124_s15 }
  0x96   : > { %p3128_p11 = pneg %p3127_p8  ;;  %p3134_p12 = por %p3133_p9, %p3132_p6 }
  0x98   : > { %p3135_p1 = pnand %p3134_p12, %p3128_p11 }
  0x9a   : > { %3138 = shalt.err (!%p3135_p1)
}
  0x9b   : > { %2921 = dma.hbm_to_vmem [thread:$0]  (!%p3523_p13), %s3592_s16, 16, %s3595_s28, %s3536_s14  }
  0x9c   : > { %s4048_s3 = sld [smem:[#allocation25_spill]]  ;;  %p4050_p4 = scmp.ne.s32.totalorder %s4034_s1, 0 }
  0x9e   : > { %p4051_p0 = pneg %p4050_p4 }
  0xa2   : > { %s4049_s27 = smov %s4048_s3  ;;  %s3139_s12 = scalar_lea.hbm %s4048_s3, 16 }
  0xa3   : > { %p3140_p10 = scmp.ne.s32.totalorder %s4049_s27, %s3139_s12  ;;  %p3146_p5 = scmp.lt.u32.totalorder %s3139_s12, %s4049_s27 }
  0xa5   : > { %p3142_p2 = pnand %p3140_p10, %p4051_p0 }
  0xa7   : > { %p3143_p7 = pneg %p3142_p2 }
  0xa9   : > { %p3148_p8 = pnand %p3146_p5, %p3143_p7 }
  0xab   : > { %3151 = shalt.err (!%p3148_p8)
}
  0xac   : > { %s3152_s16 = scalar_lea.vmem %s608_s8, 16  ;;  %p4052_p6 = pmov %p4051_p0 }
  0xad   : > { %p3153_p11 = scmp.ne.s32.totalorder %s608_s8, %s3152_s16  ;;  %s3159_s28 = scalar_lea.vmem %s608_s8, 32 }
  0xae   : > { %p3160_p1 = scmp.lt.s32.totalorder %s608_s8, %s608_s8  ;;  %p3161_p13 = scmp.lt.s32.totalorder %s3159_s28, %s3152_s16 }
  0xaf   : > { %p3155_p9 = pnand %p3153_p11, %p4052_p6 }
  0xb0   : > { %p3162_p3 = por %p3161_p13, %p3160_p1 }
  0xb1   : > { %p3156_p12 = pneg %p3155_p9 }
  0xb3   : > { %p3163_p0 = pnand %p3162_p3, %p3156_p12 }
  0xb5   : > { %3166 = shalt.err (!%p3163_p0)
}
  0xb6   : > { %2911 = dma.hbm_to_vmem [thread:$0]  (!%p4050_p4), %s4049_s27, 16, %s608_s8, [#allocation5]  }
  0xb7   : > { %s4053_s19 = sld [smem:[#allocation40_spill]]  ;;  %s763_s3 = scalar_lea.vmem [#allocation9], %s3509_s17 }
  0xb8   : > { %s770_s0 = sshll.u32 %s763_s3, 4  ;;  %p4054_p3 = scmp.ne.s32.totalorder %s4046_s25, 0  ;;  %s771_s0 = int_to_ptr.vmem [resolvable:$true] %s770_s0 }
  0xbd   : > { %s3643_s10 = scalar_lea.hbm %s4053_s19, %s3512_s20  ;;  %s3172_s8 = scalar_lea.hbm %s4053_s19, 32 }
  0xbe   : > { %s3167_s1 = scalar_lea.hbm %s3643_s10, 16  ;;  %p3173_p4 = scmp.lt.u32.totalorder %s3643_s10, %s4053_s19 }
  0xbf   : > { %p3168_p13 = scmp.ne.s32.totalorder %s3643_s10, %s3167_s1  ;;  %p3174_p7 = scmp.lt.u32.totalorder %s3172_s8, %s3167_s1 }
  0xc0   : > { %p3176_p8 = scmp.lt.u32.totalorder %s3167_s1, %s3643_s10 }
  0xc1   : > { %p3170_p10 = pnand %p3168_p13, %p4054_p3  ;;  %p3175_p5 = por %p3174_p7, %p3173_p4 }
  0xc3   : > { %p3171_p2 = pneg %p3170_p10  ;;  %p3177_p11 = por %p3176_p8, %p3175_p5 }
  0xc5   : > { %p3178_p6 = pnand %p3177_p11, %p3171_p2 }
  0xc7   : > { %3181 = shalt.err (!%p3178_p6)
}
  0xc8   : > { %s3182_s17 = scalar_lea.vmem %s771_s0, 16  ;;  %s3278_s20 = smov [#allocation9]  }
  0xc9   : > { %p3183_p9 = scmp.ne.s32.totalorder %s771_s0, %s3182_s17  ;;  %s3187_s13 = sshll.u32 %s3278_s20, 4  ;;  %s3188_s13 = int_to_ptr.vmem [resolvable:$false] %s3187_s13 }
  0xca   : > { %s3189_s11 = scalar_lea.vmem %s3188_s13, 32  ;;  %p3190_p0 = scmp.lt.s32.totalorder %s771_s0, %s3188_s13 }
  0xcb   : > { %p3185_p12 = pnand %p3183_p9, %p4054_p3  ;;  %p3191_p13 = scmp.lt.s32.totalorder %s3189_s11, %s3182_s17 }
  0xcd   : > { %p3186_p1 = pneg %p3185_p12  ;;  %p3192_p10 = por %p3191_p13, %p3190_p0 }
  0xcf   : > { %p3193_p4 = pnand %p3192_p10, %p3186_p1 }
  0xd1   : > { %3196 = shalt.err (!%p3193_p4)
}
  0xd2   : > { %p4055_p7 = scmp.ne.s32.totalorder %s4044_s9, 0  ;;  %p4056_p2 = scmp.ne.s32.totalorder %s4033_s30, 0 }
  0xd4   : > { %2924 = dma.hbm_to_vmem [thread:$0]  (!%p4055_p7), %s3643_s10, 16, %s771_s0, %s3536_s14  }
  0xd5   : > { %779 = sbr.rel (%p4056_p2) target bundleno = 2727 (0xaa7), region = 100 }
  0xdc   : > { %p4057_p3 = scmp.ne.s32.totalorder %s4031_s4, 0 }
  0xde   : > { %3230 = dma.done.wait (%p4057_p3), [#allocation3], 64  }
  0xdf   : > { %3232 = vsyncadd (%p4057_p3), [#allocation3], 4294967232 }
  0xe0   : > { %3234 = dma.done.wait (%p4057_p3), [#allocation5], 16  }
  0xe1   : > { %3236 = vsyncadd (%p4057_p3), [#allocation5], 4294967280  ;;  %s4058_s25 = sadd.s32 4294967295, %s3271_s26   ;;  %s3677_s14 = sand.u32 1, %s3247_s22  }
  0xe2   : > { %s789_s9 = sand.u32 1, %s4058_s25   ;;  %p4059_p5 = scmp.ne.s32.totalorder %s4032_s29, 0 }
  0xe3   : > { %s790_s30 = scalar_lea.sflag [#allocation3], %s789_s9 }
  0xe4   : > { %3238 = dma.done.wait (%p4059_p5), %s790_s30, 64  }
  0xe5   : > { %3240 = vsyncadd (%p4059_p5), %s790_s30, 4294967232  ;;  %p935_p8 = scmp.lt.s32.totalorder %s3259_s2, 1  ;;  %p939_p11 = scmp.lt.s32.totalorder %s3255_s24, 1 }
  0xe6   : > { %s4060_s3 = sld [smem:[#allocation22_spill]]  ;;  %s4061_s8 = sld [smem:[#allocation26_spill]] }
  0xe7   : > { %s4100_s2 = smov (!%p935_p8, %s3259_s2), 1  ;;  %s4063_s6 = sld [smem:[#allocation28_spill]] }
  0xe8   : > { %s3688_s4 = scalar_select %p939_p11, %s3255_s24, 1 }
  0xe9   : > { %s2612_s23 = sshll.u32 %s4100_s2, 3  ;;  %s4066_s18 = sld [smem:[#allocation31_spill]] }
  0xea   : > { %s2664_s1 = sshll.u32 %s3688_s4, 5  ;;  %s4069_s30 = sld [smem:[#allocation35_spill]] }
  0xeb   : > { %s2669_s21 = sshll.u32 %s3688_s4, 6  ;;  %s4071_s28 = sld [smem:[#allocation38_spill]] }
  0xec   : > { %s938_s0 = scalar_lea.vmem %s4060_s3, %s2612_s23  ;;  %s3697_s16 = scalar_lea.vmem %s4061_s8, %s2664_s1 }
  0xed   : > { %s3706_s2 = scalar_lea.vmem %s4063_s6, %s2664_s1  ;;  %s4064_s3 = sld [smem:[#allocation29_spill]] }
  0xee   : > { %s4068_s6 = sld [smem:[#allocation32_spill]]  ;;  %s4073_s11 = sld [smem:[#allocation41_spill]] }
  0xef   : > { %s3724_s19 = scalar_lea.vmem %s4066_s18, %s2664_s1  ;;  %s816_s9 = scalar_lea.vmem [#allocation9], %s3677_s14 }
  0xf0   : > { %4067 = sst [smem:[#allocation21_spill]] %s3724_s19  ;;  %s3733_s22 = scalar_lea.vmem %s4069_s30, %s2664_s1 }
  0xf1   : > { %s986_s20 = scalar_lea.vmem %s4071_s28, %s3688_s4  ;;  %s4072_s19 = sld [smem:[#allocation37_spill]] }
  0xf2   : > { %s808_s30 = scalar_lea.vmem [#allocation8], %s3677_s14  ;;  %p2626_p6 = scmp.ne.s32.totalorder %s3255_s24, 0 }
  0xf3   : > { %s3715_s15 = scalar_lea.vmem %s4064_s3, %s2664_s1  ;;  %s4070_s3 = sld [smem:[#allocation36_spill]]  ;;  %v996_v0 = vld [vmem:[#allocation2] sm:$0xf] (!%p2626_p6)  ;;  %vm1008_vm0 = vcmask (!%p2626_p6), 1043456   ;;  %v3279_v2 = vmov (!%p2626_p6), 0.0   ;;  %vm3280_vm1 = vmmov (!%p2626_p6), 0  }
  0xf4   : > { %s970_s27 = scalar_lea.vmem %s4068_s6, %s3688_s4  ;;  %s3752_s25 = scalar_lea.vmem %s4073_s11, %s2612_s23  ;;  %v995_v1 = vld [vmem:[%s938_s0] sm:$0xff] (!%p2626_p6)  ;;  %2722 = vmatprep.subr.mxu0 (!%p2626_p6), %v3279_v2  ;;  %2724 = vmatprep.mubr.msk.f32.mxu0 (!%p2626_p6), %vm3280_vm1, %v3279_v2  ;;  %vm1004_vm2 = vcmask (!%p2626_p6), 31744   ;;  %vm1084_vm3 = vcmask (!%p2626_p6), 261120  }
  0xf5   : > { %s800_s1 = scalar_lea.vmem [#allocation7], %s3677_s14  ;;  %994 = sbr.rel (%p2626_p6) target bundleno = 463 (0x1cf), region = 128  ;;  %2723 = vmatpush3.msk.msra.mxu0 (!%p2626_p6), %vm1008_vm0, %v996_v0  ;;  %v2627_v3 = vld [vmem:[#allocation4] ss:$0 sm:$0xff] (!%p2626_p6) }
  0xf6   : > { %2725 = vmatmul.mubr.msk.f32.vlgmr.msra.gmra.mrb[0].mxu0 (!%p2626_p6), %vm1004_vm2, %v995_v1  ;;  %s4074_s28 = sld [smem:[#allocation23_spill]] (!%p2626_p6) }
  0xf7   : > { %s3747_s5 = scalar_lea.vmem %s4072_s19, %s2669_s21 }
  0xf9   : > { %s978_s26 = scalar_lea.vmem %s4070_s3, %s3688_s4 }
  0xfc   : > { %v1082_v5 = vld [vmem:[%s4074_s28] sm:$0xff] }
 0x1c9   : > { %v1078_v4 = vpop.f32.mrb[0].mxu0 }
 0x1ca   : > { %v1079_v6 = vadd.f32 %v2627_v3, %v1078_v4  ;;  %v2726_v7 = vpop.f32.mrb[1].mxu0 }
 0x1cc   : > { %v1083_v8 = vadd.f32 %v1082_v5, %v1079_v6 }
 0x1ce   : > { %1085 = vst.msk [vmem:[%s3752_s25] sm:$0xff] %vm1084_vm3, %v1083_v8 }
 0x1cf PF: > { %v1172_v9 = vld [vmem:[%s3706_s2] sm:$0xff]  ;;  %v1173_v10 = vld [vmem:[%s3706_s2 + $0x8] sm:$0xff]  ;;  %v3281_v12 = vmov 0.0|0.0   ;;  %v1174_v15 = vld [vmem:[%s3706_s2 + $0x10] sm:$0xff]  ;;  %vm3282_vm4 = vmmov 0   ;;  %v3283_v20 = vmov 0.0   ;;  %v1334_v30 = vlaneseq }
 0x1d0   : > { %v1087_v11 = vld [vmem:[%s3697_s16] sm:$0xff]  ;;  %2847 = vmatprep.subr.bf16.mxu1 %v3281_v12  ;;  %2841 = vmatprep.subr.bf16.mxu0 %v3281_v12  ;;  %v2848_v13 = vpack.c.bf16 %v1173_v10, %v1172_v9  ;;  %v1088_v14 = vld [vmem:[%s3697_s16 + $0x8] sm:$0xff]  ;;  %v1175_v16 = vld [vmem:[%s3706_s2 + $0x18] sm:$0xff]  ;;  %vm1098_vm5 = vcmask 261120   ;;  %s4076_s29 = sld [smem:[#allocation27_spill]]  ;;  %s4078_s12 = sld [smem:[#allocation30_spill]] }
 0x1d1   : > { %v2842_v17 = vpack.c.bf16 %v1088_v14, %v1087_v11  ;;  %v1089_v18 = vld [vmem:[%s3697_s16 + $0x10] sm:$0xff]  ;;  %v1090_v19 = vld [vmem:[%s3697_s16 + $0x18] sm:$0xff]  ;;  %2746 = vmatprep.mubr.msk.f32.mxu1 %vm3282_vm4, %v3283_v20  ;;  %2735 = vmatprep.mubr.msk.f32.mxu0 %vm3282_vm4, %v3283_v20  ;;  %v2851_v21 = vpack.c.bf16 %v1175_v16, %v1174_v15  ;;  %v1253_v23 = vld [vmem:[%s3715_s15] sm:$0xff]  ;;  %v1335_v31 = vand.u32 127, %v1334_v30  ;;  %s4075_s16 = scalar_lea.vmem %s3969_s7, %s3688_s4  ;;  %vm1418_vm0 = vcmask 64512   ;;  %s4080_s18 = sld [smem:[#allocation21_spill]] }
 0x1d2   : > { %2849 = vmatpush3.bf16.msra.mxu1 %v2848_v13  ;;  %v2845_v22 = vpack.c.bf16 %v1090_v19, %v1089_v18  ;;  %v1254_v24 = vld [vmem:[%s3715_s15 + $0x8] sm:$0xff]  ;;  %v1255_v27 = vld [vmem:[%s3715_s15 + $0x10] sm:$0xff]  ;;  %v1256_v28 = vld [vmem:[%s3715_s15 + $0x18] sm:$0xff]  ;;  %vm2213_vm1 = vcmask 523264  }
 0x1d3   : > { %2843 = vmatpush3.bf16.msra.mxu0 %v2842_v17  ;;  %2850 = vmatprep.subr.bf16.mxu1 %v3281_v12  ;;  %v2854_v26 = vpack.c.bf16 %v1254_v24, %v1253_v23  ;;  %v2857_v29 = vpack.c.bf16 %v1256_v28, %v1255_v27  ;;  %vm1431_vm6 = vcmp.ge.s32.totalorder %v1335_v31, 8  ;;  %vm1432_vm7 = vcmp.lt.s32.totalorder %v1335_v31, 16  ;;  %v2632_v32 = vld [vmem:[%s4075_s16] ss:$0 sm:$0xff] }
 0x1d4   : > { %2844 = vmatprep.subr.bf16.mxu0 %v3281_v12  ;;  %vm1337_vm8 = vcmp.lt.s32.totalorder %v1335_v31, 8  ;;  %vm1433_vm9 = vmand %vm1431_vm6, %vm1432_vm7  ;;  %vm1668_vm10 = vcmp.ge.s32.totalorder %v1335_v31, 16  ;;  %vm1669_vm11 = vcmp.lt.s32.totalorder %v1335_v31, 24  ;;  %vm1833_vm13 = vcmp.ge.s32.totalorder %v1335_v31, 24 }
 0x1d5   : > { %v3781_v25 = vld [vmem:[%s3752_s25] sm:$0xff]  ;;  %v3812_v37 = vsel %vm1337_vm8, 1.0, %v3283_v20  ;;  %v2639_v38 = vsel %vm1433_vm9, 1.0, %v3283_v20  ;;  %vm1670_vm12 = vmand %vm1668_vm10, %vm1669_vm11  ;;  %vm1834_vm14 = vcmp.lt.s32.totalorder %v1335_v31, 32 }
 0x1d6   : > { %2852 = vmatpush3.bf16.msra.mxu1 %v2851_v21  ;;  %s4077_s10 = scalar_lea.vmem %s4076_s29, %s3688_s4  ;;  %v3820_v44 = vsel %vm1670_vm12, 1.0, %v3283_v20  ;;  %vm1835_vm15 = vmand %vm1833_vm13, %vm1834_vm14  ;;  %s4079_s8 = scalar_lea.vmem %s4078_s12, %s3688_s4 }
 0x1d7   : > { %2846 = vmatpush3.bf16.msra.mxu0 %v2845_v22  ;;  %2765 = vmatprep.subr.mxu1 %v3283_v20  ;;  %v2630_v33 = vld [vmem:[%s4077_s10] ss:$0 sm:$0xff]  ;;  %v3833_v46 = vsel %vm1835_vm15, 1.0, %v3283_v20  ;;  %v1999_v24 = vld [vmem:[%s4080_s18 + $0x8] sm:$0xff]  ;;  %v2001_v28 = vld [vmem:[%s4080_s18 + $0x18] sm:$0xff] }
 0x1d8   : > { %2853 = vmatprep.subr.bf16.mxu0 %v3281_v12  ;;  %v2634_v50 = vld [vmem:[%s4079_s8] ss:$0 sm:$0xff] }
 0x1d9   : > { %2747 = vmatmul.mubr.msk.f32.vlgmr.msra.gmra.mrb[0].mxu1 %vm1098_vm5, %v3781_v25  ;;  %v1998_v23 = vld [vmem:[%s4080_s18] sm:$0xff] }
 0x1da   : > { %2736 = vmatmul.mubr.msk.f32.vlgmr.msra.gmra.mrb[0].mxu0 %vm1098_vm5, %v3781_v25  ;;  %2767 = vmatprep.mubr.msk.f32.mxu1 %vm3282_vm4, %v3283_v20  ;;  %v2860_v27 = vpack.c.bf16 %v1999_v24, %v1998_v23 }
 0x1db   : > { %2855 = vmatpush3.bf16.msra.mxu0 %v2854_v26  ;;  %2757 = vmatprep.mubr.msk.f32.mxu0 %vm3282_vm4, %v3283_v20  ;;  %v2000_v26 = vld [vmem:[%s4080_s18 + $0x10] sm:$0xff] }
 0x1dc   : > { %2856 = vmatprep.subr.bf16.mxu0 %v3281_v12 }
 0x1df   : > { %2858 = vmatpush3.bf16.msra.mxu0 %v2857_v29  ;;  %v2863_v29 = vpack.c.bf16 %v2001_v28, %v2000_v26  ;;  %v2658_v26 = vld [vmem:[%s986_s20] ss:$0 sm:$0xff] }
 0x1e0   : > { %2760 = vmatprep.subr.mxu0 %v3283_v20 }
 0x1e2   : > { %2758 = vmatmul.mubr.msk.f32.vlgmr.msra.gmra.mrb[2].mxu0 %vm1098_vm5, %v3781_v25 }
 0x1e3   : > { %2762 = vmatprep.mubr.msk.f32.mxu0 %vm3282_vm4, %v3283_v20 }
 0x2ac   : > { %v1249_v34 = vpop.f32.mrb[0].mxu1 }
 0x2ad   : > { %v1250_v35 = vadd.f32 %v2632_v32, %v1249_v34  ;;  %v1168_v36 = vpop.f32.mrb[0].mxu0  ;;  %v2748_v39 = vpop.f32.mrb[1].mxu1 }
 0x2ae   : > { %v1169_v40 = vadd.f32 %v2630_v33, %v1168_v36  ;;  %v2737_v41 = vpop.f32.mrb[1].mxu0 }
 0x2af   : > { %2761 = vmatpush3.xpose.msk.msra.mxu0 %vm1098_vm5, %v1250_v35  ;;  %2766 = vmatpush3.xpose.msk.msra.mxu1 %vm1098_vm5, %v1250_v35 }
 0x2b0   : > { %v1341_v42 = vmul.f32 %v3812_v37, %v1169_v40  ;;  %v1436_v43 = vmul.f32 %v2639_v38, %v1169_v40  ;;  %2780 = vmatprep.subr.mxu1 %v3283_v20  ;;  %2770 = vmatprep.subr.mxu0 %v3283_v20  ;;  %v1673_v45 = vmul.f32 %v3820_v44, %v1169_v40 }
 0x2b1   : > { %v1838_v49 = vmul.f32 %v3833_v46, %v1169_v40 }
 0x2b2   : > { %2763 = vmatmul.mubr.msk.f32.vlgmr.msra.gmra.mrb[4].mxu0 %vm1098_vm5, %v1341_v42  ;;  %2768 = vmatmul.mubr.msk.f32.vlgmr.msra.gmra.mrb[2].mxu1 %vm1098_vm5, %v1436_v43 }
 0x2b3   : > { %2781 = vmatpush3.xpose.msk.msra.mxu1 %vm1098_vm5, %v1250_v35  ;;  %2782 = vmatprep.mubr.msk.f32.mxu1 %vm3282_vm4, %v3283_v20 }
 0x2b4   : > { %2790 = vmatprep.subr.mxu1 %v3283_v20  ;;  %2772 = vmatprep.mubr.msk.f32.mxu0 %vm3282_vm4, %v3283_v20 }
 0x2b5   : > { %v1330_v47 = vpop.f32.mrb[2].mxu0 }
 0x2b6   : > { %2783 = vmatmul.mubr.msk.f32.vlgmr.msra.gmra.mrb[4].mxu1 %vm1098_vm5, %v1673_v45  ;;  %v2759_v48 = vpop.f32.mrb[3].mxu0  ;;  %v3849_v51 = vadd.f32 %v2634_v50, %v1330_v47 }
 0x2b7   : > { %2791 = vmatpush3.xpose.msk.msra.mxu1 %vm1098_vm5, %v1250_v35  ;;  %2792 = vmatprep.mubr.msk.f32.mxu1 %vm3282_vm4, %v3283_v20 }
 0x2b8   : > { %2859 = vmatprep.subr.bf16.mxu1 %v3281_v12  ;;  %v1521_v52 = vmul.f32 %v2639_v38, %v3849_v51  ;;  %v1430_v35 = vmul.f32 %v3812_v37, %v3849_v51  ;;  %v1758_v40 = vmul.f32 %v3820_v44, %v3849_v51  ;;  %v1923_v42 = vmul.f32 %v3833_v46, %v3849_v51  ;;  %v2652_v46 = vld [vmem:[%s970_s27] ss:$0 sm:$0xff] }
 0x2ba   : > { %2793 = vmatmul.mubr.msk.f32.vlgmr.msra.gmra.mrb[6].mxu1 %vm1098_vm5, %v1838_v49  ;;  %2771 = vmatpush3.msra.mxu0 %v1521_v52 }
 0x2bb   : > { %2808 = vmatprep.mubr.msk.f32.mxu1 %vm3282_vm4, %v3283_v20  ;;  %2775 = vmatprep.subr.mxu0 %v3283_v20 }
 0x2bc   : > { %2861 = vmatpush3.bf16.msra.mxu1 %v2860_v27 }
 0x2bd   : > { %2862 = vmatprep.subr.bf16.mxu1 %v3281_v12 }
 0x2c0   : > { %2864 = vmatpush3.bf16.msra.mxu1 %v2863_v29 }
 0x2c1   : > { %2871 = vmatprep.subr.bf16.mxu1 %v3281_v12 }
 0x385   : > { %v1414_v53 = vpop.f32.mrb[4].mxu0  ;;  %v1506_v54 = vpop.f32.mrb[2].mxu1 }
 0x386   : > { %v2764_v55 = vpop.f32.mrb[5].mxu0  ;;  %v2769_v56 = vpop.f32.mrb[3].mxu1  ;;  %v1510_v57 = vsel %vm1418_vm0, %v1506_v54, -inf  ;;  %v1419_v61 = vsel %vm1418_vm0, %v1414_v53, -inf }
 0x387   : > { %1511 = vmax.xlane.f32.xlu0 %v1510_v57  ;;  %v2113_v57 = vld [vmem:[%s3733_s22] sm:$0xff] }
 0x389   : > { %v1743_v58 = vpop.f32.mrb[4].mxu1 }
 0x38a   : > { %v2784_v59 = vpop.f32.mrb[5].mxu1  ;;  %v1747_v60 = vsel %vm1418_vm0, %v1743_v58, -inf }
 0x38b   : > { %1748 = vmax.xlane.f32.xlu1 %v1747_v60  ;;  %1420 = vmax.xlane.f32.xlu0 %v1419_v61  ;;  %v2116_v60 = vld [vmem:[%s3733_s22 + $0x18] sm:$0xff] }
 0x38d   : > { %v1908_v62 = vpop.f32.mrb[6].mxu1 }
 0x38e   : > { %v2794_v63 = vpop.f32.mrb[7].mxu1  ;;  %v1912_v0 = vsel %vm1418_vm0, %v1908_v62, -inf }
 0x38f   : > { %1913 = vmax.xlane.f32.xlu1 %v1912_v0  ;;  %v2199_v63 = vld [vmem:[%s3747_s5 + $0x8] sm:$0xff]  ;;  %v2200_v0 = vld [vmem:[%s3747_s5 + $0x10] sm:$0xff] }
 0x414   : > { %v1512_v1 = vpop.xlane.xlu0 %1511 }
 0x415   : > { %v1513_v2 = vsub.f32 %v1506_v54, %v1512_v1 }
 0x417   : > { %v1514_v3 = vmul.f32 1.442695, %v1513_v2  ;;  %v2201_v2 = vld [vmem:[%s3747_s5 + $0x18] sm:$0xff] }
 0x418   : > { %v1749_v4 = vpop.xlane.xlu1 %1748  ;;  %v1421_v5 = vpop.xlane.xlu0 %1420 }
 0x419   : > { %3001 = vpow2.f32 %v1514_v3  ;;  %v1750_v6 = vsub.f32 %v1743_v58, %v1749_v4  ;;  %v1422_v7 = vsub.f32 %v1414_v53, %v1421_v5  ;;  %v2114_v58 = vld [vmem:[%s3733_s22 + $0x8] sm:$0xff]  ;;  %v2875_v3 = vpack.c.bf16 %v2201_v2, %v2200_v0  ;;  %v2202_v4 = vld [vmem:[%s3747_s5 + $0x20] sm:$0xff] }
 0x41a   : > { %v2866_v59 = vpack.c.bf16 %v2114_v58, %v2113_v57  ;;  %v2203_v5 = vld [vmem:[%s3747_s5 + $0x28] sm:$0xff] }
 0x41b   : > { %v1751_v8 = vmul.f32 1.442695, %v1750_v6  ;;  %v1423_v9 = vmul.f32 1.442695, %v1422_v7  ;;  %v2878_v6 = vpack.c.bf16 %v2203_v5, %v2202_v4 }
 0x41c   : > { %v1914_v10 = vpop.xlane.xlu1 %1913 }
 0x41d   : > { %3003 = vpow2.f32 %v1751_v8  ;;  %v1915_v11 = vsub.f32 %v1908_v62, %v1914_v10  ;;  %v2198_v62 = vld [vmem:[%s3747_s5] sm:$0xff] }
 0x41e   : > { %3005 = vpow2.f32 %v1423_v9  ;;  %v2872_v1 = vpack.c.bf16 %v2199_v63, %v2198_v62 }
 0x41f   : > { %v1916_v13 = vmul.f32 1.442695, %v1915_v11 }
 0x421   : > { %3007 = vpow2.f32 %v1916_v13 }
 0x423   : > { %v3002_v14 = vpop.eup %3001 }
 0x424   : > { %v1516_v15 = vsel %vm1418_vm0, %v3002_v14, 0.0 }
 0x425   : > { %1517 = vadd.xlane.f32.xlu0 %v1516_v15 }
 0x427   : > { %v3004_v16 = vpop.eup %3003 }
 0x428   : > { %v3006_v17 = vpop.eup %3005  ;;  %v1753_v18 = vsel %vm1418_vm0, %v3004_v16, 0.0 }
 0x429   : > { %1754 = vadd.xlane.f32.xlu0 %v1753_v18  ;;  %v1425_v19 = vsel %vm1418_vm0, %v3006_v17, 0.0  ;;  %v2205_v18 = vld [vmem:[%s3747_s5 + $0x38] sm:$0xff] }
 0x42a   : > { %1426 = vadd.xlane.f32.xlu1 %v1425_v19 }
 0x42b   : > { %v3008_v21 = vpop.eup %3007 }
 0x42c   : > { %v1918_v22 = vsel %vm1418_vm0, %v3008_v21, 0.0 }
 0x42e   : > { %1919 = vadd.xlane.f32.xlu1 %v1918_v22 }
 0x4b2   : > { %v1518_v30 = vpop.xlane.xlu0 %1517 }
 0x4b3   : > { %3009 = vrcp.f32 %v1518_v30 }
 0x4b6   : > { %v1755_v34 = vpop.xlane.xlu0 %1754 }
 0x4b7   : > { %v1427_v31 = vpop.xlane.xlu1 %1426 }
 0x4b8   : > { %3011 = vrcp.f32 %v1427_v31 }
 0x4b9   : > { %3013 = vrcp.f32 %v1755_v34 }
 0x4bb   : > { %v1920_v39 = vpop.xlane.xlu1 %1919 }
 0x4bc   : > { %3015 = vrcp.f32 %v1920_v39 }
 0x4bd   : > { %v3010_v32 = vpop.eup %3009 }
 0x4be   : > { %v1520_v33 = vmul.f32 %v3010_v32, %v3002_v14  ;;  %v2655_v14 = vld [vmem:[%s800_s1] ss:$0 sm:$0xff] }
 0x4c0   : > { %2773 = vmatmul.mubr.msk.f32.vlgmr.msra.gmra.mrb[6].mxu0 %vm1418_vm0, %v1520_v33 }
 0x4c1   : > { %2776 = vmatpush3.msra.mxu0 %v1430_v35  ;;  %2777 = vmatprep.mubr.msk.f32.mxu0 %vm3282_vm4, %v3283_v20 }
 0x4c2   : > { %2785 = vmatprep.subr.mxu0 %v3283_v20  ;;  %v3012_v36 = vpop.eup %3011 }
 0x4c3   : > { %v1429_v38 = vmul.f32 %v3012_v36, %v3006_v17  ;;  %v3014_v37 = vpop.eup %3013  ;;  %v2204_v17 = vld [vmem:[%s3747_s5 + $0x30] sm:$0xff] }
 0x4c4   : > { %v1757_v41 = vmul.f32 %v3014_v37, %v3004_v16  ;;  %v2881_v19 = vpack.c.bf16 %v2205_v18, %v2204_v17 }
 0x4c6   : > { %v3016_v43 = vpop.eup %3015 }
 0x4c7   : > { %v1922_v44 = vmul.f32 %v3016_v43, %v3008_v21  ;;  %v2661_v43 = vld [vmem:[%s816_s9] ss:$0 sm:$0xff] }
 0x4c8   : > { %2778 = vmatmul.mubr.msk.f32.vlgmr.msra.gmra.mrb[6].mxu0 %vm1418_vm0, %v1429_v38 }
 0x4c9   : > { %2786 = vmatpush3.msra.mxu0 %v1758_v40  ;;  %2787 = vmatprep.mubr.msk.f32.mxu0 %vm3282_vm4, %v3283_v20 }
 0x4ca   : > { %2795 = vmatprep.subr.mxu0 %v3283_v20 }
 0x4d0   : > { %2788 = vmatmul.mubr.msk.f32.vlgmr.msra.gmra.mrb[6].mxu0 %vm1418_vm0, %v1757_v41  ;;  %v2660_v41 = vld [vmem:[%s808_s30] ss:$0 sm:$0xff] }
 0x4d1   : > { %2796 = vmatpush3.msra.mxu0 %v1923_v42  ;;  %2797 = vmatprep.mubr.msk.f32.mxu0 %vm3282_vm4, %v3283_v20 }
 0x4d2   : > { %2865 = vmatprep.subr.bf16.mxu0 %v3281_v12 }
 0x4d8   : > { %2798 = vmatmul.mubr.msk.f32.vlgmr.msra.gmra.mrb[6].mxu0 %vm1418_vm0, %v1922_v44 }
 0x4d9   : > { %2819 = vmatprep.mubr.msk.f32.mxu0 %vm3282_vm4, %v3283_v20  ;;  %2867 = vmatpush3.bf16.msra.mxu0 %v2866_v59 }
 0x4da   : > { %2868 = vmatprep.subr.bf16.mxu0 %v3281_v12 }
 0x5ab   : > { %v1993_v45 = vpop.f32.mrb[6].mxu0 }
 0x5ac   : > { %v2799_v47 = vpop.f32.mrb[7].mxu0  ;;  %2809 = vmatmul.mubr.msk.f32.vlgmr.msra.gmra.mrb[8].mxu1 %vm1098_vm5, %v1993_v45 }
 0x5ad   : > { %2838 = vmatprep.mubr.msk.f32.mxu1 %vm3282_vm4, %v3283_v20  ;;  %2873 = vmatpush3.bf16.msra.mxu1 %v2872_v1 }
 0x5ae   : > { %2874 = vmatprep.subr.bf16.mxu1 %v3281_v12 }
 0x5b1   : > { %2876 = vmatpush3.bf16.msra.mxu1 %v2875_v3 }
 0x5b2   : > { %2877 = vmatprep.subr.bf16.mxu1 %v3281_v12 }
 0x5b5   : > { %2879 = vmatpush3.bf16.msra.mxu1 %v2878_v6 }
 0x5b6   : > { %2880 = vmatprep.subr.bf16.mxu1 %v3281_v12  ;;  %v2656_v12 = vld [vmem:[%s978_s26] ss:$0 sm:$0xff] }
 0x5b9   : > { %2882 = vmatpush3.bf16.msra.mxu1 %v2881_v19 }
 0x67f   : > { %v2078_v48 = vpop.f32.mrb[8].mxu1 }
 0x680   : > { %v2079_v49 = vadd.f32 %v2652_v46, %v2078_v48  ;;  %v2810_v50 = vpop.f32.mrb[9].mxu1 }
 0x682   : > { %v2082_v51 = vadd.f32 %v2079_v49, %v3781_v25  ;;  %v2115_v25 = vld [vmem:[%s3733_s22 + $0x10] sm:$0xff]  ;;  %s4082_s22 = scalar_lea.vmem [#allocation6], %s3677_s14 }
 0x683   : > { %v2869_v61 = vpack.c.bf16 %v2116_v60, %v2115_v25  ;;  %v2654_v11 = vld [vmem:[%s4082_s22] ss:$0 sm:$0xff] }
 0x684   : > { %v2085_v52 = vsel %vm1098_vm5, %v2082_v51, 0.0 }
 0x685   : > { %2086 = vadd.xlane.f32.xlu0 %v2085_v52  ;;  %2870 = vmatpush3.bf16.msra.mxu0 %v2869_v61 }
 0x712   : > { %v2087_v53 = vpop.xlane.xlu0 %2086 }
 0x713   : > { %v2089_v54 = vmul.f32 0.03125, %v2087_v53 }
 0x715   : > { %v2090_v20 = vsub.f32 %v2082_v51, %v2089_v54 }
 0x717   : > { %v2091_v55 = vmul.f32 %v2090_v20, %v2090_v20 }
 0x719   : > { %v2092_v56 = vsel %vm1098_vm5, %v2091_v55, 0.0 }
 0x71a   : > { %2093 = vadd.xlane.f32.xlu1 %v2092_v56 }
 0x7a7   : > { %v2094_v7 = vpop.xlane.xlu1 %2093 }
 0x7a8   : > { %v2095_v8 = vmul.f32 0.03125, %v2094_v7 }
 0x7aa   : > { %v2096_v9 = vadd.f32 1e-05, %v2095_v8 }
 0x7ac   : > { %3017 = vrsqrt.f32 %v2096_v9 }
 0x7b6   : > { %v3018_v10 = vpop.eup %3017 }
 0x7b7   : > { %v2098_v13 = vmul.f32 %v3018_v10, %v2090_v20 }
 0x7b9   : > { %v2105_v15 = vmul.f32 %v2654_v11, %v2098_v13 }
 0x7bb   : > { %v2112_v16 = vadd.f32 %v2655_v14, %v2105_v15 }
 0x7bd   : > { %2820 = vmatmul.mubr.msk.f32.vlgmr.msra.gmra.mrb[8].mxu0 %vm1098_vm5, %v2112_v16 }
 0x890   : > { %v2193_v21 = vpop.f32.mrb[8].mxu0 }
 0x891   : > { %v2194_v22 = vadd.f32 %v2656_v12, %v2193_v21  ;;  %v2821_v23 = vpop.f32.mrb[9].mxu0 }
 0x893   : > { %v2197_v24 = vmax.f32 %v2194_v22, 0.0 }
 0x895   : > { %2839 = vmatmul.mubr.msk.f32.vlgmr.msra.gmra.mrb[10].mxu1 %vm2213_vm1, %v2197_v24 }
 0x968   : > { %v2283_v27 = vpop.f32.mrb[10].mxu1 }
 0x969   : > { %v2284_v28 = vadd.f32 %v2658_v26, %v2283_v27  ;;  %v2840_v29 = vpop.f32.mrb[11].mxu1 }
 0x96b   : > { %v2287_v30 = vadd.f32 %v2284_v28, %v2112_v16 }
 0x96d   : > { %v2290_v31 = vsel %vm1098_vm5, %v2287_v30, 0.0 }
 0x96e   : > { %2291 = vadd.xlane.f32.xlu0 %v2290_v31 }
 0x9fb   : > { %v2292_v32 = vpop.xlane.xlu0 %2291 }
 0x9fc   : > { %v2293_v33 = vmul.f32 0.03125, %v2292_v32 }
 0x9fe   : > { %v2294_v34 = vsub.f32 %v2287_v30, %v2293_v33 }
 0xa00   : > { %v2295_v35 = vmul.f32 %v2294_v34, %v2294_v34 }
 0xa02   : > { %v2296_v36 = vsel %vm1098_vm5, %v2295_v35, 0.0 }
 0xa03   : > { %2297 = vadd.xlane.f32.xlu1 %v2296_v36 }
 0xa90   : > { %v2298_v38 = vpop.xlane.xlu1 %2297 }
 0xa91   : > { %v2299_v39 = vmul.f32 0.03125, %v2298_v38 }
 0xa93   : > { %v2300_v40 = vadd.f32 1e-05, %v2299_v39 }
 0xa95   : > { %3019 = vrsqrt.f32 %v2300_v40 }
 0xa9f   : > { %v3020_v37 = vpop.eup %3019 }
 0xaa0   : > { %v2302_v42 = vmul.f32 %v3020_v37, %v2294_v34 }
 0xaa2   : > { %v2309_v44 = vmul.f32 %v2660_v41, %v2302_v42 }
 0xaa4   : > { %v2316_v45 = vadd.f32 %v2661_v43, %v2309_v44 }
 0xaa6   : > { %2317 = vst.msk [vmem:[%s3752_s25] sm:$0xff] %vm1098_vm5, %v2316_v45 }
 0xaa7 PF: > { %s4085_s5 = sld [smem:[#allocation17_spill]]  ;;  %s4086_s1 = sld [smem:[#allocation13_spill]] }
 0xaa8   : > { %s4087_s22 = sld [smem:[#allocation14_spill]]  ;;  %s4088_s23 = sld [smem:[#allocation20_spill]] }
 0xaa9   : > { %s4089_s24 = sld [smem:[#allocation15_spill]]  ;;  %s4090_s2 = sld [smem:[#allocation16_spill]] }
 0xaaa   : > { %s4091_s25 = sld [smem:[#allocation18_spill]]  ;;  %s4092_s3 = sld [smem:[#allocation19_spill]] }
 0xaad   : > { %s32_s26 = sadd.s32 1, %s4085_s5  }
 0xaae   : > { %p29_p9 = scmp.ge.s32.totalorder %s32_s26, 6  }
 0xab0   :  { %31 = sbr.rel (!%p29_p9) target bundleno = 26 (0x1a), region = 223 }
 0xab7   :  { %2337 = vsyncpa [#allocation3], 1 }
 0xab8   :  { %2339 = vsyncpa [#allocation3 + $0x1], 1 }
 0xab9   :  { %2340 = vsyncpa [#allocation5], 1 }

// kernel: _lambda_.4
= control target key start
LH: loop header
LB: loop body
LE: loop exit
PB: predicated region body
PF: predicated region fallthrough
CT: control target
= control target key end

     0   :  { %s4610_s30 = smov 0   ;;  %s5115_s0 = inlined_call_operand.vmem [shape: f32[2,8,32], index: 0, kind: input, shape index: {}]   ;;  %s5116_s1 = inlined_call_operand.vmem [shape: f32[2,8,32], index: 1, kind: input, shape index: {}]   ;;  %s5117_s2 = inlined_call_operand.vmem [shape: f32[2,32,32], index: 2, kind: input, shape index: {}]   ;;  %s5118_s3 = inlined_call_operand.vmem [shape: f32[2,1,32], index: 3, kind: input, shape index: {}]   ;;  %s5119_s4 = inlined_call_operand.vmem [shape: f32[2,32,32], index: 4, kind: input, shape index: {}]   ;;  %s5120_s5 = inlined_call_operand.vmem [shape: f32[2,1,32], index: 5, kind: input, shape index: {}]   ;;  %s5121_s6 = inlined_call_operand.vmem [shape: f32[2,32,32], index: 6, kind: input, shape index: {}]   ;;  %s5122_s7 = inlined_call_operand.vmem [shape: f32[2,1,32], index: 7, kind: input, shape index: {}]   ;;  %s5123_s8 = inlined_call_operand.vmem [shape: f32[2,32,32], index: 8, kind: input, shape index: {}]   ;;  %s5124_s9 = inlined_call_operand.vmem [shape: f32[2,1,32], index: 9, kind: input, shape index: {}]   ;;  %s5125_s10 = inlined_call_operand.vmem [shape: f32[2,1,32], index: 10, kind: input, shape index: {}]   ;;  %s5126_s11 = inlined_call_operand.vmem [shape: f32[2,1,32], index: 11, kind: input, shape index: {}]   ;;  %s5127_s12 = inlined_call_operand.vmem [shape: f32[2,32,32], index: 12, kind: input, shape index: {}]   ;;  %s5128_s13 = inlined_call_operand.vmem [shape: f32[2,1,32], index: 13, kind: input, shape index: {}]   ;;  %s5129_s14 = inlined_call_operand.vmem [shape: f32[2,32,32], index: 14, kind: input, shape index: {}]   ;;  %s5130_s15 = inlined_call_operand.vmem [shape: f32[2,1,32], index: 15, kind: input, shape index: {}]   ;;  %s5131_s16 = inlined_call_operand.vmem [shape: f32[2,32,32], index: 16, kind: input, shape index: {}]   ;;  %s5132_s17 = inlined_call_operand.vmem [shape: f32[2,1,32], index: 17, kind: input, shape index: {}]   ;;  %s5133_s18 = inlined_call_operand.vmem [shape: f32[2,32,32], index: 18, kind: input, shape index: {}]   ;;  %s5134_s19 = inlined_call_operand.vmem [shape: f32[2,1,32], index: 19, kind: input, shape index: {}]   ;;  %s5135_s20 = inlined_call_operand.vmem [shape: f32[2,1,32], index: 20, kind: input, shape index: {}]   ;;  %s5136_s21 = inlined_call_operand.vmem [shape: f32[2,1,32], index: 21, kind: input, shape index: {}]   ;;  %s5137_s22 = inlined_call_operand.vmem [shape: f32[2,32,64], index: 22, kind: input, shape index: {}]   ;;  %s5138_s23 = inlined_call_operand.vmem [shape: f32[2,1,64], index: 23, kind: input, shape index: {}]   ;;  %s5139_s24 = inlined_call_operand.vmem [shape: f32[2,64,32], index: 24, kind: input, shape index: {}]   ;;  %s5140_s25 = inlined_call_operand.vmem [shape: f32[2,1,32], index: 25, kind: input, shape index: {}]   ;;  %s5141_s26 = inlined_call_operand.vmem [shape: f32[2,1,32], index: 26, kind: input, shape index: {}]   ;;  %s5142_s27 = inlined_call_operand.vmem [shape: f32[2,1,32], index: 27, kind: input, shape index: {}]   ;;  %s5143_s28 = inlined_call_operand.vmem [shape: f32[2,8,32], index: 28, kind: output, shape index: {}]  }
   0x1   :  { %5151 = sst [smem:[#allocation11_spill]] %s5115_s0 }
   0x2   :  { %5152 = sst [smem:[#allocation12_spill]] %s5116_s1 }
   0x3   :  { %5153 = sst [smem:[#allocation13_spill]] %s5117_s2 }
   0x4   :  { %5154 = sst [smem:[#allocation14_spill]] %s5118_s3  ;;  %s4612_s3 = smov 0  }
   0x5   :  { %5155 = sst [smem:[#allocation15_spill]] %s5119_s4 }
   0x6   :  { %5156 = sst [smem:[#allocation16_spill]] %s5120_s5  ;;  %s4606_s5 = smov 0  }
   0x7   :  { %5157 = sst [smem:[#allocation17_spill]] %s5121_s6 }
   0x8   :  { %5158 = sst [smem:[#allocation18_spill]] %s5122_s7 }
   0x9   :  { %5159 = sst [smem:[#allocation19_spill]] %s5123_s8  ;;  %s4604_s8 = smov 0  }
   0xa   :  { %5160 = sst [smem:[#allocation20_spill]] %s5124_s9  ;;  %s4608_s9 = smov 0  }
   0xb   :  { %5161 = sst [smem:[#allocation21_spill]] %s5125_s10 }
   0xc   :  { %5162 = sst [smem:[#allocation22_spill]] %s5126_s11 }
   0xd   :  { %5163 = sst [smem:[#allocation23_spill]] %s5127_s12 }
   0xe   :  { %5164 = sst [smem:[#allocation24_spill]] %s5129_s14 }
   0xf   :  { %5165 = sst [smem:[#allocation25_spill]] %s5131_s16 }
  0x10   :  { %5166 = sst [smem:[#allocation26_spill]] %s5132_s17 }
  0x11   :  { %5167 = sst [smem:[#allocation27_spill]] %s5133_s18 }
  0x12   :  { %5168 = sst [smem:[#allocation28_spill]] %s5134_s19 }
  0x13   :  { %5169 = sst [smem:[#allocation29_spill]] %s5135_s20 }
  0x14   :  { %5170 = sst [smem:[#allocation30_spill]] %s5136_s21 }
  0x15   :  { %5171 = sst [smem:[#allocation31_spill]] %s5137_s22 }
  0x16   :  { %5172 = sst [smem:[#allocation32_spill]] %s5138_s23 }
  0x17   :  { %5173 = sst [smem:[#allocation33_spill]] %s5139_s24 }
  0x18   :  { %5174 = sst [smem:[#allocation34_spill]] %s5140_s25 }
  0x19   :  { %5175 = sst [smem:[#allocation35_spill]] %s5141_s26 }
  0x1a   :  { %5176 = sst [smem:[#allocation36_spill]] %s5142_s27 }
  0x1b   :  { %5177 = sst [smem:[#allocation37_spill]] %s5143_s28 }
  0x1c LB: > { %5178 = sst [smem:[#allocation2_spill]] %s4438_s8  ;;  %s47_s6 = sadd.s32 1, %s4446_s9  ;;  %s4454_s3 = sphi %s4612_s3, %s38_s3   ;;  %s4450_s30 = sphi %s4610_s30, %s5253_s30   ;;  %s4446_s9 = sphi %s4608_s9, %s5252_s9   ;;  %s4442_s5 = sphi %s4606_s5, %s5251_s5   ;;  %s4438_s8 = sphi %s4604_s8, %s5250_s8  }
  0x1d   : > { %5179 = sst [smem:[#allocation3_spill]] %s4446_s9  ;;  %s50_s10 = sadd.s32 1, %s4450_s30 }
  0x1e   : > { %5180 = sst [smem:[#allocation4_spill]] %s4450_s30  ;;  %p48_p0 = scmp.ge.s32.totalorder %s47_s6, 2 }
  0x1f   : > { %5181 = sst [smem:[#allocation5_spill]] %s4454_s3  ;;  %p3882_p1 = scmp.ge.s32.totalorder %s4454_s3, 1 }
  0x20   : > { %p1010_p2 = scmp.lt.s32.totalorder %s4454_s3, 5  ;;  %s5255_s6 = smov (%p48_p0, %s47_s6), 0 }
  0x21   : > { %5182 = sst [smem:[#allocation6_spill]] %s5255_s6  ;;  %s5257_s10 = smov (!%p48_p0, %s50_s10), %s4450_s30 }
  0x22   : > { %p1011_p3 = pnand %p3882_p1, %p1010_p2  ;;  %p52_p4 = scmp.ge.s32.totalorder %s5257_s10, 2 }
  0x24   : > { %s5259_s10 = smov (%p52_p4, %s5257_s10), 0  ;;  %1014 = sbr.rel (%p1011_p3) target bundleno = 3856 (0xf10), region = 132 }
  0x25   : > { %5183 = sst [smem:[#allocation7_spill]] %s5259_s10 }
  0x2b   : > { %p1184_p5 = scmp.lt.s32.totalorder %s4442_s5, 1  ;;  %p1192_p6 = scmp.lt.s32.totalorder %s4438_s8, 1 }
  0x2c   : > { %s5187_s26 = sld [smem:[#allocation13_spill]]  ;;  %s5189_s2 = sld [smem:[#allocation15_spill]] }
  0x2d   : > { %s5261_s5 = smov (!%p1184_p5, %s4442_s5), 1  ;;  %s5192_s3 = sld [smem:[#allocation17_spill]] }
  0x2e   : > { %s4638_s0 = scalar_select %p1192_p6, %s4438_s8, 1 }
  0x2f   : > { %s4640_s11 = sshll.u32 %s5261_s5, 3  ;;  %s5195_s29 = sld [smem:[#allocation19_spill]] }
  0x30   : > { %s3963_s30 = sshll.u32 %s4638_s0, 5  ;;  %s5200_s14 = sld [smem:[#allocation24_spill]] }
  0x31   : > { %s5201_s16 = sld [smem:[#allocation25_spill]]  ;;  %s5203_s18 = sld [smem:[#allocation27_spill]] }
  0x32   : > { %s4658_s25 = scalar_lea.vmem %s5187_s26, %s3963_s30  ;;  %s4663_s7 = scalar_lea.vmem %s5189_s2, %s3963_s30 }
  0x33   : > { %5188 = sst [smem:[#allocation8_spill]] %s4658_s25  ;;  %s4672_s8 = scalar_lea.vmem %s5192_s3, %s3963_s30 }
  0x34   : > { %5190 = sst [smem:[#allocation9_spill]] %s4663_s7  ;;  %s5199_s25 = sld [smem:[#allocation23_spill]] }
  0x35   : > { %5193 = sst [smem:[#allocation10_spill]] %s4672_s8  ;;  %s4681_s2 = scalar_lea.vmem %s5195_s29, %s3963_s30 }
  0x36   : > { %s4707_s6 = scalar_lea.vmem %s5200_s14, %s3963_s30  ;;  %s3972_s17 = sshll.u32 %s4638_s0, 6 }
  0x37   : > { %s4716_s26 = scalar_lea.vmem %s5201_s16, %s3963_s30  ;;  %s4725_s1 = scalar_lea.vmem %s5203_s18, %s3963_s30 }
  0x38   : > { %s5209_s3 = sld [smem:[#allocation33_spill]]  ;;  %s5210_s22 = sld [smem:[#allocation34_spill]] }
  0x39   : > { %s5211_s21 = sld [smem:[#allocation35_spill]]  ;;  %s5213_s29 = sld [smem:[#allocation37_spill]] }
  0x3a   : > { %s4698_s24 = scalar_lea.vmem %s5199_s25, %s3963_s30  ;;  %s5207_s25 = sld [smem:[#allocation31_spill]] }
  0x3b   : > { %s5214_s27 = sld [smem:[#allocation2_spill]] }
  0x3e   : > { %s4752_s19 = scalar_lea.vmem %s5209_s3, %s3972_s17  ;;  %s1283_s12 = scalar_lea.vmem %s5210_s22, %s4638_s0 }
  0x3f   : > { %s1286_s14 = scalar_lea.vmem %s5211_s21, %s4638_s0  ;;  %s4770_s18 = scalar_lea.vmem %s5213_s29, %s4640_s11 }
  0x40   : > { %s4742_s28 = scalar_lea.vmem %s5207_s25, %s3963_s30  ;;  %s5212_s25 = sld [smem:[#allocation36_spill]] }
  0x41   : > { %p3906_p7 = scmp.ne.s32.totalorder %s5214_s27, 0 }
  0x42   : > { %s5215_s4 = sld [smem:[#allocation11_spill]] (!%p3906_p7)  ;;  %vm1299_vm0 = vcmask (!%p3906_p7), 261120  }
  0x43   : > { %1297 = sbr.rel (%p3906_p7) target bundleno = 75 (0x4b), region = 136 }
  0x46   : > { %s1289_s20 = scalar_lea.vmem %s5212_s25, %s4638_s0 }
  0x48   : > { %s5216_s22 = scalar_lea.vmem (!%p3906_p7), %s5215_s4, %s4640_s11 }
  0x49   : > { %v1298_v0 = vld [vmem:[%s5216_s22] sm:$0xff] (!%p3906_p7) }
  0x4a   : > { %1300 = vst.msk [vmem:[%s4770_s18] sm:$0xff] %vm1299_vm0, %v1298_v0 }
  0x4b PF: > { %s5217_s21 = sld [smem:[#allocation9_spill]]  ;;  %s5218_s10 = sld [smem:[#allocation8_spill]]  ;;  %v4456_v4 = vmov 0.0|0.0   ;;  %vm4457_vm1 = vmmov 0   ;;  %v4458_v12 = vmov 0.0   ;;  %vm1314_vm2 = vcmask 261120  }
  0x4c   : > { %4263 = vmatprep.subr.bf16.mxu1 %v4456_v4  ;;  %4257 = vmatprep.subr.bf16.mxu0 %v4456_v4  ;;  %s5219_s23 = sld [smem:[#allocation10_spill]]  ;;  %v1550_v22 = vlaneseq  ;;  %s5220_s30 = sld [smem:[#allocation16_spill]]  ;;  %vm1634_vm13 = vcmask 64512   ;;  %vm3433_vm14 = vcmask 523264  }
  0x4d   : > { %4078 = vmatprep.mubr.msk.f32.mxu1 %vm4457_vm1, %v4458_v12  ;;  %4067 = vmatprep.mubr.msk.f32.mxu0 %vm4457_vm1, %v4458_v12  ;;  %s5222_s16 = sld [smem:[#allocation14_spill]]  ;;  %s5224_s3 = sld [smem:[#allocation18_spill]] }
  0x4e   : > { %v1551_v23 = vand.u32 127, %v1550_v22  ;;  %s5228_s9 = sld [smem:[#allocation12_spill]]  ;;  %s5235_s22 = scalar_lea.vmem %s5128_s13, %s4638_s0 }
  0x4f   : > { %s5242_s7 = sld [smem:[#allocation30_spill]]  ;;  %s5244_s17 = sld [smem:[#allocation32_spill]] }
  0x50   : > { %vm1647_vm3 = vcmp.ge.s32.totalorder %v1551_v23, 8  ;;  %vm1648_vm4 = vcmp.lt.s32.totalorder %v1551_v23, 16  ;;  %vm1553_vm5 = vcmp.lt.s32.totalorder %v1551_v23, 8  ;;  %vm1884_vm7 = vcmp.ge.s32.totalorder %v1551_v23, 16 }
  0x51   : > { %v1388_v1 = vld [vmem:[%s5217_s21] sm:$0xff]  ;;  %v1389_v2 = vld [vmem:[%s5217_s21 + $0x8] sm:$0xff]  ;;  %v1390_v7 = vld [vmem:[%s5217_s21 + $0x10] sm:$0xff]  ;;  %vm1885_vm8 = vcmp.lt.s32.totalorder %v1551_v23, 24  ;;  %v4829_v29 = vsel %vm1553_vm5, 1.0, %v4458_v12  ;;  %vm2049_vm10 = vcmp.ge.s32.totalorder %v1551_v23, 24 }
  0x52   : > { %v1303_v3 = vld [vmem:[%s5218_s10] sm:$0xff]  ;;  %v4264_v5 = vpack.c.bf16 %v1389_v2, %v1388_v1  ;;  %v1304_v6 = vld [vmem:[%s5218_s10 + $0x8] sm:$0xff]  ;;  %v1391_v8 = vld [vmem:[%s5217_s21 + $0x18] sm:$0xff]  ;;  %s5221_s5 = scalar_lea.vmem %s5220_s30, %s4638_s0  ;;  %vm2050_vm11 = vcmp.lt.s32.totalorder %v1551_v23, 32  ;;  %s5226_s21 = sld [smem:[#allocation20_spill]] }
  0x53   : > { %v4258_v9 = vpack.c.bf16 %v1304_v6, %v1303_v3  ;;  %v1305_v10 = vld [vmem:[%s5218_s10 + $0x10] sm:$0xff]  ;;  %v1306_v11 = vld [vmem:[%s5218_s10 + $0x18] sm:$0xff]  ;;  %v4267_v13 = vpack.c.bf16 %v1391_v8, %v1390_v7  ;;  %v1469_v15 = vld [vmem:[%s5219_s23] sm:$0xff]  ;;  %s5223_s29 = scalar_lea.vmem %s5222_s16, %s4638_s0  ;;  %s5225_s4 = scalar_lea.vmem %s5224_s3, %s4638_s0 }
  0x54   : > { %4265 = vmatpush3.bf16.msra.mxu1 %v4264_v5  ;;  %v4261_v14 = vpack.c.bf16 %v1306_v11, %v1305_v10  ;;  %v1470_v16 = vld [vmem:[%s5219_s23 + $0x8] sm:$0xff]  ;;  %v4798_v17 = vld [vmem:[%s4770_s18] sm:$0xff]  ;;  %v1471_v19 = vld [vmem:[%s5219_s23 + $0x10] sm:$0xff]  ;;  %s5229_s30 = scalar_lea.vmem %s5228_s9, %s4640_s11  ;;  %s5232_s16 = sld [smem:[#allocation22_spill]] }
  0x55   : > { %4259 = vmatpush3.bf16.msra.mxu0 %v4258_v9  ;;  %4266 = vmatprep.subr.bf16.mxu1 %v4456_v4  ;;  %v4270_v18 = vpack.c.bf16 %v1470_v16, %v1469_v15  ;;  %v1472_v20 = vld [vmem:[%s5219_s23 + $0x18] sm:$0xff]  ;;  %v3909_v24 = vld [vmem:[%s5221_s5] ss:$0 sm:$0xff]  ;;  %vm1649_vm6 = vmand %vm1647_vm3, %vm1648_vm4  ;;  %s5234_s3 = scalar_lea.vmem %s5130_s15, %s4638_s0  ;;  %s5238_s9 = sld [smem:[#allocation28_spill]] }
  0x56   : > { %4260 = vmatprep.subr.bf16.mxu0 %v4456_v4  ;;  %v4273_v21 = vpack.c.bf16 %v1472_v20, %v1471_v19  ;;  %v3907_v25 = vld [vmem:[%s5223_s29] ss:$0 sm:$0xff]  ;;  %v4832_v30 = vsel %vm1649_vm6, 1.0, %v4458_v12  ;;  %vm1886_vm9 = vmand %vm1884_vm7, %vm1885_vm8  ;;  %v2215_v16 = vld [vmem:[%s4681_s2 + $0x8] sm:$0xff]  ;;  %s5240_s11 = sld [smem:[#allocation29_spill]] }
  0x57   : > { %v4840_v36 = vsel %vm1886_vm9, 1.0, %v4458_v12  ;;  %vm2051_vm12 = vmand %vm2049_vm10, %vm2050_vm11  ;;  %v3911_v42 = vld [vmem:[%s5225_s4] ss:$0 sm:$0xff]  ;;  %v2217_v20 = vld [vmem:[%s4681_s2 + $0x18] sm:$0xff] }
  0x58   : > { %4268 = vmatpush3.bf16.msra.mxu1 %v4267_v13  ;;  %v4853_v38 = vsel %vm2051_vm12, 1.0, %v4458_v12  ;;  %v2214_v15 = vld [vmem:[%s4681_s2] sm:$0xff]  ;;  %s5227_s10 = scalar_lea.vmem %s5226_s21, %s4638_s0 }
  0x59   : > { %4262 = vmatpush3.bf16.msra.mxu0 %v4261_v14  ;;  %4097 = vmatprep.subr.mxu1 %v4458_v12  ;;  %v4276_v19 = vpack.c.bf16 %v2215_v16, %v2214_v15 }
  0x5a   : > { %4269 = vmatprep.subr.bf16.mxu0 %v4456_v4  ;;  %s5233_s29 = scalar_lea.vmem %s5232_s16, %s4638_s0  ;;  %s5243_s16 = scalar_lea.vmem %s5242_s7, %s4638_s0 }
  0x5b   : > { %4079 = vmatmul.mubr.msk.f32.vlgmr.msra.gmra.mrb[0].mxu1 %vm1314_vm2, %v4798_v17 }
  0x5c   : > { %4068 = vmatmul.mubr.msk.f32.vlgmr.msra.gmra.mrb[0].mxu0 %vm1314_vm2, %v4798_v17  ;;  %4099 = vmatprep.mubr.msk.f32.mxu1 %vm4457_vm1, %v4458_v12 }
  0x5d   : > { %4271 = vmatpush3.bf16.msra.mxu0 %v4270_v18  ;;  %4089 = vmatprep.mubr.msk.f32.mxu0 %vm4457_vm1, %v4458_v12  ;;  %v2216_v18 = vld [vmem:[%s4681_s2 + $0x10] sm:$0xff] }
  0x5e   : > { %4272 = vmatprep.subr.bf16.mxu0 %v4456_v4 }
  0x61   : > { %4274 = vmatpush3.bf16.msra.mxu0 %v4273_v21  ;;  %v4279_v21 = vpack.c.bf16 %v2217_v20, %v2216_v18  ;;  %v3933_v18 = vld [vmem:[%s5235_s22] ss:$0 sm:$0xff] }
  0x62   : > { %4092 = vmatprep.subr.mxu0 %v4458_v12 }
  0x64   : > { %4090 = vmatmul.mubr.msk.f32.vlgmr.msra.gmra.mrb[2].mxu0 %vm1314_vm2, %v4798_v17 }
  0x65   : > { %4094 = vmatprep.mubr.msk.f32.mxu0 %vm4457_vm1, %v4458_v12 }
 0x12e   : > { %v1465_v26 = vpop.f32.mrb[0].mxu1 }
 0x12f   : > { %v1466_v27 = vadd.f32 %v3909_v24, %v1465_v26  ;;  %v1384_v28 = vpop.f32.mrb[0].mxu0  ;;  %v4080_v31 = vpop.f32.mrb[1].mxu1 }
 0x130   : > { %v1385_v32 = vadd.f32 %v3907_v25, %v1384_v28  ;;  %v4069_v33 = vpop.f32.mrb[1].mxu0 }
 0x131   : > { %4093 = vmatpush3.xpose.msk.msra.mxu0 %vm1314_vm2, %v1466_v27  ;;  %4098 = vmatpush3.xpose.msk.msra.mxu1 %vm1314_vm2, %v1466_v27 }
 0x132   : > { %v1557_v34 = vmul.f32 %v4829_v29, %v1385_v32  ;;  %v1652_v35 = vmul.f32 %v4832_v30, %v1385_v32  ;;  %4112 = vmatprep.subr.mxu1 %v4458_v12  ;;  %4102 = vmatprep.subr.mxu0 %v4458_v12  ;;  %v1889_v37 = vmul.f32 %v4840_v36, %v1385_v32 }
 0x133   : > { %v2054_v41 = vmul.f32 %v4853_v38, %v1385_v32 }
 0x134   : > { %4095 = vmatmul.mubr.msk.f32.vlgmr.msra.gmra.mrb[4].mxu0 %vm1314_vm2, %v1557_v34  ;;  %4100 = vmatmul.mubr.msk.f32.vlgmr.msra.gmra.mrb[2].mxu1 %vm1314_vm2, %v1652_v35 }
 0x135   : > { %4113 = vmatpush3.xpose.msk.msra.mxu1 %vm1314_vm2, %v1466_v27  ;;  %4114 = vmatprep.mubr.msk.f32.mxu1 %vm4457_vm1, %v4458_v12 }
 0x136   : > { %4122 = vmatprep.subr.mxu1 %v4458_v12  ;;  %4104 = vmatprep.mubr.msk.f32.mxu0 %vm4457_vm1, %v4458_v12 }
 0x137   : > { %v1546_v39 = vpop.f32.mrb[2].mxu0 }
 0x138   : > { %4115 = vmatmul.mubr.msk.f32.vlgmr.msra.gmra.mrb[4].mxu1 %vm1314_vm2, %v1889_v37  ;;  %v4091_v40 = vpop.f32.mrb[3].mxu0  ;;  %v4869_v43 = vadd.f32 %v3911_v42, %v1546_v39 }
 0x139   : > { %4123 = vmatpush3.xpose.msk.msra.mxu1 %vm1314_vm2, %v1466_v27  ;;  %4124 = vmatprep.mubr.msk.f32.mxu1 %vm4457_vm1, %v4458_v12 }
 0x13a   : > { %4275 = vmatprep.subr.bf16.mxu1 %v4456_v4  ;;  %v1737_v44 = vmul.f32 %v4832_v30, %v4869_v43  ;;  %v1646_v27 = vmul.f32 %v4829_v29, %v4869_v43  ;;  %v1974_v33 = vmul.f32 %v4840_v36, %v4869_v43  ;;  %v2139_v37 = vmul.f32 %v4853_v38, %v4869_v43  ;;  %v3929_v43 = vld [vmem:[%s5227_s10] ss:$0 sm:$0xff]  ;;  %s5236_s10 = sld [smem:[#allocation26_spill]] }
 0x13c   : > { %4125 = vmatmul.mubr.msk.f32.vlgmr.msra.gmra.mrb[6].mxu1 %vm1314_vm2, %v2054_v41  ;;  %4103 = vmatpush3.msra.mxu0 %v1737_v44 }
 0x13d   : > { %4140 = vmatprep.mubr.msk.f32.mxu1 %vm4457_vm1, %v4458_v12  ;;  %4107 = vmatprep.subr.mxu0 %v4458_v12 }
 0x13e   : > { %4277 = vmatpush3.bf16.msra.mxu1 %v4276_v19 }
 0x13f   : > { %4278 = vmatprep.subr.bf16.mxu1 %v4456_v4 }
 0x140   : > { %s5237_s23 = scalar_lea.vmem %s5236_s10, %s4638_s0 }
 0x142   : > { %4280 = vmatpush3.bf16.msra.mxu1 %v4279_v21 }
 0x143   : > { %4287 = vmatprep.subr.bf16.mxu1 %v4456_v4 }
 0x207   : > { %v1630_v45 = vpop.f32.mrb[4].mxu0  ;;  %v1722_v46 = vpop.f32.mrb[2].mxu1 }
 0x208   : > { %v4096_v47 = vpop.f32.mrb[5].mxu0  ;;  %v4101_v48 = vpop.f32.mrb[3].mxu1  ;;  %v1726_v49 = vsel %vm1634_vm13, %v1722_v46, -inf  ;;  %v1635_v53 = vsel %vm1634_vm13, %v1630_v45, -inf }
 0x209   : > { %1727 = vmax.xlane.f32.xlu0 %v1726_v49 }
 0x20b   : > { %v1959_v50 = vpop.f32.mrb[4].mxu1 }
 0x20c   : > { %v4116_v51 = vpop.f32.mrb[5].mxu1  ;;  %v1963_v52 = vsel %vm1634_vm13, %v1959_v50, -inf }
 0x20d   : > { %1964 = vmax.xlane.f32.xlu1 %v1963_v52  ;;  %1636 = vmax.xlane.f32.xlu0 %v1635_v53 }
 0x20f   : > { %v2124_v54 = vpop.f32.mrb[6].mxu1 }
 0x210   : > { %v4126_v55 = vpop.f32.mrb[7].mxu1  ;;  %v2128_v56 = vsel %vm1634_vm13, %v2124_v54, -inf }
 0x211   : > { %2129 = vmax.xlane.f32.xlu1 %v2128_v56  ;;  %v2414_v55 = vld [vmem:[%s4707_s6 + $0x8] sm:$0xff] }
 0x296   : > { %v1728_v57 = vpop.xlane.xlu0 %1727 }
 0x297   : > { %v1729_v58 = vsub.f32 %v1722_v46, %v1728_v57  ;;  %v2329_v57 = vld [vmem:[%s4698_s24] sm:$0xff] }
 0x299   : > { %v1730_v59 = vmul.f32 1.442695, %v1729_v58 }
 0x29a   : > { %v1965_v60 = vpop.xlane.xlu1 %1964  ;;  %v1637_v61 = vpop.xlane.xlu0 %1636 }
 0x29b   : > { %4378 = vpow2.f32 %v1730_v59  ;;  %v1966_v62 = vsub.f32 %v1959_v50, %v1965_v60  ;;  %v1638_v63 = vsub.f32 %v1630_v45, %v1637_v61  ;;  %v2415_v59 = vld [vmem:[%s4707_s6 + $0x10] sm:$0xff]  ;;  %v2416_v60 = vld [vmem:[%s4707_s6 + $0x18] sm:$0xff] }
 0x29c   : > { %v4291_v61 = vpack.c.bf16 %v2416_v60, %v2415_v59 }
 0x29d   : > { %v1967_v0 = vmul.f32 1.442695, %v1966_v62  ;;  %v1639_v1 = vmul.f32 1.442695, %v1638_v63  ;;  %v2331_v62 = vld [vmem:[%s4698_s24 + $0x10] sm:$0xff]  ;;  %v2332_v63 = vld [vmem:[%s4698_s24 + $0x18] sm:$0xff] }
 0x29e   : > { %v2130_v2 = vpop.xlane.xlu1 %2129 }
 0x29f   : > { %4380 = vpow2.f32 %v1967_v0  ;;  %v2131_v3 = vsub.f32 %v2124_v54, %v2130_v2  ;;  %v2413_v54 = vld [vmem:[%s4707_s6] sm:$0xff]  ;;  %v4285_v0 = vpack.c.bf16 %v2332_v63, %v2331_v62  ;;  %s5230_s6 = sld [smem:[#allocation21_spill]] }
 0x2a0   : > { %4382 = vpow2.f32 %v1639_v1  ;;  %v4288_v56 = vpack.c.bf16 %v2414_v55, %v2413_v54  ;;  %v1302_v1 = vld [vmem:[%s5229_s30] sm:$0xff]  ;;  %s5239_s30 = scalar_lea.vmem %s5238_s9, %s4638_s0 }
 0x2a1   : > { %v2132_v5 = vmul.f32 1.442695, %v2131_v3 }
 0x2a3   : > { %4384 = vpow2.f32 %v2132_v5 }
 0x2a5   : > { %v4379_v6 = vpop.eup %4378  ;;  %s5231_s5 = scalar_lea.vmem %s5230_s6, %s4638_s0  ;;  %s5241_s6 = scalar_lea.vmem %s5240_s11, %s4638_s0 }
 0x2a6   : > { %v1732_v7 = vsel %vm1634_vm13, %v4379_v6, 0.0 }
 0x2a7   : > { %1733 = vadd.xlane.f32.xlu0 %v1732_v7  ;;  %v3931_v7 = vld [vmem:[%s5231_s5] ss:$0 sm:$0xff] }
 0x2a9   : > { %v4381_v8 = vpop.eup %4380 }
 0x2aa   : > { %v4383_v9 = vpop.eup %4382  ;;  %v1969_v10 = vsel %vm1634_vm13, %v4381_v8, 0.0 }
 0x2ab   : > { %1970 = vadd.xlane.f32.xlu0 %v1969_v10  ;;  %v1641_v11 = vsel %vm1634_vm13, %v4383_v9, 0.0 }
 0x2ac   : > { %1642 = vadd.xlane.f32.xlu1 %v1641_v11 }
 0x2ad   : > { %v4385_v13 = vpop.eup %4384 }
 0x2ae   : > { %v2134_v14 = vsel %vm1634_vm13, %v4385_v13, 0.0 }
 0x2b0   : > { %2135 = vadd.xlane.f32.xlu1 %v2134_v14 }
 0x334   : > { %v1734_v22 = vpop.xlane.xlu0 %1733 }
 0x335   : > { %4386 = vrcp.f32 %v1734_v22 }
 0x338   : > { %v1971_v26 = vpop.xlane.xlu0 %1970 }
 0x339   : > { %v1643_v23 = vpop.xlane.xlu1 %1642 }
 0x33a   : > { %4388 = vrcp.f32 %v1643_v23 }
 0x33b   : > { %4390 = vrcp.f32 %v1971_v26  ;;  %v2497_v26 = vld [vmem:[%s4716_s26] sm:$0xff] }
 0x33d   : > { %v2136_v32 = vpop.xlane.xlu1 %2135 }
 0x33e   : > { %4392 = vrcp.f32 %v2136_v32  ;;  %v2500_v32 = vld [vmem:[%s4716_s26 + $0x18] sm:$0xff] }
 0x33f   : > { %v4387_v24 = vpop.eup %4386 }
 0x340   : > { %v1736_v25 = vmul.f32 %v4387_v24, %v4379_v6 }
 0x342   : > { %4105 = vmatmul.mubr.msk.f32.vlgmr.msra.gmra.mrb[6].mxu0 %vm1634_vm13, %v1736_v25 }
 0x343   : > { %4108 = vmatpush3.msra.mxu0 %v1646_v27  ;;  %4109 = vmatprep.mubr.msk.f32.mxu0 %vm4457_vm1, %v4458_v12  ;;  %v2498_v27 = vld [vmem:[%s4716_s26 + $0x8] sm:$0xff] }
 0x344   : > { %4117 = vmatprep.subr.mxu0 %v4458_v12  ;;  %v4389_v28 = vpop.eup %4388 }
 0x345   : > { %v1645_v31 = vmul.f32 %v4389_v28, %v4383_v9  ;;  %v4391_v34 = vpop.eup %4390  ;;  %v3932_v9 = vld [vmem:[%s5233_s29] ss:$0 sm:$0xff]  ;;  %v2499_v28 = vld [vmem:[%s4716_s26 + $0x10] sm:$0xff] }
 0x346   : > { %v1973_v35 = vmul.f32 %v4391_v34, %v4381_v8 }
 0x348   : > { %v4393_v39 = vpop.eup %4392 }
 0x349   : > { %v2138_v40 = vmul.f32 %v4393_v39, %v4385_v13  ;;  %v3935_v13 = vld [vmem:[%s5234_s3] ss:$0 sm:$0xff]  ;;  %s5245_s3 = scalar_lea.vmem %s5244_s17, %s4638_s0 }
 0x34a   : > { %4110 = vmatmul.mubr.msk.f32.vlgmr.msra.gmra.mrb[6].mxu0 %vm1634_vm13, %v1645_v31  ;;  %v4294_v31 = vpack.c.bf16 %v2498_v27, %v2497_v26 }
 0x34b   : > { %4118 = vmatpush3.msra.mxu0 %v1974_v33  ;;  %4119 = vmatprep.mubr.msk.f32.mxu0 %vm4457_vm1, %v4458_v12  ;;  %v4297_v33 = vpack.c.bf16 %v2500_v32, %v2499_v28 }
 0x34c   : > { %4127 = vmatprep.subr.mxu0 %v4458_v12 }
 0x352   : > { %4120 = vmatmul.mubr.msk.f32.vlgmr.msra.gmra.mrb[6].mxu0 %vm1634_vm13, %v1973_v35 }
 0x353   : > { %4128 = vmatpush3.msra.mxu0 %v2139_v37  ;;  %4129 = vmatprep.mubr.msk.f32.mxu0 %vm4457_vm1, %v4458_v12 }
 0x354   : > { %4281 = vmatprep.subr.bf16.mxu0 %v4456_v4 }
 0x35a   : > { %4130 = vmatmul.mubr.msk.f32.vlgmr.msra.gmra.mrb[6].mxu0 %vm1634_vm13, %v2138_v40 }
 0x35b   : > { %4151 = vmatprep.mubr.msk.f32.mxu0 %vm4457_vm1, %v4458_v12 }
 0x42d   : > { %v2209_v41 = vpop.f32.mrb[6].mxu0 }
 0x42e   : > { %v4131_v42 = vpop.f32.mrb[7].mxu0  ;;  %4141 = vmatmul.mubr.msk.f32.vlgmr.msra.gmra.mrb[8].mxu1 %vm1314_vm2, %v2209_v41 }
 0x42f   : > { %4162 = vmatprep.mubr.msk.f32.mxu1 %vm4457_vm1, %v4458_v12  ;;  %4289 = vmatpush3.bf16.msra.mxu1 %v4288_v56 }
 0x430   : > { %4290 = vmatprep.subr.bf16.mxu1 %v4456_v4 }
 0x433   : > { %4292 = vmatpush3.bf16.msra.mxu1 %v4291_v61 }
 0x434   : > { %4176 = vmatprep.subr.mxu1 %v4458_v12 }
 0x436   : > { %4163 = vmatmul.mubr.msk.f32.vlgmr.msra.gmra.mrb[10].mxu1 %vm1314_vm2, %v1302_v1 }
 0x437   : > { %4178 = vmatprep.mubr.msk.f32.mxu1 %vm4457_vm1, %v4458_v12 }
 0x501   : > { %v2294_v44 = vpop.f32.mrb[8].mxu1 }
 0x502   : > { %v2295_v45 = vadd.f32 %v3929_v43, %v2294_v44  ;;  %v4142_v46 = vpop.f32.mrb[9].mxu1 }
 0x504   : > { %v2298_v47 = vadd.f32 %v2295_v45, %v4798_v17  ;;  %v2330_v17 = vld [vmem:[%s4698_s24 + $0x8] sm:$0xff] }
 0x505   : > { %v4282_v58 = vpack.c.bf16 %v2330_v17, %v2329_v57 }
 0x506   : > { %v2301_v48 = vsel %vm1314_vm2, %v2298_v47, 0.0 }
 0x507   : > { %2302 = vadd.xlane.f32.xlu0 %v2301_v48  ;;  %4283 = vmatpush3.bf16.msra.mxu0 %v4282_v58 }
 0x508   : > { %4284 = vmatprep.subr.bf16.mxu0 %v4456_v4 }
 0x509   : > { %v2493_v14 = vpop.f32.mrb[10].mxu1 }
 0x50a   : > { %v2494_v15 = vadd.f32 %v3935_v13, %v2493_v14  ;;  %v4164_v16 = vpop.f32.mrb[11].mxu1  ;;  %v3221_v13 = vld [vmem:[%s4725_s1 + $0x10] sm:$0xff] }
 0x50b   : > { %4286 = vmatpush3.bf16.msra.mxu0 %v4285_v0 }
 0x50c   : > { %4293 = vmatprep.subr.bf16.mxu0 %v4456_v4  ;;  %4177 = vmatpush3.xpose.msk.msra.mxu1 %vm1314_vm2, %v2494_v15 }
 0x50d   : > { %4181 = vmatprep.subr.mxu1 %v4458_v12 }
 0x594   : > { %v2303_v49 = vpop.xlane.xlu0 %2302 }
 0x595   : > { %v2305_v50 = vmul.f32 0.03125, %v2303_v49 }
 0x597   : > { %v2306_v51 = vsub.f32 %v2298_v47, %v2305_v50 }
 0x599   : > { %v2307_v52 = vmul.f32 %v2306_v51, %v2306_v51 }
 0x59b   : > { %v2308_v53 = vsel %vm1314_vm2, %v2307_v52, 0.0 }
 0x59c   : > { %2309 = vadd.xlane.f32.xlu1 %v2308_v53 }
 0x629   : > { %v2310_v2 = vpop.xlane.xlu1 %2309 }
 0x62a   : > { %v2311_v3 = vmul.f32 0.03125, %v2310_v2 }
 0x62c   : > { %v2312_v5 = vadd.f32 1e-05, %v2311_v3  ;;  %v3937_v3 = vld [vmem:[%s5237_s23] ss:$0 sm:$0xff] }
 0x62e   : > { %4394 = vrsqrt.f32 %v2312_v5 }
 0x638   : > { %v4395_v6 = vpop.eup %4394 }
 0x639   : > { %v2314_v8 = vmul.f32 %v4395_v6, %v2306_v51 }
 0x63b   : > { %v2321_v10 = vmul.f32 %v3931_v7, %v2314_v8 }
 0x63d   : > { %v4950_v11 = vadd.f32 %v3932_v9, %v2321_v10  ;;  %v3219_v9 = vld [vmem:[%s4725_s1] sm:$0xff]  ;;  %v3220_v10 = vld [vmem:[%s4725_s1 + $0x8] sm:$0xff] }
 0x63e   : > { %v4300_v14 = vpack.c.bf16 %v3220_v10, %v3219_v9 }
 0x63f   : > { %4152 = vmatmul.mubr.msk.f32.vlgmr.msra.gmra.mrb[8].mxu0 %vm1314_vm2, %v4950_v11 }
 0x640   : > { %4173 = vmatprep.mubr.msk.f32.mxu0 %vm4457_vm1, %v4458_v12  ;;  %4295 = vmatpush3.bf16.msra.mxu0 %v4294_v31 }
 0x641   : > { %4296 = vmatprep.subr.bf16.mxu0 %v4456_v4 }
 0x644   : > { %4298 = vmatpush3.bf16.msra.mxu0 %v4297_v33 }
 0x645   : > { %4186 = vmatprep.subr.mxu0 %v4458_v12 }
 0x647   : > { %4174 = vmatmul.mubr.msk.f32.vlgmr.msra.gmra.mrb[10].mxu0 %vm1314_vm2, %v1302_v1 }
 0x648   : > { %4188 = vmatprep.mubr.msk.f32.mxu0 %vm4457_vm1, %v4458_v12 }
 0x712   : > { %v2409_v19 = vpop.f32.mrb[8].mxu0 }
 0x713   : > { %v2410_v20 = vadd.f32 %v3933_v18, %v2409_v19  ;;  %v4153_v21 = vpop.f32.mrb[9].mxu0 }
 0x715   : > { %v2578_v22 = vmul.f32 %v4829_v29, %v2410_v20  ;;  %v2667_v23 = vmul.f32 %v4832_v30, %v2410_v20  ;;  %v2899_v24 = vmul.f32 %v4840_v36, %v2410_v20  ;;  %v3059_v25 = vmul.f32 %v4853_v38, %v2410_v20 }
 0x717   : > { %4179 = vmatmul.mubr.msk.f32.vlgmr.msra.gmra.mrb[12].mxu1 %vm1314_vm2, %v2578_v22 }
 0x718   : > { %4182 = vmatpush3.xpose.msk.msra.mxu1 %vm1314_vm2, %v2494_v15  ;;  %4183 = vmatprep.mubr.msk.f32.mxu1 %vm4457_vm1, %v4458_v12 }
 0x719   : > { %4196 = vmatprep.subr.mxu1 %v4458_v12 }
 0x71a   : > { %v2574_v5 = vpop.f32.mrb[10].mxu0 }
 0x71b   : > { %4184 = vmatmul.mubr.msk.f32.vlgmr.msra.gmra.mrb[14].mxu1 %vm1314_vm2, %v2667_v23  ;;  %v2575_v6 = vadd.f32 %v3937_v3, %v2574_v5  ;;  %v4175_v7 = vpop.f32.mrb[11].mxu0  ;;  %v3425_v3 = vld [vmem:[%s4752_s19 + $0x38] sm:$0xff] }
 0x71c   : > { %4197 = vmatpush3.xpose.msk.msra.mxu1 %vm1314_vm2, %v2494_v15  ;;  %4198 = vmatprep.mubr.msk.f32.mxu1 %vm4457_vm1, %v4458_v12 }
 0x71d   : > { %4206 = vmatprep.subr.mxu1 %v4458_v12  ;;  %v2752_v8 = vmul.f32 %v4832_v30, %v2575_v6  ;;  %v2666_v20 = vmul.f32 %v4829_v29, %v2575_v6  ;;  %v2984_v26 = vmul.f32 %v4840_v36, %v2575_v6  ;;  %v3144_v28 = vmul.f32 %v4853_v38, %v2575_v6  ;;  %v3951_v38 = vld [vmem:[%s5239_s30] ss:$0 sm:$0xff] }
 0x71e   : > { %v3955_v6 = vld [vmem:[%s5245_s3] ss:$0 sm:$0xff] }
 0x71f   : > { %4199 = vmatmul.mubr.msk.f32.vlgmr.msra.gmra.mrb[16].mxu1 %vm1314_vm2, %v2899_v24  ;;  %4187 = vmatpush3.msra.mxu0 %v2752_v8 }
 0x720   : > { %4207 = vmatpush3.xpose.msk.msra.mxu1 %vm1314_vm2, %v2494_v15  ;;  %4208 = vmatprep.mubr.msk.f32.mxu1 %vm4457_vm1, %v4458_v12  ;;  %v3222_v15 = vld [vmem:[%s4725_s1 + $0x18] sm:$0xff] }
 0x721   : > { %4299 = vmatprep.subr.bf16.mxu1 %v4456_v4  ;;  %4191 = vmatprep.subr.mxu0 %v4458_v12  ;;  %v4303_v16 = vpack.c.bf16 %v3222_v15, %v3221_v13  ;;  %v3957_v13 = vld [vmem:[%s1283_s12] ss:$0 sm:$0xff] }
 0x723   : > { %4209 = vmatmul.mubr.msk.f32.vlgmr.msra.gmra.mrb[18].mxu1 %vm1314_vm2, %v3059_v25 }
 0x724   : > { %4224 = vmatprep.mubr.msk.f32.mxu1 %vm4457_vm1, %v4458_v12  ;;  %4301 = vmatpush3.bf16.msra.mxu1 %v4300_v14 }
 0x725   : > { %4302 = vmatprep.subr.bf16.mxu1 %v4456_v4 }
 0x728   : > { %4304 = vmatpush3.bf16.msra.mxu1 %v4303_v16 }
 0x729   : > { %4311 = vmatprep.subr.bf16.mxu1 %v4456_v4 }
 0x7ea   : > { %v2651_v34 = vpop.f32.mrb[12].mxu1 }
 0x7eb   : > { %v4180_v35 = vpop.f32.mrb[13].mxu1  ;;  %v2655_v37 = vsel %vm1634_vm13, %v2651_v34, -inf }
 0x7ec   : > { %2656 = vmax.xlane.f32.xlu1 %v2655_v37 }
 0x7ee   : > { %v2737_v39 = vpop.f32.mrb[14].mxu1 }
 0x7ef   : > { %v4185_v40 = vpop.f32.mrb[15].mxu1  ;;  %v2741_v41 = vsel %vm1634_vm13, %v2737_v39, -inf }
 0x7f0   : > { %2742 = vmax.xlane.f32.xlu0 %v2741_v41 }
 0x7f2   : > { %v2969_v42 = vpop.f32.mrb[16].mxu1 }
 0x7f3   : > { %v4200_v43 = vpop.f32.mrb[17].mxu1  ;;  %v2973_v44 = vsel %vm1634_vm13, %v2969_v42, -inf }
 0x7f4   : > { %2974 = vmax.xlane.f32.xlu0 %v2973_v44 }
 0x7f6   : > { %v3129_v45 = vpop.f32.mrb[18].mxu1 }
 0x7f7   : > { %v4210_v46 = vpop.f32.mrb[19].mxu1  ;;  %v3133_v47 = vsel %vm1634_vm13, %v3129_v45, -inf }
 0x7f8   : > { %3134 = vmax.xlane.f32.xlu1 %v3133_v47  ;;  %v3334_v46 = vld [vmem:[%s4742_s28 + $0x8] sm:$0xff] }
 0x879   : > { %v2657_v48 = vpop.xlane.xlu1 %2656 }
 0x87a   : > { %v2658_v49 = vsub.f32 %v2651_v34, %v2657_v48  ;;  %v3336_v48 = vld [vmem:[%s4742_s28 + $0x18] sm:$0xff] }
 0x87c   : > { %v2659_v50 = vmul.f32 1.442695, %v2658_v49 }
 0x87d   : > { %v2743_v51 = vpop.xlane.xlu0 %2742 }
 0x87e   : > { %4396 = vpow2.f32 %v2659_v50  ;;  %v2744_v52 = vsub.f32 %v2737_v39, %v2743_v51  ;;  %v3418_v50 = vld [vmem:[%s4752_s19] sm:$0xff]  ;;  %v3419_v51 = vld [vmem:[%s4752_s19 + $0x8] sm:$0xff] }
 0x880   : > { %v2745_v53 = vmul.f32 1.442695, %v2744_v52  ;;  %v3420_v52 = vld [vmem:[%s4752_s19 + $0x10] sm:$0xff] }
 0x881   : > { %v2975_v54 = vpop.xlane.xlu0 %2974 }
 0x882   : > { %4398 = vpow2.f32 %v2745_v53  ;;  %v2976_v55 = vsub.f32 %v2969_v42, %v2975_v54  ;;  %v4312_v53 = vpack.c.bf16 %v3419_v51, %v3418_v50  ;;  %v3421_v54 = vld [vmem:[%s4752_s19 + $0x18] sm:$0xff] }
 0x884   : > { %v2977_v56 = vmul.f32 1.442695, %v2976_v55  ;;  %v4315_v55 = vpack.c.bf16 %v3421_v54, %v3420_v52 }
 0x885   : > { %v3135_v57 = vpop.xlane.xlu1 %3134 }
 0x886   : > { %4400 = vpow2.f32 %v2977_v56  ;;  %v3136_v17 = vsub.f32 %v3129_v45, %v3135_v57  ;;  %v3333_v45 = vld [vmem:[%s4742_s28] sm:$0xff]  ;;  %v3423_v57 = vld [vmem:[%s4752_s19 + $0x28] sm:$0xff] }
 0x887   : > { %v4306_v47 = vpack.c.bf16 %v3334_v46, %v3333_v45  ;;  %v3422_v56 = vld [vmem:[%s4752_s19 + $0x20] sm:$0xff] }
 0x888   : > { %v4397_v58 = vpop.eup %4396  ;;  %v3137_v59 = vmul.f32 1.442695, %v3136_v17  ;;  %v4318_v17 = vpack.c.bf16 %v3423_v57, %v3422_v56 }
 0x889   : > { %v2661_v60 = vsel %vm1634_vm13, %v4397_v58, 0.0 }
 0x88a   : > { %4402 = vpow2.f32 %v3137_v59  ;;  %2662 = vadd.xlane.f32.xlu1 %v2661_v60 }
 0x88c   : > { %v4399_v61 = vpop.eup %4398 }
 0x88d   : > { %v2747_v62 = vsel %vm1634_vm13, %v4399_v61, 0.0 }
 0x88e   : > { %2748 = vadd.xlane.f32.xlu0 %v2747_v62  ;;  %v3953_v62 = vld [vmem:[%s5241_s6] ss:$0 sm:$0xff] }
 0x890   : > { %v4401_v63 = vpop.eup %4400 }
 0x891   : > { %v2979_v0 = vsel %vm1634_vm13, %v4401_v63, 0.0 }
 0x892   : > { %2980 = vadd.xlane.f32.xlu0 %v2979_v0  ;;  %v3954_v0 = vld [vmem:[%s5243_s16] ss:$0 sm:$0xff] }
 0x894   : > { %v4403_v1 = vpop.eup %4402 }
 0x895   : > { %v3139_v2 = vsel %vm1634_vm13, %v4403_v1, 0.0 }
 0x896   : > { %3140 = vadd.xlane.f32.xlu1 %v3139_v2  ;;  %v3424_v2 = vld [vmem:[%s4752_s19 + $0x30] sm:$0xff] }
 0x897   : > { %v4321_v5 = vpack.c.bf16 %v3425_v3, %v3424_v2 }
 0x917   : > { %v2663_v19 = vpop.xlane.xlu1 %2662 }
 0x91b   : > { %v2749_v18 = vpop.xlane.xlu0 %2748 }
 0x91c   : > { %4404 = vrcp.f32 %v2749_v18 }
 0x91d   : > { %4406 = vrcp.f32 %v2663_v19 }
 0x91f   : > { %v2981_v22 = vpop.xlane.xlu0 %2980 }
 0x920   : > { %4408 = vrcp.f32 %v2981_v22 }
 0x923   : > { %v3141_v25 = vpop.xlane.xlu1 %3140 }
 0x924   : > { %4410 = vrcp.f32 %v3141_v25 }
 0x926   : > { %v4405_v30 = vpop.eup %4404 }
 0x927   : > { %v2751_v21 = vmul.f32 %v4405_v30, %v4399_v61  ;;  %v4407_v23 = vpop.eup %4406 }
 0x928   : > { %v2665_v24 = vmul.f32 %v4407_v23, %v4397_v58 }
 0x929   : > { %4189 = vmatmul.mubr.msk.f32.vlgmr.msra.gmra.mrb[12].mxu0 %vm1634_vm13, %v2751_v21 }
 0x92a   : > { %4192 = vmatpush3.msra.mxu0 %v2666_v20  ;;  %4193 = vmatprep.mubr.msk.f32.mxu0 %vm4457_vm1, %v4458_v12  ;;  %v4409_v29 = vpop.eup %4408 }
 0x92b   : > { %4201 = vmatprep.subr.mxu0 %v4458_v12  ;;  %v2983_v27 = vmul.f32 %v4409_v29, %v4401_v63 }
 0x92e   : > { %v4411_v36 = vpop.eup %4410 }
 0x92f   : > { %v3143_v31 = vmul.f32 %v4411_v36, %v4403_v1  ;;  %v3960_v36 = vld [vmem:[%s1289_s20] ss:$0 sm:$0xff] }
 0x931   : > { %4194 = vmatmul.mubr.msk.f32.vlgmr.msra.gmra.mrb[12].mxu0 %vm1634_vm13, %v2665_v24 }
 0x932   : > { %4202 = vmatpush3.msra.mxu0 %v2984_v26  ;;  %4203 = vmatprep.mubr.msk.f32.mxu0 %vm4457_vm1, %v4458_v12 }
 0x933   : > { %4211 = vmatprep.subr.mxu0 %v4458_v12 }
 0x939   : > { %4204 = vmatmul.mubr.msk.f32.vlgmr.msra.gmra.mrb[12].mxu0 %vm1634_vm13, %v2983_v27  ;;  %v3959_v27 = vld [vmem:[%s1286_s14] ss:$0 sm:$0xff] }
 0x93a   : > { %4212 = vmatpush3.msra.mxu0 %v3144_v28  ;;  %4213 = vmatprep.mubr.msk.f32.mxu0 %vm4457_vm1, %v4458_v12 }
 0x93b   : > { %4305 = vmatprep.subr.bf16.mxu0 %v4456_v4 }
 0x941   : > { %4214 = vmatmul.mubr.msk.f32.vlgmr.msra.gmra.mrb[12].mxu0 %vm1634_vm13, %v3143_v31 }
 0x942   : > { %4235 = vmatprep.mubr.msk.f32.mxu0 %vm4457_vm1, %v4458_v12  ;;  %4307 = vmatpush3.bf16.msra.mxu0 %v4306_v47 }
 0x943   : > { %4308 = vmatprep.subr.bf16.mxu0 %v4456_v4 }
 0xa14   : > { %v3214_v32 = vpop.f32.mrb[12].mxu0 }
 0xa15   : > { %v4215_v33 = vpop.f32.mrb[13].mxu0  ;;  %4225 = vmatmul.mubr.msk.f32.vlgmr.msra.gmra.mrb[20].mxu1 %vm1314_vm2, %v3214_v32 }
 0xa16   : > { %4254 = vmatprep.mubr.msk.f32.mxu1 %vm4457_vm1, %v4458_v12  ;;  %4313 = vmatpush3.bf16.msra.mxu1 %v4312_v53 }
 0xa17   : > { %4314 = vmatprep.subr.bf16.mxu1 %v4456_v4 }
 0xa1a   : > { %4316 = vmatpush3.bf16.msra.mxu1 %v4315_v55 }
 0xa1b   : > { %4317 = vmatprep.subr.bf16.mxu1 %v4456_v4 }
 0xa1e   : > { %4319 = vmatpush3.bf16.msra.mxu1 %v4318_v17 }
 0xa1f   : > { %4320 = vmatprep.subr.bf16.mxu1 %v4456_v4 }
 0xa22   : > { %4322 = vmatpush3.bf16.msra.mxu1 %v4321_v5 }
 0xae8   : > { %v3299_v34 = vpop.f32.mrb[20].mxu1 }
 0xae9   : > { %v3300_v35 = vadd.f32 %v3951_v38, %v3299_v34  ;;  %v4226_v37 = vpop.f32.mrb[21].mxu1 }
 0xaeb   : > { %v3303_v39 = vadd.f32 %v3300_v35, %v4950_v11  ;;  %v3335_v11 = vld [vmem:[%s4742_s28 + $0x10] sm:$0xff] }
 0xaec   : > { %v4309_v49 = vpack.c.bf16 %v3336_v48, %v3335_v11 }
 0xaed   : > { %v3306_v40 = vsel %vm1314_vm2, %v3303_v39, 0.0 }
 0xaee   : > { %3307 = vadd.xlane.f32.xlu0 %v3306_v40  ;;  %4310 = vmatpush3.bf16.msra.mxu0 %v4309_v49 }
 0xb7b   : > { %v3308_v41 = vpop.xlane.xlu0 %3307 }
 0xb7c   : > { %v3309_v42 = vmul.f32 0.03125, %v3308_v41 }
 0xb7e   : > { %v3310_v12 = vsub.f32 %v3303_v39, %v3309_v42 }
 0xb80   : > { %v3311_v43 = vmul.f32 %v3310_v12, %v3310_v12 }
 0xb82   : > { %v3312_v44 = vsel %vm1314_vm2, %v3311_v43, 0.0 }
 0xb83   : > { %3313 = vadd.xlane.f32.xlu1 %v3312_v44 }
 0xc10   : > { %v3314_v58 = vpop.xlane.xlu1 %3313 }
 0xc11   : > { %v3315_v59 = vmul.f32 0.03125, %v3314_v58 }
 0xc13   : > { %v3316_v60 = vadd.f32 1e-05, %v3315_v59 }
 0xc15   : > { %4412 = vrsqrt.f32 %v3316_v60 }
 0xc1f   : > { %v4413_v61 = vpop.eup %4412 }
 0xc20   : > { %v3318_v63 = vmul.f32 %v4413_v61, %v3310_v12 }
 0xc22   : > { %v3325_v1 = vmul.f32 %v3953_v62, %v3318_v63 }
 0xc24   : > { %v3332_v4 = vadd.f32 %v3954_v0, %v3325_v1 }
 0xc26   : > { %4236 = vmatmul.mubr.msk.f32.vlgmr.msra.gmra.mrb[14].mxu0 %vm1314_vm2, %v3332_v4 }
 0xcf9   : > { %v3413_v7 = vpop.f32.mrb[14].mxu0 }
 0xcfa   : > { %v3414_v8 = vadd.f32 %v3955_v6, %v3413_v7  ;;  %v4237_v9 = vpop.f32.mrb[15].mxu0 }
 0xcfc   : > { %v3417_v10 = vmax.f32 %v3414_v8, 0.0 }
 0xcfe   : > { %4255 = vmatmul.mubr.msk.f32.vlgmr.msra.gmra.mrb[22].mxu1 %vm3433_vm14, %v3417_v10 }
 0xdd1   : > { %v3503_v14 = vpop.f32.mrb[22].mxu1 }
 0xdd2   : > { %v3504_v15 = vadd.f32 %v3957_v13, %v3503_v14  ;;  %v4256_v16 = vpop.f32.mrb[23].mxu1 }
 0xdd4   : > { %v3507_v18 = vadd.f32 %v3504_v15, %v3332_v4 }
 0xdd6   : > { %v3510_v19 = vsel %vm1314_vm2, %v3507_v18, 0.0 }
 0xdd7   : > { %3511 = vadd.xlane.f32.xlu0 %v3510_v19 }
 0xe64   : > { %v3512_v30 = vpop.xlane.xlu0 %3511 }
 0xe65   : > { %v3513_v20 = vmul.f32 0.03125, %v3512_v30 }
 0xe67   : > { %v3514_v21 = vsub.f32 %v3507_v18, %v3513_v20 }
 0xe69   : > { %v3515_v22 = vmul.f32 %v3514_v21, %v3514_v21 }
 0xe6b   : > { %v3516_v23 = vsel %vm1314_vm2, %v3515_v22, 0.0 }
 0xe6c   : > { %3517 = vadd.xlane.f32.xlu1 %v3516_v23 }
 0xef9   : > { %v3518_v24 = vpop.xlane.xlu1 %3517 }
 0xefa   : > { %v3519_v25 = vmul.f32 0.03125, %v3518_v24 }
 0xefc   : > { %v3520_v26 = vadd.f32 1e-05, %v3519_v25 }
 0xefe   : > { %4414 = vrsqrt.f32 %v3520_v26 }
 0xf08   : > { %v4415_v29 = vpop.eup %4414 }
 0xf09   : > { %v3522_v28 = vmul.f32 %v4415_v29, %v3514_v21 }
 0xf0b   : > { %v3529_v31 = vmul.f32 %v3959_v27, %v3522_v28 }
 0xf0d   : > { %v3536_v32 = vadd.f32 %v3960_v36, %v3529_v31 }
 0xf0f   : > { %3537 = vst.msk [vmem:[%s4770_s18] sm:$0xff] %vm1314_vm2, %v3536_v32 }
 0xf10 PF: > { %s5249_s1 = sld [smem:[#allocation5_spill]]  ;;  %s5250_s8 = sld [smem:[#allocation3_spill]] }
 0xf11   : > { %s5251_s5 = sld [smem:[#allocation4_spill]]  ;;  %s5252_s9 = sld [smem:[#allocation6_spill]] }
 0xf12   : > { %s5253_s30 = sld [smem:[#allocation7_spill]] }
 0xf16   : > { %s38_s3 = sadd.s32 1, %s5249_s1  }
 0xf17   : > { %p35_p8 = scmp.ge.s32.totalorder %s38_s3, 6  }
 0xf19   :  { %37 = sbr.rel (!%p35_p8) target bundleno = 28 (0x1c), region = 247 }

</bundles_post_ra>
